<compile_context>
chip_gen: v5e
topology: v5e:2x2
jax: 0.10.0
libtpu: 0.0.40
codegen_flags: <defaults>
</compile_context>

<pallas_src>
import math

import jax
import jax.numpy as jnp
from jax.experimental import pallas as pl
from jax.experimental.pallas import tpu as pltpu

# ----------------------------- small config ---------------------------------
BATCH = 2
SEQ = 1
CHANNELS = 3
IMG_HW = 32
VIT_PATCH = 8                        # stand-in ViT patch size (real: 16)
PATCH_GRID = IMG_HW // VIT_PATCH     # 4
N_PATCHES = PATCH_GRID ** 2          # 16 (real: 196)
PATCH_DIM = CHANNELS * VIT_PATCH * VIT_PATCH
IMG_FEAT_DIM = 64                    # real: 768
HIDDEN_SIZE = 32                     # real: 512 (cond_dim / CLIP text dim)
ACTION_DIM = 2
ACTION_HORIZON = 8                   # real: 30
N_EMB = 32                           # real: 768
N_HEAD = 4                           # real: 12
HEAD_DIM = N_EMB // N_HEAD
N_LAYER = 2                          # real: 12
CLIP_VOCAB = 64
LANG_LEN = 8
LN_EPS = 1e-5
N_COND_TOKENS = SEQ * N_PATCHES + 1  # patch tokens + language token
T_COND = 1 + N_COND_TOKENS           # + time token
OUT_PAD = 128                        # lane-dense padded head output width


# --------------------------- in-kernel math helpers --------------------------
def _mm(a, b):
    """MXU matmul: bf16 operands, f32 accumulation."""
    return jnp.dot(a.astype(jnp.bfloat16), b.astype(jnp.bfloat16),
                   preferred_element_type=jnp.float32)


def _mm_t(a, b):
    """a @ b.T without materializing a transpose (contract last dims)."""
    return jax.lax.dot_general(
        a.astype(jnp.bfloat16), b.astype(jnp.bfloat16),
        dimension_numbers=(((1,), (1,)), ((), ())),
        preferred_element_type=jnp.float32)


def _layernorm(x, g, b):
    mu = jnp.mean(x, axis=-1, keepdims=True)
    xc = x - mu
    var = jnp.mean(xc * xc, axis=-1, keepdims=True)
    return xc * jax.lax.rsqrt(var + LN_EPS) * g + b


def _erf(x):
    # Abramowitz & Stegun 7.1.26 polynomial (|err| < 1.5e-7); uses only exp/abs.
    a1, a2, a3, a4, a5 = 0.254829592, -0.284496736, 1.421413741, -1.453152027, 1.061405429
    p = 0.3275911
    s = jnp.where(x >= 0.0, 1.0, -1.0)
    ax = jnp.abs(x)
    t = 1.0 / (1.0 + p * ax)
    poly = ((((a5 * t + a4) * t + a3) * t + a2) * t + a1) * t
    return s * (1.0 - poly * jnp.exp(-ax * ax))


def _gelu(x):
    # exact (erf) GELU, matching F.gelu(approximate='none')
    return 0.5 * x * (1.0 + _erf(x * (1.0 / math.sqrt(2.0))))


def _mish(x):
    # x * tanh(softplus(x)), numerically stable softplus
    sp = jnp.maximum(x, 0.0) + jnp.log(1.0 + jnp.exp(-jnp.abs(x)))
    return x * jnp.tanh(sp)


def _mha(q, k, v, bias, wo, bo):
    """Multi-head attention (q pre-scaled) with the output projection folded
    into the per-head loop (no lane concat of heads)."""
    out = None
    for h in range(N_HEAD):
        sl = slice(h * HEAD_DIM, (h + 1) * HEAD_DIM)
        s = _mm_t(q[:, sl], k[:, sl]) + bias
        s = s - jnp.max(s, axis=-1, keepdims=True)
        e = jnp.exp(s)
        p = e * pl.reciprocal(jnp.sum(e, axis=-1, keepdims=True), approx=True)
        head = _mm(p, v[:, sl])                     # (Tq, Dh)
        part = _mm(head, wo[sl, :])                 # head's slice of W_o -> (Tq, E)
        out = part if out is None else out + part
    return out + bo


# ----------------------------- fused Pallas kernel ---------------------------
def _policy_kernel(patches_ref, tok_ref, time_ref, sample_ref,
                   clip_w_ref, clip_b_ref,
                   mae_w_ref, mae_b_ref, proj_w_ref, proj_b_ref,
                   in_w_ref, in_b_ref, pos_ref,
                   cobs_w_ref, cobs_b_ref, cpos_ref,
                   enc_w1_ref, enc_b1_ref, enc_w2_ref, enc_b2_ref,
                   ln_g_ref, ln_b_ref,
                   sa_wqkv_ref, sa_bqkv_ref, sa_wo_ref, sa_bo_ref,
                   ca_wq_ref, ca_bq_ref, ca_wkv_ref, ca_bkv_ref, ca_wo_ref, ca_bo_ref,
                   ff_w1_ref, ff_b1_ref, ff_w2_ref, ff_b2_ref,
                   lnf_g_ref, lnf_b_ref, head_w_ref, head_b_ref,
                   noise_ref, lang_ref, obs_ref, patch_ref):
    E = N_EMB
    T = ACTION_HORIZON
    S = T_COND
    NEG = -1e30
    scale = 1.0 / math.sqrt(HEAD_DIM)

    # ---- stage 1: frozen-encoder stand-ins (all VMEM resident) --------------
    # CLIP text stand-in: pooled token embedding -> projection
    pooled = jnp.mean(tok_ref[0], axis=0, keepdims=True)                 # (1, Hc)
    lang = _mm(pooled, clip_w_ref[...]) + clip_b_ref[...]                # (1, Hc)
    lang_ref[0] = lang

    # MAE stand-in: patch-embed matmul, mean-pool obs feature, proj_static_img
    pf = _mm(patches_ref[0], mae_w_ref[...]) + mae_b_ref[...]            # (S*P, F)
    if SEQ == 1:
        obs_ref[0] = jnp.mean(pf, axis=0, keepdims=True)                 # (1, F)
    else:
        obs_ref[0] = jnp.mean(
            pf.reshape(SEQ, N_PATCHES, IMG_FEAT_DIM), axis=1)            # (S, F)
    pp = _mm(pf, proj_w_ref[...]) + proj_b_ref[...]                      # (S*P, Hc)
    patch_ref[0] = pp

    # ---- stage 2: TransformerForDiffusion ------------------------------------
    # attention masks generated in-kernel from iota (no HBM mask operands)
    qi = jax.lax.broadcasted_iota(jnp.int32, (T, T), 0)
    ki = jax.lax.broadcasted_iota(jnp.int32, (T, T), 1)
    causal_bias = jnp.where(ki > qi, NEG, 0.0)                           # mask k > q
    qm = jax.lax.broadcasted_iota(jnp.int32, (T, S), 0)
    km = jax.lax.broadcasted_iota(jnp.int32, (T, S), 1)
    mem_bias = jnp.where(km > qm + 1, NEG, 0.0)                          # allow t >= s-1

    # condition path: [patch tokens ; lang token] -> cond emb, prepend time token
    cond_tok = jnp.concatenate([pp, lang], axis=0)                       # (Nc, Hc)
    cond_emb = _mm(cond_tok, cobs_w_ref[...]) + cobs_b_ref[...]          # (Nc, E)
    ce = jnp.concatenate([time_ref[0], cond_emb], axis=0) + cpos_ref[0]  # (Tc, E)
    # cond encoder MLP (Linear -> Mish -> Linear); memory stays VMEM-resident
    memory = _mm(_mish(_mm(ce, enc_w1_ref[...]) + enc_b1_ref[...]),
                 enc_w2_ref[...]) + enc_b2_ref[...]                      # (Tc, E)

    # decoder input
    x = _mm(sample_ref[0], in_w_ref[...]) + in_b_ref[...] + pos_ref[0]   # (T, E)

    # pre-LN decoder blocks
    for l in range(N_LAYER):
        g3 = ln_g_ref[l]                                                 # (3, E)
        b3 = ln_b_ref[l]
        # causal self-attention (fused QKV matmul, q pre-scaled once)
        h1 = _layernorm(x, g3[0], b3[0])
        qkv = _mm(h1, sa_wqkv_ref[l]) + sa_bqkv_ref[l]                   # (T, 3E)
        x = x + _mha(qkv[:, :E] * scale, qkv[:, E:2 * E], qkv[:, 2 * E:],
                     causal_bias, sa_wo_ref[l], sa_bo_ref[l])
        # cross-attention over cond memory (fused KV matmul)
        h2 = _layernorm(x, g3[1], b3[1])
        q = (_mm(h2, ca_wq_ref[l]) + ca_bq_ref[l]) * scale               # (T, E)
        kv = _mm(memory, ca_wkv_ref[l]) + ca_bkv_ref[l]                  # (Tc, 2E)
        x = x + _mha(q, kv[:, :E], kv[:, E:],
                     mem_bias, ca_wo_ref[l], ca_bo_ref[l])
        # GELU feed-forward
        h3 = _layernorm(x, g3[2], b3[2])
        x = x + _mm(_gelu(_mm(h3, ff_w1_ref[l]) + ff_b1_ref[l]),
                    ff_w2_ref[l]) + ff_b2_ref[l]

    # head (lane-dense padded output)
    x = _layernorm(x, lnf_g_ref[...], lnf_b_ref[...])
    noise_ref[0] = _mm(x, head_w_ref[...]) + head_b_ref[...]             # (T, OUT_PAD)


# ----------------------------- spec helpers ----------------------------------
def _full_spec(arr):
    zero = (0,) * arr.ndim
    return pl.BlockSpec(tuple(arr.shape), lambda b, _z=zero: _z)


def _batched_spec(arr):
    blk = (1,) + tuple(arr.shape[1:])
    rest = arr.ndim - 1
    return pl.BlockSpec(blk, lambda b, _n=rest: (b,) + (0,) * _n)


def _batched_out_spec(shape):
    blk = (1,) + tuple(shape[1:])
    rest = len(shape) - 1
    return pl.BlockSpec(blk, lambda b, _n=rest: (b,) + (0,) * _n)


# ----------------------------- glue (plain JAX) -------------------------------
def sinusoidal_pos_emb(t, dim):
    half = dim // 2
    freqs = jnp.exp(jnp.arange(half, dtype=jnp.float32) * -(math.log(10000.0) / (half - 1)))
    args = t.astype(jnp.float32)[:, None] * freqs[None, :]
    return jnp.concatenate([jnp.sin(args), jnp.cos(args)], axis=-1)


def traj_predict_policy_forward(params, rgb_static_norm, language, timesteps, noisy_actions):
    B, S, C, H, W = rgb_static_norm.shape
    rgb = rgb_static_norm.reshape(B * S, C, H, W)

    # patchify (layout-only reshape/transpose, XLA glue)
    ps = VIT_PATCH
    gh, gw = H // ps, W // ps
    patches = rgb.reshape(B * S, C, gh, ps, gw, ps).transpose(0, 2, 4, 1, 3, 5)
    patches = patches.reshape(B, S * gh * gw, C * ps * ps)

    # TODO(synk): frozen CLIP text encoder -> token-embedding gather (XLA glue);
    # pooled projection happens inside the fused kernel.
    tok_emb = params["clip_tok_emb"][language]                       # (B, L, Hc)

    # sinusoidal diffusion-timestep embedding (tiny; computed as XLA glue)
    time_emb = sinusoidal_pos_emb(jnp.broadcast_to(timesteps, (B,)), N_EMB)[:, None, :]

    tfd = params["tfd"]
    data = [patches, tok_emb, time_emb, noisy_actions]
    weights = [params["clip_proj_w"], params["clip_proj_b"],
               params["mae_patch_w"], params["mae_patch_b"],
               params["proj_w"], params["proj_b"],
               tfd["input_emb_w"], tfd["input_emb_b"], tfd["pos_emb"],
               tfd["cond_obs_w"], tfd["cond_obs_b"], tfd["cond_pos_emb"],
               tfd["enc_w1"], tfd["enc_b1"], tfd["enc_w2"], tfd["enc_b2"],
               tfd["ln_g"], tfd["ln_b"],
               tfd["sa_wqkv"], tfd["sa_bqkv"], tfd["sa_wo"], tfd["sa_bo"],
               tfd["ca_wq"], tfd["ca_bq"], tfd["ca_wkv"], tfd["ca_bkv"],
               tfd["ca_wo"], tfd["ca_bo"],
               tfd["ff_w1"], tfd["ff_b1"], tfd["ff_w2"], tfd["ff_b2"],
               tfd["ln_f_g"], tfd["ln_f_b"], tfd["head_w"], tfd["head_b"]]
    in_specs = [_batched_spec(a) for a in data] + [_full_spec(w) for w in weights]

    out_shapes = (jax.ShapeDtypeStruct((B, ACTION_HORIZON, OUT_PAD), jnp.float32),
                  jax.ShapeDtypeStruct((B, 1, HIDDEN_SIZE), jnp.float32),
                  jax.ShapeDtypeStruct((B, S, IMG_FEAT_DIM), jnp.float32),
                  jax.ShapeDtypeStruct((B, S * N_PATCHES, HIDDEN_SIZE), jnp.float32))
    out_specs = (_batched_out_spec((B, ACTION_HORIZON, OUT_PAD)),
                 _batched_out_spec((B, 1, HIDDEN_SIZE)),
                 _batched_out_spec((B, S, IMG_FEAT_DIM)),
                 _batched_out_spec((B, S * N_PATCHES, HIDDEN_SIZE)))

    noise_pad, lang_emb, obs_emb, patch_emb = pl.pallas_call(
        _policy_kernel,
        out_shape=out_shapes,
        grid=(B,),
        in_specs=in_specs,
        out_specs=out_specs,
        compiler_params=pltpu.CompilerParams(dimension_semantics=("parallel",)),
    )(*data, *weights)

    noise_pred = noise_pad[..., :ACTION_DIM]                         # drop lane padding
    obs_embeddings = obs_emb.reshape(B * S, IMG_FEAT_DIM)
    patch_embeddings = patch_emb.reshape(B * S, N_PATCHES, HIDDEN_SIZE)
    return noise_pred, lang_emb, obs_embeddings, patch_embeddings


# ----------------------------- parameter init --------------------------------
def init_params(key):
    kit = iter(jax.random.split(key, 64))

    def nrm(shape, scale=0.02):
        return jax.random.normal(next(kit), shape, dtype=jnp.float32) * scale

    def zeros(shape):
        return jnp.zeros(shape, jnp.float32)

    def ones(shape):
        return jnp.ones(shape, jnp.float32)

    L, E, F = N_LAYER, N_EMB, 4 * N_EMB
    # head weight stored pre-padded to OUT_PAD lanes (zero pad -> lane-dense store)
    head_w = zeros((E, OUT_PAD)).at[:, :ACTION_DIM].set(nrm((E, ACTION_DIM)))

    tfd = dict(
        input_emb_w=nrm((ACTION_DIM, E)), input_emb_b=zeros((1, E)),
        pos_emb=nrm((1, ACTION_HORIZON, E)),
        cond_obs_w=nrm((HIDDEN_SIZE, E)), cond_obs_b=zeros((1, E)),
        cond_pos_emb=nrm((1, T_COND, E)),
        enc_w1=nrm((E, F)), enc_b1=zeros((1, F)),
        enc_w2=nrm((F, E)), enc_b2=zeros((1, E)),
        ln_g=ones((L, 3, E)), ln_b=zeros((L, 3, E)),
        sa_wqkv=nrm((L, E, 3 * E)), sa_bqkv=zeros((L, 1, 3 * E)),
        sa_wo=nrm((L, E, E)), sa_bo=zeros((L, 1, E)),
        ca_wq=nrm((L, E, E)), ca_bq=zeros((L, 1, E)),
        ca_wkv=nrm((L, E, 2 * E)), ca_bkv=zeros((L, 1, 2 * E)),
        ca_wo=nrm((L, E, E)), ca_bo=zeros((L, 1, E)),
        ff_w1=nrm((L, E, F)), ff_b1=zeros((L, 1, F)),
        ff_w2=nrm((L, F, E)), ff_b2=zeros((L, 1, E)),
        ln_f_g=ones((1, E)), ln_f_b=zeros((1, E)),
        head_w=head_w, head_b=zeros((1, OUT_PAD)),
    )

    return dict(
        clip_tok_emb=nrm((CLIP_VOCAB, HIDDEN_SIZE)),
        clip_proj_w=nrm((HIDDEN_SIZE, HIDDEN_SIZE)), clip_proj_b=zeros((1, HIDDEN_SIZE)),
        mae_patch_w=nrm((PATCH_DIM, IMG_FEAT_DIM)),
        mae_patch_b=zeros((1, IMG_FEAT_DIM)),
        proj_w=nrm((IMG_FEAT_DIM, HIDDEN_SIZE)), proj_b=zeros((1, HIDDEN_SIZE)),
        tfd=tfd,
    )


# --------------------------------- main ---------------------------------------
if __name__ == "__main__":
    root = jax.random.PRNGKey(0)
    kp, k1, k2, k3, k4 = jax.random.split(root, 5)

    params = init_params(kp)
    rgb_static_norm = jax.random.normal(k1, (BATCH, SEQ, CHANNELS, IMG_HW, IMG_HW), jnp.float32)
    language = jax.random.randint(k2, (BATCH, LANG_LEN), 0, CLIP_VOCAB, dtype=jnp.int32)
    timesteps = jax.random.randint(k3, (BATCH,), 0, 100, dtype=jnp.int32)
    noisy_actions = jax.random.normal(k4, (BATCH, ACTION_HORIZON, ACTION_DIM), jnp.float32)

    fwd = jax.jit(traj_predict_policy_forward)
    noise_pred, lang_emb, obs_emb, patch_emb = fwd(
        params, rgb_static_norm, language, timesteps, noisy_actions)
    jax.block_until_ready(noise_pred)

    assert noise_pred.shape == (BATCH, ACTION_HORIZON, ACTION_DIM)
    assert lang_emb.shape == (BATCH, 1, HIDDEN_SIZE)
    assert obs_emb.shape == (BATCH * SEQ, IMG_FEAT_DIM)
    assert patch_emb.shape == (BATCH * SEQ, N_PATCHES, HIDDEN_SIZE)
    assert bool(jnp.all(jnp.isfinite(noise_pred)))
    assert bool(jnp.all(jnp.isfinite(lang_emb)))
    assert bool(jnp.all(jnp.isfinite(obs_emb)))
    assert bool(jnp.all(jnp.isfinite(patch_emb)))
    print("KERNEL_OK")
</pallas_src>

<mosaic_0001>
module attributes {stable_mosaic.version = 11 : i64} {
  func.func @_policy_kernel(%arg0: i32, %arg1: memref<1x16x192xf32, #tpu.memory_space<vmem>>, %arg2: memref<1x8x32xf32, #tpu.memory_space<vmem>>, %arg3: memref<1x1x32xf32, #tpu.memory_space<vmem>>, %arg4: memref<1x8x2xf32, #tpu.memory_space<vmem>>, %arg5: memref<32x32xf32, #tpu.memory_space<vmem>>, %arg6: memref<1x32xf32, #tpu.memory_space<vmem>>, %arg7: memref<192x64xf32, #tpu.memory_space<vmem>>, %arg8: memref<1x64xf32, #tpu.memory_space<vmem>>, %arg9: memref<64x32xf32, #tpu.memory_space<vmem>>, %arg10: memref<1x32xf32, #tpu.memory_space<vmem>>, %arg11: memref<2x32xf32, #tpu.memory_space<vmem>>, %arg12: memref<1x32xf32, #tpu.memory_space<vmem>>, %arg13: memref<1x8x32xf32, #tpu.memory_space<vmem>>, %arg14: memref<32x32xf32, #tpu.memory_space<vmem>>, %arg15: memref<1x32xf32, #tpu.memory_space<vmem>>, %arg16: memref<1x18x32xf32, #tpu.memory_space<vmem>>, %arg17: memref<32x128xf32, #tpu.memory_space<vmem>>, %arg18: memref<1x128xf32, #tpu.memory_space<vmem>>, %arg19: memref<128x32xf32, #tpu.memory_space<vmem>>, %arg20: memref<1x32xf32, #tpu.memory_space<vmem>>, %arg21: memref<2x3x32xf32, #tpu.memory_space<vmem>>, %arg22: memref<2x3x32xf32, #tpu.memory_space<vmem>>, %arg23: memref<2x32x96xf32, #tpu.memory_space<vmem>>, %arg24: memref<2x1x96xf32, #tpu.memory_space<vmem>>, %arg25: memref<2x32x32xf32, #tpu.memory_space<vmem>>, %arg26: memref<2x1x32xf32, #tpu.memory_space<vmem>>, %arg27: memref<2x32x32xf32, #tpu.memory_space<vmem>>, %arg28: memref<2x1x32xf32, #tpu.memory_space<vmem>>, %arg29: memref<2x32x64xf32, #tpu.memory_space<vmem>>, %arg30: memref<2x1x64xf32, #tpu.memory_space<vmem>>, %arg31: memref<2x32x32xf32, #tpu.memory_space<vmem>>, %arg32: memref<2x1x32xf32, #tpu.memory_space<vmem>>, %arg33: memref<2x32x128xf32, #tpu.memory_space<vmem>>, %arg34: memref<2x1x128xf32, #tpu.memory_space<vmem>>, %arg35: memref<2x128x32xf32, #tpu.memory_space<vmem>>, %arg36: memref<2x1x32xf32, #tpu.memory_space<vmem>>, %arg37: memref<1x32xf32, #tpu.memory_space<vmem>>, %arg38: memref<1x32xf32, #tpu.memory_space<vmem>>, %arg39: memref<32x128xf32, #tpu.memory_space<vmem>>, %arg40: memref<1x128xf32, #tpu.memory_space<vmem>>, %arg41: memref<1x8x128xf32, #tpu.memory_space<vmem>>, %arg42: memref<1x1x32xf32, #tpu.memory_space<vmem>>, %arg43: memref<1x1x64xf32, #tpu.memory_space<vmem>>, %arg44: memref<1x16x32xf32, #tpu.memory_space<vmem>>) attributes {dimension_semantics = [#tpu.dimension_semantics<parallel>], iteration_bounds = array<i64: 2>, scalar_prefetch = 0 : i64, scratch_operands = 0 : i64, tpu.core_type = #tpu.core_type<tc>, window_params = [{transform_indices = @transform_0, window_bounds = array<i64: 1, 16, 192>}, {transform_indices = @transform_1, window_bounds = array<i64: 1, 8, 32>}, {transform_indices = @transform_2, window_bounds = array<i64: 1, 1, 32>}, {transform_indices = @transform_3, window_bounds = array<i64: 1, 8, 2>}, {pipeline_mode = #tpu.pipeline_mode<synchronous>, transform_indices = @transform_4, window_bounds = array<i64: 32, 32>}, {pipeline_mode = #tpu.pipeline_mode<synchronous>, transform_indices = @transform_5, window_bounds = array<i64: 1, 32>}, {pipeline_mode = #tpu.pipeline_mode<synchronous>, transform_indices = @transform_6, window_bounds = array<i64: 192, 64>}, {pipeline_mode = #tpu.pipeline_mode<synchronous>, transform_indices = @transform_7, window_bounds = array<i64: 1, 64>}, {pipeline_mode = #tpu.pipeline_mode<synchronous>, transform_indices = @transform_8, window_bounds = array<i64: 64, 32>}, {pipeline_mode = #tpu.pipeline_mode<synchronous>, transform_indices = @transform_9, window_bounds = array<i64: 1, 32>}, {pipeline_mode = #tpu.pipeline_mode<synchronous>, transform_indices = @transform_10, window_bounds = array<i64: 2, 32>}, {pipeline_mode = #tpu.pipeline_mode<synchronous>, transform_indices = @transform_11, window_bounds = array<i64: 1, 32>}, {pipeline_mode = #tpu.pipeline_mode<synchronous>, transform_indices = @transform_12, window_bounds = array<i64: 1, 8, 32>}, {pipeline_mode = #tpu.pipeline_mode<synchronous>, transform_indices = @transform_13, window_bounds = array<i64: 32, 32>}, {pipeline_mode = #tpu.pipeline_mode<synchronous>, transform_indices = @transform_14, window_bounds = array<i64: 1, 32>}, {pipeline_mode = #tpu.pipeline_mode<synchronous>, transform_indices = @transform_15, window_bounds = array<i64: 1, 18, 32>}, {pipeline_mode = #tpu.pipeline_mode<synchronous>, transform_indices = @transform_16, window_bounds = array<i64: 32, 128>}, {pipeline_mode = #tpu.pipeline_mode<synchronous>, transform_indices = @transform_17, window_bounds = array<i64: 1, 128>}, {pipeline_mode = #tpu.pipeline_mode<synchronous>, transform_indices = @transform_18, window_bounds = array<i64: 128, 32>}, {pipeline_mode = #tpu.pipeline_mode<synchronous>, transform_indices = @transform_19, window_bounds = array<i64: 1, 32>}, {pipeline_mode = #tpu.pipeline_mode<synchronous>, transform_indices = @transform_20, window_bounds = array<i64: 2, 3, 32>}, {pipeline_mode = #tpu.pipeline_mode<synchronous>, transform_indices = @transform_21, window_bounds = array<i64: 2, 3, 32>}, {pipeline_mode = #tpu.pipeline_mode<synchronous>, transform_indices = @transform_22, window_bounds = array<i64: 2, 32, 96>}, {pipeline_mode = #tpu.pipeline_mode<synchronous>, transform_indices = @transform_23, window_bounds = array<i64: 2, 1, 96>}, {pipeline_mode = #tpu.pipeline_mode<synchronous>, transform_indices = @transform_24, window_bounds = array<i64: 2, 32, 32>}, {pipeline_mode = #tpu.pipeline_mode<synchronous>, transform_indices = @transform_25, window_bounds = array<i64: 2, 1, 32>}, {pipeline_mode = #tpu.pipeline_mode<synchronous>, transform_indices = @transform_26, window_bounds = array<i64: 2, 32, 32>}, {pipeline_mode = #tpu.pipeline_mode<synchronous>, transform_indices = @transform_27, window_bounds = array<i64: 2, 1, 32>}, {pipeline_mode = #tpu.pipeline_mode<synchronous>, transform_indices = @transform_28, window_bounds = array<i64: 2, 32, 64>}, {pipeline_mode = #tpu.pipeline_mode<synchronous>, transform_indices = @transform_29, window_bounds = array<i64: 2, 1, 64>}, {pipeline_mode = #tpu.pipeline_mode<synchronous>, transform_indices = @transform_30, window_bounds = array<i64: 2, 32, 32>}, {pipeline_mode = #tpu.pipeline_mode<synchronous>, transform_indices = @transform_31, window_bounds = array<i64: 2, 1, 32>}, {pipeline_mode = #tpu.pipeline_mode<synchronous>, transform_indices = @transform_32, window_bounds = array<i64: 2, 32, 128>}, {pipeline_mode = #tpu.pipeline_mode<synchronous>, transform_indices = @transform_33, window_bounds = array<i64: 2, 1, 128>}, {pipeline_mode = #tpu.pipeline_mode<synchronous>, transform_indices = @transform_34, window_bounds = array<i64: 2, 128, 32>}, {pipeline_mode = #tpu.pipeline_mode<synchronous>, transform_indices = @transform_35, window_bounds = array<i64: 2, 1, 32>}, {pipeline_mode = #tpu.pipeline_mode<synchronous>, transform_indices = @transform_36, window_bounds = array<i64: 1, 32>}, {pipeline_mode = #tpu.pipeline_mode<synchronous>, transform_indices = @transform_37, window_bounds = array<i64: 1, 32>}, {pipeline_mode = #tpu.pipeline_mode<synchronous>, transform_indices = @transform_38, window_bounds = array<i64: 32, 128>}, {pipeline_mode = #tpu.pipeline_mode<synchronous>, transform_indices = @transform_39, window_bounds = array<i64: 1, 128>}, {transform_indices = @transform_40, window_bounds = array<i64: 1, 8, 128>}, {transform_indices = @transform_41, window_bounds = array<i64: 1, 1, 32>}, {transform_indices = @transform_42, window_bounds = array<i64: 1, 1, 64>}, {transform_indices = @transform_43, window_bounds = array<i64: 1, 16, 32>}]} {
    %c0 = arith.constant 0 : index
    %c0_0 = arith.constant 0 : index
    %c0_1 = arith.constant 0 : index
    %0 = vector.load %arg2[%c0, %c0_0, %c0_1] : memref<1x8x32xf32, #tpu.memory_space<vmem>>, vector<1x8x32xf32>
    %1 = vector.shape_cast %0 : vector<1x8x32xf32> to vector<8x32xf32>
    %cst = arith.constant dense<0.000000e+00> : vector<32xf32>
    %2 = vector.multi_reduction <add>, %1, %cst [0] : vector<8x32xf32> to vector<32xf32>
    %3 = vector.shape_cast %2 : vector<32xf32> to vector<1x32xf32>
    %cst_2 = arith.constant 8.000000e+00 : f32
    %4 = vector.broadcast %cst_2 : f32 to vector<1x32xf32>
    %5 = arith.divf %3, %4 : vector<1x32xf32>
    %c0_3 = arith.constant 0 : index
    %c0_4 = arith.constant 0 : index
    %6 = vector.load %arg5[%c0_3, %c0_4] : memref<32x32xf32, #tpu.memory_space<vmem>>, vector<32x32xf32>
    %7 = arith.truncf %5 : vector<1x32xf32> to vector<1x32xbf16>
    %8 = arith.truncf %6 : vector<32x32xf32> to vector<32x32xbf16>
    %cst_5 = arith.constant dense<0.000000e+00> : vector<1x32xf32>
    %9 = tpu.matmul %7, %8, %cst_5 {dimension_numbers = #tpu.dot_dimension_numbers<[1], [0], [0], [1], [0, 0, 1, 1], [], []>} : vector<1x32xbf16>, vector<32x32xbf16>, vector<1x32xf32> -> vector<1x32xf32>
    %c0_6 = arith.constant 0 : index
    %c0_7 = arith.constant 0 : index
    %10 = vector.load %arg6[%c0_6, %c0_7] : memref<1x32xf32, #tpu.memory_space<vmem>>, vector<1x32xf32>
    %11 = arith.addf %9, %10 : vector<1x32xf32>
    %c0_8 = arith.constant 0 : index
    %c0_9 = arith.constant 0 : index
    %c0_10 = arith.constant 0 : index
    %12 = vector.load %arg42[%c0_8, %c0_9, %c0_10] : memref<1x1x32xf32, #tpu.memory_space<vmem>>, vector<1x1x32xf32>
    %13 = vector.shape_cast %12 : vector<1x1x32xf32> to vector<1x32xf32>
    %14 = vector.shape_cast %11 : vector<1x32xf32> to vector<1x1x32xf32>
    tpu.vector_store %arg42[%c0_8, %c0_9, %c0_10], %14 {strides = array<i32>} : memref<1x1x32xf32, #tpu.memory_space<vmem>>, vector<1x1x32xf32>,
    %c0_11 = arith.constant 0 : index
    %c0_12 = arith.constant 0 : index
    %c0_13 = arith.constant 0 : index
    %15 = vector.load %arg1[%c0_11, %c0_12, %c0_13] : memref<1x16x192xf32, #tpu.memory_space<vmem>>, vector<1x16x192xf32>
    %16 = vector.shape_cast %15 : vector<1x16x192xf32> to vector<16x192xf32>
    %c0_14 = arith.constant 0 : index
    %c0_15 = arith.constant 0 : index
    %17 = vector.load %arg7[%c0_14, %c0_15] : memref<192x64xf32, #tpu.memory_space<vmem>>, vector<192x64xf32>
    %18 = arith.truncf %16 : vector<16x192xf32> to vector<16x192xbf16>
    %19 = arith.truncf %17 : vector<192x64xf32> to vector<192x64xbf16>
    %cst_16 = arith.constant dense<0.000000e+00> : vector<16x64xf32>
    %20 = tpu.matmul %18, %19, %cst_16 {dimension_numbers = #tpu.dot_dimension_numbers<[1], [0], [0], [1], [0, 0, 1, 1], [], []>} : vector<16x192xbf16>, vector<192x64xbf16>, vector<16x64xf32> -> vector<16x64xf32>
    %c0_17 = arith.constant 0 : index
    %c0_18 = arith.constant 0 : index
    %21 = vector.load %arg8[%c0_17, %c0_18] : memref<1x64xf32, #tpu.memory_space<vmem>>, vector<1x64xf32>
    %22 = vector.broadcast %21 : vector<1x64xf32> to vector<16x64xf32>
    %23 = arith.addf %20, %22 : vector<16x64xf32>
    %cst_19 = arith.constant dense<0.000000e+00> : vector<64xf32>
    %24 = vector.multi_reduction <add>, %23, %cst_19 [0] : vector<16x64xf32> to vector<64xf32>
    %25 = vector.shape_cast %24 : vector<64xf32> to vector<1x64xf32>
    %cst_20 = arith.constant 1.600000e+01 : f32
    %26 = vector.broadcast %cst_20 : f32 to vector<1x64xf32>
    %27 = arith.divf %25, %26 : vector<1x64xf32>
    %c0_21 = arith.constant 0 : index
    %c0_22 = arith.constant 0 : index
    %c0_23 = arith.constant 0 : index
    %28 = vector.load %arg43[%c0_21, %c0_22, %c0_23] : memref<1x1x64xf32, #tpu.memory_space<vmem>>, vector<1x1x64xf32>
    %29 = vector.shape_cast %28 : vector<1x1x64xf32> to vector<1x64xf32>
    %30 = vector.shape_cast %27 : vector<1x64xf32> to vector<1x1x64xf32>
    tpu.vector_store %arg43[%c0_21, %c0_22, %c0_23], %30 {strides = array<i32>} : memref<1x1x64xf32, #tpu.memory_space<vmem>>, vector<1x1x64xf32>,
    %c0_24 = arith.constant 0 : index
    %c0_25 = arith.constant 0 : index
    %31 = vector.load %arg9[%c0_24, %c0_25] : memref<64x32xf32, #tpu.memory_space<vmem>>, vector<64x32xf32>
    %32 = arith.truncf %23 : vector<16x64xf32> to vector<16x64xbf16>
    %33 = arith.truncf %31 : vector<64x32xf32> to vector<64x32xbf16>
    %cst_26 = arith.constant dense<0.000000e+00> : vector<16x32xf32>
    %34 = tpu.matmul %32, %33, %cst_26 {dimension_numbers = #tpu.dot_dimension_numbers<[1], [0], [0], [1], [0, 0, 1, 1], [], []>} : vector<16x64xbf16>, vector<64x32xbf16>, vector<16x32xf32> -> vector<16x32xf32>
    %c0_27 = arith.constant 0 : index
    %c0_28 = arith.constant 0 : index
    %35 = vector.load %arg10[%c0_27, %c0_28] : memref<1x32xf32, #tpu.memory_space<vmem>>, vector<1x32xf32>
    %36 = vector.broadcast %35 : vector<1x32xf32> to vector<16x32xf32>
    %37 = arith.addf %34, %36 : vector<16x32xf32>
    %c0_29 = arith.constant 0 : index
    %c0_30 = arith.constant 0 : index
    %c0_31 = arith.constant 0 : index
    %38 = vector.load %arg44[%c0_29, %c0_30, %c0_31] : memref<1x16x32xf32, #tpu.memory_space<vmem>>, vector<1x16x32xf32>
    %39 = vector.shape_cast %38 : vector<1x16x32xf32> to vector<16x32xf32>
    %40 = vector.shape_cast %37 : vector<16x32xf32> to vector<1x16x32xf32>
    tpu.vector_store %arg44[%c0_29, %c0_30, %c0_31], %40 {strides = array<i32>} : memref<1x16x32xf32, #tpu.memory_space<vmem>>, vector<1x16x32xf32>,
    %41 = tpu.iota {dimensions = array<i32: 0>} : vector<8x8xi32>
    %42 = tpu.iota {dimensions = array<i32: 1>} : vector<8x8xi32>
    %43 = arith.cmpi sgt, %42, %41 : vector<8x8xi32>
    %cst_32 = arith.constant -1.000000e+30 : f32
    %cst_33 = arith.constant 0.000000e+00 : f32
    %44 = vector.broadcast %cst_32 : f32 to vector<8x8xf32>
    %45 = vector.broadcast %cst_33 : f32 to vector<8x8xf32>
    %46 = arith.select %43, %44, %45 : vector<8x8xi1>, vector<8x8xf32>
    %47 = tpu.iota {dimensions = array<i32: 0>} : vector<8x18xi32>
    %48 = tpu.iota {dimensions = array<i32: 1>} : vector<8x18xi32>
    %c1_i32 = arith.constant 1 : i32
    %49 = vector.broadcast %c1_i32 : i32 to vector<8x18xi32>
    %50 = arith.addi %47, %49 : vector<8x18xi32>
    %51 = arith.cmpi sgt, %48, %50 : vector<8x18xi32>
    %cst_34 = arith.constant -1.000000e+30 : f32
    %cst_35 = arith.constant 0.000000e+00 : f32
    %52 = vector.broadcast %cst_34 : f32 to vector<8x18xf32>
    %53 = vector.broadcast %cst_35 : f32 to vector<8x18xf32>
    %54 = arith.select %51, %52, %53 : vector<8x18xi1>, vector<8x18xf32>
    %55 = tpu.concatenate %37, %11 in 0 : vector<16x32xf32>, vector<1x32xf32> -> vector<17x32xf32>
    %c0_36 = arith.constant 0 : index
    %c0_37 = arith.constant 0 : index
    %56 = vector.load %arg14[%c0_36, %c0_37] : memref<32x32xf32, #tpu.memory_space<vmem>>, vector<32x32xf32>
    %57 = arith.truncf %55 : vector<17x32xf32> to vector<17x32xbf16>
    %58 = arith.truncf %56 : vector<32x32xf32> to vector<32x32xbf16>
    %cst_38 = arith.constant dense<0.000000e+00> : vector<17x32xf32>
    %59 = tpu.matmul %57, %58, %cst_38 {dimension_numbers = #tpu.dot_dimension_numbers<[1], [0], [0], [1], [0, 0, 1, 1], [], []>} : vector<17x32xbf16>, vector<32x32xbf16>, vector<17x32xf32> -> vector<17x32xf32>
    %c0_39 = arith.constant 0 : index
    %c0_40 = arith.constant 0 : index
    %60 = vector.load %arg15[%c0_39, %c0_40] : memref<1x32xf32, #tpu.memory_space<vmem>>, vector<1x32xf32>
    %61 = vector.broadcast %60 : vector<1x32xf32> to vector<17x32xf32>
    %62 = arith.addf %59, %61 : vector<17x32xf32>
    %c0_41 = arith.constant 0 : index
    %c0_42 = arith.constant 0 : index
    %c0_43 = arith.constant 0 : index
    %63 = vector.load %arg3[%c0_41, %c0_42, %c0_43] : memref<1x1x32xf32, #tpu.memory_space<vmem>>, vector<1x1x32xf32>
    %64 = vector.shape_cast %63 : vector<1x1x32xf32> to vector<1x32xf32>
    %65 = tpu.concatenate %64, %62 in 0 : vector<1x32xf32>, vector<17x32xf32> -> vector<18x32xf32>
    %c0_44 = arith.constant 0 : index
    %c0_45 = arith.constant 0 : index
    %c0_46 = arith.constant 0 : index
    %66 = vector.load %arg16[%c0_44, %c0_45, %c0_46] : memref<1x18x32xf32, #tpu.memory_space<vmem>>, vector<1x18x32xf32>
    %67 = vector.shape_cast %66 : vector<1x18x32xf32> to vector<18x32xf32>
    %68 = arith.addf %65, %67 : vector<18x32xf32>
    %c0_47 = arith.constant 0 : index
    %c0_48 = arith.constant 0 : index
    %69 = vector.load %arg17[%c0_47, %c0_48] : memref<32x128xf32, #tpu.memory_space<vmem>>, vector<32x128xf32>
    %70 = arith.truncf %68 : vector<18x32xf32> to vector<18x32xbf16>
    %71 = arith.truncf %69 : vector<32x128xf32> to vector<32x128xbf16>
    %cst_49 = arith.constant dense<0.000000e+00> : vector<18x128xf32>
    %72 = tpu.matmul %70, %71, %cst_49 {dimension_numbers = #tpu.dot_dimension_numbers<[1], [0], [0], [1], [0, 0, 1, 1], [], []>} : vector<18x32xbf16>, vector<32x128xbf16>, vector<18x128xf32> -> vector<18x128xf32>
    %c0_50 = arith.constant 0 : index
    %c0_51 = arith.constant 0 : index
    %73 = vector.load %arg18[%c0_50, %c0_51] : memref<1x128xf32, #tpu.memory_space<vmem>>, vector<1x128xf32>
    %74 = vector.broadcast %73 : vector<1x128xf32> to vector<18x128xf32>
    %75 = arith.addf %72, %74 : vector<18x128xf32>
    %cst_52 = arith.constant 0.000000e+00 : f32
    %76 = vector.broadcast %cst_52 : f32 to vector<18x128xf32>
    %77 = arith.maximumf %75, %76 : vector<18x128xf32>
    %78 = math.absf %75 : vector<18x128xf32>
    %cst_53 = arith.constant 0.000000e+00 : f32
    %79 = vector.broadcast %cst_53 : f32 to vector<18x128xf32>
    %80 = arith.subf %79, %78 : vector<18x128xf32>
    %81 = math.exp %80 : vector<18x128xf32>
    %cst_54 = arith.constant 1.000000e+00 : f32
    %82 = vector.broadcast %cst_54 : f32 to vector<18x128xf32>
    %83 = arith.addf %82, %81 : vector<18x128xf32>
    %84 = math.log %83 : vector<18x128xf32>
    %85 = arith.addf %77, %84 : vector<18x128xf32>
    %86 = math.tanh %85 : vector<18x128xf32>
    %87 = arith.mulf %75, %86 : vector<18x128xf32>
    %c0_55 = arith.constant 0 : index
    %c0_56 = arith.constant 0 : index
    %88 = vector.load %arg19[%c0_55, %c0_56] : memref<128x32xf32, #tpu.memory_space<vmem>>, vector<128x32xf32>
    %89 = arith.truncf %87 : vector<18x128xf32> to vector<18x128xbf16>
    %90 = arith.truncf %88 : vector<128x32xf32> to vector<128x32xbf16>
    %cst_57 = arith.constant dense<0.000000e+00> : vector<18x32xf32>
    %91 = tpu.matmul %89, %90, %cst_57 {dimension_numbers = #tpu.dot_dimension_numbers<[1], [0], [0], [1], [0, 0, 1, 1], [], []>} : vector<18x128xbf16>, vector<128x32xbf16>, vector<18x32xf32> -> vector<18x32xf32>
    %c0_58 = arith.constant 0 : index
    %c0_59 = arith.constant 0 : index
    %92 = vector.load %arg20[%c0_58, %c0_59] : memref<1x32xf32, #tpu.memory_space<vmem>>, vector<1x32xf32>
    %93 = vector.broadcast %92 : vector<1x32xf32> to vector<18x32xf32>
    %94 = arith.addf %91, %93 : vector<18x32xf32>
    %c0_60 = arith.constant 0 : index
    %c0_61 = arith.constant 0 : index
    %c0_62 = arith.constant 0 : index
    %95 = vector.load %arg4[%c0_60, %c0_61, %c0_62] : memref<1x8x2xf32, #tpu.memory_space<vmem>>, vector<1x8x2xf32>
    %96 = vector.shape_cast %95 : vector<1x8x2xf32> to vector<8x2xf32>
    %c0_63 = arith.constant 0 : index
    %c0_64 = arith.constant 0 : index
    %97 = vector.load %arg11[%c0_63, %c0_64] : memref<2x32xf32, #tpu.memory_space<vmem>>, vector<2x32xf32>
    %98 = arith.truncf %96 : vector<8x2xf32> to vector<8x2xbf16>
    %99 = arith.truncf %97 : vector<2x32xf32> to vector<2x32xbf16>
    %cst_65 = arith.constant dense<0.000000e+00> : vector<8x32xf32>
    %100 = tpu.matmul %98, %99, %cst_65 {dimension_numbers = #tpu.dot_dimension_numbers<[1], [0], [0], [1], [0, 0, 1, 1], [], []>} : vector<8x2xbf16>, vector<2x32xbf16>, vector<8x32xf32> -> vector<8x32xf32>
    %c0_66 = arith.constant 0 : index
    %c0_67 = arith.constant 0 : index
    %101 = vector.load %arg12[%c0_66, %c0_67] : memref<1x32xf32, #tpu.memory_space<vmem>>, vector<1x32xf32>
    %102 = vector.broadcast %101 : vector<1x32xf32> to vector<8x32xf32>
    %103 = arith.addf %100, %102 : vector<8x32xf32>
    %c0_68 = arith.constant 0 : index
    %c0_69 = arith.constant 0 : index
    %c0_70 = arith.constant 0 : index
    %104 = vector.load %arg13[%c0_68, %c0_69, %c0_70] : memref<1x8x32xf32, #tpu.memory_space<vmem>>, vector<1x8x32xf32>
    %105 = vector.shape_cast %104 : vector<1x8x32xf32> to vector<8x32xf32>
    %106 = arith.addf %103, %105 : vector<8x32xf32>
    %c0_71 = arith.constant 0 : index
    %c0_72 = arith.constant 0 : index
    %c0_73 = arith.constant 0 : index
    %107 = vector.load %arg21[%c0_71, %c0_72, %c0_73] : memref<2x3x32xf32, #tpu.memory_space<vmem>>, vector<1x3x32xf32>
    %108 = vector.shape_cast %107 : vector<1x3x32xf32> to vector<3x32xf32>
    %c0_74 = arith.constant 0 : index
    %c0_75 = arith.constant 0 : index
    %c0_76 = arith.constant 0 : index
    %109 = vector.load %arg22[%c0_74, %c0_75, %c0_76] : memref<2x3x32xf32, #tpu.memory_space<vmem>>, vector<1x3x32xf32>
    %110 = vector.shape_cast %109 : vector<1x3x32xf32> to vector<3x32xf32>
    %111 = vector.extract_strided_slice %108 {offsets = [0, 0], sizes = [1, 32], strides = [1, 1]} : vector<3x32xf32> to vector<1x32xf32>
    %112 = vector.shape_cast %111 : vector<1x32xf32> to vector<32xf32>
    %113 = vector.extract_strided_slice %110 {offsets = [0, 0], sizes = [1, 32], strides = [1, 1]} : vector<3x32xf32> to vector<1x32xf32>
    %114 = vector.shape_cast %113 : vector<1x32xf32> to vector<32xf32>
    %cst_77 = arith.constant dense<0.000000e+00> : vector<8xf32>
    %115 = vector.multi_reduction <add>, %106, %cst_77 [1] : vector<8x32xf32> to vector<8xf32>
    %116 = vector.shape_cast %115 : vector<8xf32> to vector<8x1xf32>
    %cst_78 = arith.constant 3.200000e+01 : f32
    %117 = vector.broadcast %cst_78 : f32 to vector<8x1xf32>
    %118 = arith.divf %116, %117 : vector<8x1xf32>
    %119 = vector.broadcast %118 : vector<8x1xf32> to vector<8x32xf32>
    %120 = arith.subf %106, %119 : vector<8x32xf32>
    %121 = arith.mulf %120, %120 : vector<8x32xf32>
    %cst_79 = arith.constant dense<0.000000e+00> : vector<8xf32>
    %122 = vector.multi_reduction <add>, %121, %cst_79 [1] : vector<8x32xf32> to vector<8xf32>
    %123 = vector.shape_cast %122 : vector<8xf32> to vector<8x1xf32>
    %cst_80 = arith.constant 3.200000e+01 : f32
    %124 = vector.broadcast %cst_80 : f32 to vector<8x1xf32>
    %125 = arith.divf %123, %124 : vector<8x1xf32>
    %cst_81 = arith.constant 9.99999974E-6 : f32
    %126 = vector.broadcast %cst_81 : f32 to vector<8x1xf32>
    %127 = arith.addf %125, %126 : vector<8x1xf32>
    %128 = math.rsqrt %127 : vector<8x1xf32>
    %129 = vector.broadcast %128 : vector<8x1xf32> to vector<8x32xf32>
    %130 = arith.mulf %120, %129 : vector<8x32xf32>
    %131 = vector.shape_cast %112 : vector<32xf32> to vector<1x32xf32>
    %132 = vector.broadcast %131 : vector<1x32xf32> to vector<8x32xf32>
    %133 = arith.mulf %130, %132 : vector<8x32xf32>
    %134 = vector.shape_cast %114 : vector<32xf32> to vector<1x32xf32>
    %135 = vector.broadcast %134 : vector<1x32xf32> to vector<8x32xf32>
    %136 = arith.addf %133, %135 : vector<8x32xf32>
    %c0_82 = arith.constant 0 : index
    %c0_83 = arith.constant 0 : index
    %c0_84 = arith.constant 0 : index
    %137 = vector.load %arg23[%c0_82, %c0_83, %c0_84] : memref<2x32x96xf32, #tpu.memory_space<vmem>>, vector<1x32x96xf32>
    %138 = vector.shape_cast %137 : vector<1x32x96xf32> to vector<32x96xf32>
    %139 = arith.truncf %136 : vector<8x32xf32> to vector<8x32xbf16>
    %140 = arith.truncf %138 : vector<32x96xf32> to vector<32x96xbf16>
    %cst_85 = arith.constant dense<0.000000e+00> : vector<8x96xf32>
    %141 = tpu.matmul %139, %140, %cst_85 {dimension_numbers = #tpu.dot_dimension_numbers<[1], [0], [0], [1], [0, 0, 1, 1], [], []>} : vector<8x32xbf16>, vector<32x96xbf16>, vector<8x96xf32> -> vector<8x96xf32>
    %c0_86 = arith.constant 0 : index
    %c0_87 = arith.constant 0 : index
    %c0_88 = arith.constant 0 : index
    %142 = vector.load %arg24[%c0_86, %c0_87, %c0_88] : memref<2x1x96xf32, #tpu.memory_space<vmem>>, vector<1x1x96xf32>
    %143 = vector.shape_cast %142 : vector<1x1x96xf32> to vector<1x96xf32>
    %144 = vector.broadcast %143 : vector<1x96xf32> to vector<8x96xf32>
    %145 = arith.addf %141, %144 : vector<8x96xf32>
    %146 = vector.extract_strided_slice %145 {offsets = [0, 0], sizes = [8, 32], strides = [1, 1]} : vector<8x96xf32> to vector<8x32xf32>
    %cst_89 = arith.constant 0.353553385 : f32
    %147 = vector.broadcast %cst_89 : f32 to vector<8x32xf32>
    %148 = arith.mulf %146, %147 : vector<8x32xf32>
    %149 = vector.extract_strided_slice %145 {offsets = [0, 32], sizes = [8, 32], strides = [1, 1]} : vector<8x96xf32> to vector<8x32xf32>
    %150 = vector.extract_strided_slice %145 {offsets = [0, 64], sizes = [8, 32], strides = [1, 1]} : vector<8x96xf32> to vector<8x32xf32>
    %c0_90 = arith.constant 0 : index
    %c0_91 = arith.constant 0 : index
    %c0_92 = arith.constant 0 : index
    %151 = vector.load %arg25[%c0_90, %c0_91, %c0_92] : memref<2x32x32xf32, #tpu.memory_space<vmem>>, vector<1x32x32xf32>
    %152 = vector.shape_cast %151 : vector<1x32x32xf32> to vector<32x32xf32>
    %c0_93 = arith.constant 0 : index
    %c0_94 = arith.constant 0 : index
    %c0_95 = arith.constant 0 : index
    %153 = vector.load %arg26[%c0_93, %c0_94, %c0_95] : memref<2x1x32xf32, #tpu.memory_space<vmem>>, vector<1x1x32xf32>
    %154 = vector.shape_cast %153 : vector<1x1x32xf32> to vector<1x32xf32>
    %155 = vector.extract_strided_slice %148 {offsets = [0, 0], sizes = [8, 8], strides = [1, 1]} : vector<8x32xf32> to vector<8x8xf32>
    %156 = vector.extract_strided_slice %149 {offsets = [0, 0], sizes = [8, 8], strides = [1, 1]} : vector<8x32xf32> to vector<8x8xf32>
    %157 = arith.truncf %155 : vector<8x8xf32> to vector<8x8xbf16>
    %158 = arith.truncf %156 : vector<8x8xf32> to vector<8x8xbf16>
    %cst_96 = arith.constant dense<0.000000e+00> : vector<8x8xf32>
    %159 = tpu.matmul %157, %158, %cst_96 {dimension_numbers = #tpu.dot_dimension_numbers<[1], [1], [0], [0], [0, 0, 1, 0], [], []>} : vector<8x8xbf16>, vector<8x8xbf16>, vector<8x8xf32> -> vector<8x8xf32>
    %160 = arith.addf %159, %46 : vector<8x8xf32>
    %cst_97 = arith.constant dense<0xFF800000> : vector<8xf32>
    %161 = vector.multi_reduction <maximumf>, %160, %cst_97 [1] : vector<8x8xf32> to vector<8xf32>
    %162 = vector.shape_cast %161 : vector<8xf32> to vector<8x1xf32>
    %163 = vector.broadcast %162 : vector<8x1xf32> to vector<8x8xf32>
    %164 = arith.subf %160, %163 : vector<8x8xf32>
    %165 = math.exp %164 : vector<8x8xf32>
    %cst_98 = arith.constant dense<0.000000e+00> : vector<8xf32>
    %166 = vector.multi_reduction <add>, %165, %cst_98 [1] : vector<8x8xf32> to vector<8xf32>
    %167 = vector.shape_cast %166 : vector<8xf32> to vector<8x1xf32>
    %168 = tpu.reciprocal %167 {approx = true} : vector<8x1xf32> -> vector<8x1xf32>
    %169 = vector.broadcast %168 : vector<8x1xf32> to vector<8x8xf32>
    %170 = arith.mulf %165, %169 : vector<8x8xf32>
    %171 = vector.extract_strided_slice %150 {offsets = [0, 0], sizes = [8, 8], strides = [1, 1]} : vector<8x32xf32> to vector<8x8xf32>
    %172 = arith.truncf %170 : vector<8x8xf32> to vector<8x8xbf16>
    %173 = arith.truncf %171 : vector<8x8xf32> to vector<8x8xbf16>
    %cst_99 = arith.constant dense<0.000000e+00> : vector<8x8xf32>
    %174 = tpu.matmul %172, %173, %cst_99 {dimension_numbers = #tpu.dot_dimension_numbers<[1], [0], [0], [1], [0, 0, 1, 1], [], []>} : vector<8x8xbf16>, vector<8x8xbf16>, vector<8x8xf32> -> vector<8x8xf32>
    %175 = vector.extract_strided_slice %152 {offsets = [0, 0], sizes = [8, 32], strides = [1, 1]} : vector<32x32xf32> to vector<8x32xf32>
    %176 = arith.truncf %174 : vector<8x8xf32> to vector<8x8xbf16>
    %177 = arith.truncf %175 : vector<8x32xf32> to vector<8x32xbf16>
    %cst_100 = arith.constant dense<0.000000e+00> : vector<8x32xf32>
    %178 = tpu.matmul %176, %177, %cst_100 {dimension_numbers = #tpu.dot_dimension_numbers<[1], [0], [0], [1], [0, 0, 1, 1], [], []>} : vector<8x8xbf16>, vector<8x32xbf16>, vector<8x32xf32> -> vector<8x32xf32>
    %179 = vector.extract_strided_slice %148 {offsets = [0, 8], sizes = [8, 8], strides = [1, 1]} : vector<8x32xf32> to vector<8x8xf32>
    %180 = vector.extract_strided_slice %149 {offsets = [0, 8], sizes = [8, 8], strides = [1, 1]} : vector<8x32xf32> to vector<8x8xf32>
    %181 = arith.truncf %179 : vector<8x8xf32> to vector<8x8xbf16>
    %182 = arith.truncf %180 : vector<8x8xf32> to vector<8x8xbf16>
    %cst_101 = arith.constant dense<0.000000e+00> : vector<8x8xf32>
    %183 = tpu.matmul %181, %182, %cst_101 {dimension_numbers = #tpu.dot_dimension_numbers<[1], [1], [0], [0], [0, 0, 1, 0], [], []>} : vector<8x8xbf16>, vector<8x8xbf16>, vector<8x8xf32> -> vector<8x8xf32>
    %184 = arith.addf %183, %46 : vector<8x8xf32>
    %cst_102 = arith.constant dense<0xFF800000> : vector<8xf32>
    %185 = vector.multi_reduction <maximumf>, %184, %cst_102 [1] : vector<8x8xf32> to vector<8xf32>
    %186 = vector.shape_cast %185 : vector<8xf32> to vector<8x1xf32>
    %187 = vector.broadcast %186 : vector<8x1xf32> to vector<8x8xf32>
    %188 = arith.subf %184, %187 : vector<8x8xf32>
    %189 = math.exp %188 : vector<8x8xf32>
    %cst_103 = arith.constant dense<0.000000e+00> : vector<8xf32>
    %190 = vector.multi_reduction <add>, %189, %cst_103 [1] : vector<8x8xf32> to vector<8xf32>
    %191 = vector.shape_cast %190 : vector<8xf32> to vector<8x1xf32>
    %192 = tpu.reciprocal %191 {approx = true} : vector<8x1xf32> -> vector<8x1xf32>
    %193 = vector.broadcast %192 : vector<8x1xf32> to vector<8x8xf32>
    %194 = arith.mulf %189, %193 : vector<8x8xf32>
    %195 = vector.extract_strided_slice %150 {offsets = [0, 8], sizes = [8, 8], strides = [1, 1]} : vector<8x32xf32> to vector<8x8xf32>
    %196 = arith.truncf %194 : vector<8x8xf32> to vector<8x8xbf16>
    %197 = arith.truncf %195 : vector<8x8xf32> to vector<8x8xbf16>
    %cst_104 = arith.constant dense<0.000000e+00> : vector<8x8xf32>
    %198 = tpu.matmul %196, %197, %cst_104 {dimension_numbers = #tpu.dot_dimension_numbers<[1], [0], [0], [1], [0, 0, 1, 1], [], []>} : vector<8x8xbf16>, vector<8x8xbf16>, vector<8x8xf32> -> vector<8x8xf32>
    %199 = vector.extract_strided_slice %152 {offsets = [8, 0], sizes = [8, 32], strides = [1, 1]} : vector<32x32xf32> to vector<8x32xf32>
    %200 = arith.truncf %198 : vector<8x8xf32> to vector<8x8xbf16>
    %201 = arith.truncf %199 : vector<8x32xf32> to vector<8x32xbf16>
    %cst_105 = arith.constant dense<0.000000e+00> : vector<8x32xf32>
    %202 = tpu.matmul %200, %201, %cst_105 {dimension_numbers = #tpu.dot_dimension_numbers<[1], [0], [0], [1], [0, 0, 1, 1], [], []>} : vector<8x8xbf16>, vector<8x32xbf16>, vector<8x32xf32> -> vector<8x32xf32>
    %203 = arith.addf %178, %202 : vector<8x32xf32>
    %204 = vector.extract_strided_slice %148 {offsets = [0, 16], sizes = [8, 8], strides = [1, 1]} : vector<8x32xf32> to vector<8x8xf32>
    %205 = vector.extract_strided_slice %149 {offsets = [0, 16], sizes = [8, 8], strides = [1, 1]} : vector<8x32xf32> to vector<8x8xf32>
    %206 = arith.truncf %204 : vector<8x8xf32> to vector<8x8xbf16>
    %207 = arith.truncf %205 : vector<8x8xf32> to vector<8x8xbf16>
    %cst_106 = arith.constant dense<0.000000e+00> : vector<8x8xf32>
    %208 = tpu.matmul %206, %207, %cst_106 {dimension_numbers = #tpu.dot_dimension_numbers<[1], [1], [0], [0], [0, 0, 1, 0], [], []>} : vector<8x8xbf16>, vector<8x8xbf16>, vector<8x8xf32> -> vector<8x8xf32>
    %209 = arith.addf %208, %46 : vector<8x8xf32>
    %cst_107 = arith.constant dense<0xFF800000> : vector<8xf32>
    %210 = vector.multi_reduction <maximumf>, %209, %cst_107 [1] : vector<8x8xf32> to vector<8xf32>
    %211 = vector.shape_cast %210 : vector<8xf32> to vector<8x1xf32>
    %212 = vector.broadcast %211 : vector<8x1xf32> to vector<8x8xf32>
    %213 = arith.subf %209, %212 : vector<8x8xf32>
    %214 = math.exp %213 : vector<8x8xf32>
    %cst_108 = arith.constant dense<0.000000e+00> : vector<8xf32>
    %215 = vector.multi_reduction <add>, %214, %cst_108 [1] : vector<8x8xf32> to vector<8xf32>
    %216 = vector.shape_cast %215 : vector<8xf32> to vector<8x1xf32>
    %217 = tpu.reciprocal %216 {approx = true} : vector<8x1xf32> -> vector<8x1xf32>
    %218 = vector.broadcast %217 : vector<8x1xf32> to vector<8x8xf32>
    %219 = arith.mulf %214, %218 : vector<8x8xf32>
    %220 = vector.extract_strided_slice %150 {offsets = [0, 16], sizes = [8, 8], strides = [1, 1]} : vector<8x32xf32> to vector<8x8xf32>
    %221 = arith.truncf %219 : vector<8x8xf32> to vector<8x8xbf16>
    %222 = arith.truncf %220 : vector<8x8xf32> to vector<8x8xbf16>
    %cst_109 = arith.constant dense<0.000000e+00> : vector<8x8xf32>
    %223 = tpu.matmul %221, %222, %cst_109 {dimension_numbers = #tpu.dot_dimension_numbers<[1], [0], [0], [1], [0, 0, 1, 1], [], []>} : vector<8x8xbf16>, vector<8x8xbf16>, vector<8x8xf32> -> vector<8x8xf32>
    %224 = vector.extract_strided_slice %152 {offsets = [16, 0], sizes = [8, 32], strides = [1, 1]} : vector<32x32xf32> to vector<8x32xf32>
    %225 = arith.truncf %223 : vector<8x8xf32> to vector<8x8xbf16>
    %226 = arith.truncf %224 : vector<8x32xf32> to vector<8x32xbf16>
    %cst_110 = arith.constant dense<0.000000e+00> : vector<8x32xf32>
    %227 = tpu.matmul %225, %226, %cst_110 {dimension_numbers = #tpu.dot_dimension_numbers<[1], [0], [0], [1], [0, 0, 1, 1], [], []>} : vector<8x8xbf16>, vector<8x32xbf16>, vector<8x32xf32> -> vector<8x32xf32>
    %228 = arith.addf %203, %227 : vector<8x32xf32>
    %229 = vector.extract_strided_slice %148 {offsets = [0, 24], sizes = [8, 8], strides = [1, 1]} : vector<8x32xf32> to vector<8x8xf32>
    %230 = vector.extract_strided_slice %149 {offsets = [0, 24], sizes = [8, 8], strides = [1, 1]} : vector<8x32xf32> to vector<8x8xf32>
    %231 = arith.truncf %229 : vector<8x8xf32> to vector<8x8xbf16>
    %232 = arith.truncf %230 : vector<8x8xf32> to vector<8x8xbf16>
    %cst_111 = arith.constant dense<0.000000e+00> : vector<8x8xf32>
    %233 = tpu.matmul %231, %232, %cst_111 {dimension_numbers = #tpu.dot_dimension_numbers<[1], [1], [0], [0], [0, 0, 1, 0], [], []>} : vector<8x8xbf16>, vector<8x8xbf16>, vector<8x8xf32> -> vector<8x8xf32>
    %234 = arith.addf %233, %46 : vector<8x8xf32>
    %cst_112 = arith.constant dense<0xFF800000> : vector<8xf32>
    %235 = vector.multi_reduction <maximumf>, %234, %cst_112 [1] : vector<8x8xf32> to vector<8xf32>
    %236 = vector.shape_cast %235 : vector<8xf32> to vector<8x1xf32>
    %237 = vector.broadcast %236 : vector<8x1xf32> to vector<8x8xf32>
    %238 = arith.subf %234, %237 : vector<8x8xf32>
    %239 = math.exp %238 : vector<8x8xf32>
    %cst_113 = arith.constant dense<0.000000e+00> : vector<8xf32>
    %240 = vector.multi_reduction <add>, %239, %cst_113 [1] : vector<8x8xf32> to vector<8xf32>
    %241 = vector.shape_cast %240 : vector<8xf32> to vector<8x1xf32>
    %242 = tpu.reciprocal %241 {approx = true} : vector<8x1xf32> -> vector<8x1xf32>
    %243 = vector.broadcast %242 : vector<8x1xf32> to vector<8x8xf32>
    %244 = arith.mulf %239, %243 : vector<8x8xf32>
    %245 = vector.extract_strided_slice %150 {offsets = [0, 24], sizes = [8, 8], strides = [1, 1]} : vector<8x32xf32> to vector<8x8xf32>
    %246 = arith.truncf %244 : vector<8x8xf32> to vector<8x8xbf16>
    %247 = arith.truncf %245 : vector<8x8xf32> to vector<8x8xbf16>
    %cst_114 = arith.constant dense<0.000000e+00> : vector<8x8xf32>
    %248 = tpu.matmul %246, %247, %cst_114 {dimension_numbers = #tpu.dot_dimension_numbers<[1], [0], [0], [1], [0, 0, 1, 1], [], []>} : vector<8x8xbf16>, vector<8x8xbf16>, vector<8x8xf32> -> vector<8x8xf32>
    %249 = vector.extract_strided_slice %152 {offsets = [24, 0], sizes = [8, 32], strides = [1, 1]} : vector<32x32xf32> to vector<8x32xf32>
    %250 = arith.truncf %248 : vector<8x8xf32> to vector<8x8xbf16>
    %251 = arith.truncf %249 : vector<8x32xf32> to vector<8x32xbf16>
    %cst_115 = arith.constant dense<0.000000e+00> : vector<8x32xf32>
    %252 = tpu.matmul %250, %251, %cst_115 {dimension_numbers = #tpu.dot_dimension_numbers<[1], [0], [0], [1], [0, 0, 1, 1], [], []>} : vector<8x8xbf16>, vector<8x32xbf16>, vector<8x32xf32> -> vector<8x32xf32>
    %253 = arith.addf %228, %252 : vector<8x32xf32>
    %254 = vector.broadcast %154 : vector<1x32xf32> to vector<8x32xf32>
    %255 = arith.addf %253, %254 : vector<8x32xf32>
    %256 = arith.addf %106, %255 : vector<8x32xf32>
    %257 = vector.extract_strided_slice %108 {offsets = [1, 0], sizes = [1, 32], strides = [1, 1]} : vector<3x32xf32> to vector<1x32xf32>
    %258 = vector.shape_cast %257 : vector<1x32xf32> to vector<32xf32>
    %259 = vector.extract_strided_slice %110 {offsets = [1, 0], sizes = [1, 32], strides = [1, 1]} : vector<3x32xf32> to vector<1x32xf32>
    %260 = vector.shape_cast %259 : vector<1x32xf32> to vector<32xf32>
    %cst_116 = arith.constant dense<0.000000e+00> : vector<8xf32>
    %261 = vector.multi_reduction <add>, %256, %cst_116 [1] : vector<8x32xf32> to vector<8xf32>
    %262 = vector.shape_cast %261 : vector<8xf32> to vector<8x1xf32>
    %cst_117 = arith.constant 3.200000e+01 : f32
    %263 = vector.broadcast %cst_117 : f32 to vector<8x1xf32>
    %264 = arith.divf %262, %263 : vector<8x1xf32>
    %265 = vector.broadcast %264 : vector<8x1xf32> to vector<8x32xf32>
    %266 = arith.subf %256, %265 : vector<8x32xf32>
    %267 = arith.mulf %266, %266 : vector<8x32xf32>
    %cst_118 = arith.constant dense<0.000000e+00> : vector<8xf32>
    %268 = vector.multi_reduction <add>, %267, %cst_118 [1] : vector<8x32xf32> to vector<8xf32>
    %269 = vector.shape_cast %268 : vector<8xf32> to vector<8x1xf32>
    %cst_119 = arith.constant 3.200000e+01 : f32
    %270 = vector.broadcast %cst_119 : f32 to vector<8x1xf32>
    %271 = arith.divf %269, %270 : vector<8x1xf32>
    %cst_120 = arith.constant 9.99999974E-6 : f32
    %272 = vector.broadcast %cst_120 : f32 to vector<8x1xf32>
    %273 = arith.addf %271, %272 : vector<8x1xf32>
    %274 = math.rsqrt %273 : vector<8x1xf32>
    %275 = vector.broadcast %274 : vector<8x1xf32> to vector<8x32xf32>
    %276 = arith.mulf %266, %275 : vector<8x32xf32>
    %277 = vector.shape_cast %258 : vector<32xf32> to vector<1x32xf32>
    %278 = vector.broadcast %277 : vector<1x32xf32> to vector<8x32xf32>
    %279 = arith.mulf %276, %278 : vector<8x32xf32>
    %280 = vector.shape_cast %260 : vector<32xf32> to vector<1x32xf32>
    %281 = vector.broadcast %280 : vector<1x32xf32> to vector<8x32xf32>
    %282 = arith.addf %279, %281 : vector<8x32xf32>
    %c0_121 = arith.constant 0 : index
    %c0_122 = arith.constant 0 : index
    %c0_123 = arith.constant 0 : index
    %283 = vector.load %arg27[%c0_121, %c0_122, %c0_123] : memref<2x32x32xf32, #tpu.memory_space<vmem>>, vector<1x32x32xf32>
    %284 = vector.shape_cast %283 : vector<1x32x32xf32> to vector<32x32xf32>
    %285 = arith.truncf %282 : vector<8x32xf32> to vector<8x32xbf16>
    %286 = arith.truncf %284 : vector<32x32xf32> to vector<32x32xbf16>
    %cst_124 = arith.constant dense<0.000000e+00> : vector<8x32xf32>
    %287 = tpu.matmul %285, %286, %cst_124 {dimension_numbers = #tpu.dot_dimension_numbers<[1], [0], [0], [1], [0, 0, 1, 1], [], []>} : vector<8x32xbf16>, vector<32x32xbf16>, vector<8x32xf32> -> vector<8x32xf32>
    %c0_125 = arith.constant 0 : index
    %c0_126 = arith.constant 0 : index
    %c0_127 = arith.constant 0 : index
    %288 = vector.load %arg28[%c0_125, %c0_126, %c0_127] : memref<2x1x32xf32, #tpu.memory_space<vmem>>, vector<1x1x32xf32>
    %289 = vector.shape_cast %288 : vector<1x1x32xf32> to vector<1x32xf32>
    %290 = vector.broadcast %289 : vector<1x32xf32> to vector<8x32xf32>
    %291 = arith.addf %287, %290 : vector<8x32xf32>
    %cst_128 = arith.constant 0.353553385 : f32
    %292 = vector.broadcast %cst_128 : f32 to vector<8x32xf32>
    %293 = arith.mulf %291, %292 : vector<8x32xf32>
    %c0_129 = arith.constant 0 : index
    %c0_130 = arith.constant 0 : index
    %c0_131 = arith.constant 0 : index
    %294 = vector.load %arg29[%c0_129, %c0_130, %c0_131] : memref<2x32x64xf32, #tpu.memory_space<vmem>>, vector<1x32x64xf32>
    %295 = vector.shape_cast %294 : vector<1x32x64xf32> to vector<32x64xf32>
    %296 = arith.truncf %94 : vector<18x32xf32> to vector<18x32xbf16>
    %297 = arith.truncf %295 : vector<32x64xf32> to vector<32x64xbf16>
    %cst_132 = arith.constant dense<0.000000e+00> : vector<18x64xf32>
    %298 = tpu.matmul %296, %297, %cst_132 {dimension_numbers = #tpu.dot_dimension_numbers<[1], [0], [0], [1], [0, 0, 1, 1], [], []>} : vector<18x32xbf16>, vector<32x64xbf16>, vector<18x64xf32> -> vector<18x64xf32>
    %c0_133 = arith.constant 0 : index
    %c0_134 = arith.constant 0 : index
    %c0_135 = arith.constant 0 : index
    %299 = vector.load %arg30[%c0_133, %c0_134, %c0_135] : memref<2x1x64xf32, #tpu.memory_space<vmem>>, vector<1x1x64xf32>
    %300 = vector.shape_cast %299 : vector<1x1x64xf32> to vector<1x64xf32>
    %301 = vector.broadcast %300 : vector<1x64xf32> to vector<18x64xf32>
    %302 = arith.addf %298, %301 : vector<18x64xf32>
    %303 = vector.extract_strided_slice %302 {offsets = [0, 0], sizes = [18, 32], strides = [1, 1]} : vector<18x64xf32> to vector<18x32xf32>
    %304 = vector.extract_strided_slice %302 {offsets = [0, 32], sizes = [18, 32], strides = [1, 1]} : vector<18x64xf32> to vector<18x32xf32>
    %c0_136 = arith.constant 0 : index
    %c0_137 = arith.constant 0 : index
    %c0_138 = arith.constant 0 : index
    %305 = vector.load %arg31[%c0_136, %c0_137, %c0_138] : memref<2x32x32xf32, #tpu.memory_space<vmem>>, vector<1x32x32xf32>
    %306 = vector.shape_cast %305 : vector<1x32x32xf32> to vector<32x32xf32>
    %c0_139 = arith.constant 0 : index
    %c0_140 = arith.constant 0 : index
    %c0_141 = arith.constant 0 : index
    %307 = vector.load %arg32[%c0_139, %c0_140, %c0_141] : memref<2x1x32xf32, #tpu.memory_space<vmem>>, vector<1x1x32xf32>
    %308 = vector.shape_cast %307 : vector<1x1x32xf32> to vector<1x32xf32>
    %309 = vector.extract_strided_slice %293 {offsets = [0, 0], sizes = [8, 8], strides = [1, 1]} : vector<8x32xf32> to vector<8x8xf32>
    %310 = vector.extract_strided_slice %303 {offsets = [0, 0], sizes = [18, 8], strides = [1, 1]} : vector<18x32xf32> to vector<18x8xf32>
    %311 = arith.truncf %309 : vector<8x8xf32> to vector<8x8xbf16>
    %312 = arith.truncf %310 : vector<18x8xf32> to vector<18x8xbf16>
    %cst_142 = arith.constant dense<0.000000e+00> : vector<8x18xf32>
    %313 = tpu.matmul %311, %312, %cst_142 {dimension_numbers = #tpu.dot_dimension_numbers<[1], [1], [0], [0], [0, 0, 1, 0], [], []>} : vector<8x8xbf16>, vector<18x8xbf16>, vector<8x18xf32> -> vector<8x18xf32>
    %314 = arith.addf %313, %54 : vector<8x18xf32>
    %cst_143 = arith.constant dense<0xFF800000> : vector<8xf32>
    %315 = vector.multi_reduction <maximumf>, %314, %cst_143 [1] : vector<8x18xf32> to vector<8xf32>
    %316 = vector.shape_cast %315 : vector<8xf32> to vector<8x1xf32>
    %317 = vector.broadcast %316 : vector<8x1xf32> to vector<8x18xf32>
    %318 = arith.subf %314, %317 : vector<8x18xf32>
    %319 = math.exp %318 : vector<8x18xf32>
    %cst_144 = arith.constant dense<0.000000e+00> : vector<8xf32>
    %320 = vector.multi_reduction <add>, %319, %cst_144 [1] : vector<8x18xf32> to vector<8xf32>
    %321 = vector.shape_cast %320 : vector<8xf32> to vector<8x1xf32>
    %322 = tpu.reciprocal %321 {approx = true} : vector<8x1xf32> -> vector<8x1xf32>
    %323 = vector.broadcast %322 : vector<8x1xf32> to vector<8x18xf32>
    %324 = arith.mulf %319, %323 : vector<8x18xf32>
    %325 = vector.extract_strided_slice %304 {offsets = [0, 0], sizes = [18, 8], strides = [1, 1]} : vector<18x32xf32> to vector<18x8xf32>
    %326 = arith.truncf %324 : vector<8x18xf32> to vector<8x18xbf16>
    %327 = arith.truncf %325 : vector<18x8xf32> to vector<18x8xbf16>
    %cst_145 = arith.constant dense<0.000000e+00> : vector<8x8xf32>
    %328 = tpu.matmul %326, %327, %cst_145 {dimension_numbers = #tpu.dot_dimension_numbers<[1], [0], [0], [1], [0, 0, 1, 1], [], []>} : vector<8x18xbf16>, vector<18x8xbf16>, vector<8x8xf32> -> vector<8x8xf32>
    %329 = vector.extract_strided_slice %306 {offsets = [0, 0], sizes = [8, 32], strides = [1, 1]} : vector<32x32xf32> to vector<8x32xf32>
    %330 = arith.truncf %328 : vector<8x8xf32> to vector<8x8xbf16>
    %331 = arith.truncf %329 : vector<8x32xf32> to vector<8x32xbf16>
    %cst_146 = arith.constant dense<0.000000e+00> : vector<8x32xf32>
    %332 = tpu.matmul %330, %331, %cst_146 {dimension_numbers = #tpu.dot_dimension_numbers<[1], [0], [0], [1], [0, 0, 1, 1], [], []>} : vector<8x8xbf16>, vector<8x32xbf16>, vector<8x32xf32> -> vector<8x32xf32>
    %333 = vector.extract_strided_slice %293 {offsets = [0, 8], sizes = [8, 8], strides = [1, 1]} : vector<8x32xf32> to vector<8x8xf32>
    %334 = vector.extract_strided_slice %303 {offsets = [0, 8], sizes = [18, 8], strides = [1, 1]} : vector<18x32xf32> to vector<18x8xf32>
    %335 = arith.truncf %333 : vector<8x8xf32> to vector<8x8xbf16>
    %336 = arith.truncf %334 : vector<18x8xf32> to vector<18x8xbf16>
    %cst_147 = arith.constant dense<0.000000e+00> : vector<8x18xf32>
    %337 = tpu.matmul %335, %336, %cst_147 {dimension_numbers = #tpu.dot_dimension_numbers<[1], [1], [0], [0], [0, 0, 1, 0], [], []>} : vector<8x8xbf16>, vector<18x8xbf16>, vector<8x18xf32> -> vector<8x18xf32>
    %338 = arith.addf %337, %54 : vector<8x18xf32>
    %cst_148 = arith.constant dense<0xFF800000> : vector<8xf32>
    %339 = vector.multi_reduction <maximumf>, %338, %cst_148 [1] : vector<8x18xf32> to vector<8xf32>
    %340 = vector.shape_cast %339 : vector<8xf32> to vector<8x1xf32>
    %341 = vector.broadcast %340 : vector<8x1xf32> to vector<8x18xf32>
    %342 = arith.subf %338, %341 : vector<8x18xf32>
    %343 = math.exp %342 : vector<8x18xf32>
    %cst_149 = arith.constant dense<0.000000e+00> : vector<8xf32>
    %344 = vector.multi_reduction <add>, %343, %cst_149 [1] : vector<8x18xf32> to vector<8xf32>
    %345 = vector.shape_cast %344 : vector<8xf32> to vector<8x1xf32>
    %346 = tpu.reciprocal %345 {approx = true} : vector<8x1xf32> -> vector<8x1xf32>
    %347 = vector.broadcast %346 : vector<8x1xf32> to vector<8x18xf32>
    %348 = arith.mulf %343, %347 : vector<8x18xf32>
    %349 = vector.extract_strided_slice %304 {offsets = [0, 8], sizes = [18, 8], strides = [1, 1]} : vector<18x32xf32> to vector<18x8xf32>
    %350 = arith.truncf %348 : vector<8x18xf32> to vector<8x18xbf16>
    %351 = arith.truncf %349 : vector<18x8xf32> to vector<18x8xbf16>
    %cst_150 = arith.constant dense<0.000000e+00> : vector<8x8xf32>
    %352 = tpu.matmul %350, %351, %cst_150 {dimension_numbers = #tpu.dot_dimension_numbers<[1], [0], [0], [1], [0, 0, 1, 1], [], []>} : vector<8x18xbf16>, vector<18x8xbf16>, vector<8x8xf32> -> vector<8x8xf32>
    %353 = vector.extract_strided_slice %306 {offsets = [8, 0], sizes = [8, 32], strides = [1, 1]} : vector<32x32xf32> to vector<8x32xf32>
    %354 = arith.truncf %352 : vector<8x8xf32> to vector<8x8xbf16>
    %355 = arith.truncf %353 : vector<8x32xf32> to vector<8x32xbf16>
    %cst_151 = arith.constant dense<0.000000e+00> : vector<8x32xf32>
    %356 = tpu.matmul %354, %355, %cst_151 {dimension_numbers = #tpu.dot_dimension_numbers<[1], [0], [0], [1], [0, 0, 1, 1], [], []>} : vector<8x8xbf16>, vector<8x32xbf16>, vector<8x32xf32> -> vector<8x32xf32>
    %357 = arith.addf %332, %356 : vector<8x32xf32>
    %358 = vector.extract_strided_slice %293 {offsets = [0, 16], sizes = [8, 8], strides = [1, 1]} : vector<8x32xf32> to vector<8x8xf32>
    %359 = vector.extract_strided_slice %303 {offsets = [0, 16], sizes = [18, 8], strides = [1, 1]} : vector<18x32xf32> to vector<18x8xf32>
    %360 = arith.truncf %358 : vector<8x8xf32> to vector<8x8xbf16>
    %361 = arith.truncf %359 : vector<18x8xf32> to vector<18x8xbf16>
    %cst_152 = arith.constant dense<0.000000e+00> : vector<8x18xf32>
    %362 = tpu.matmul %360, %361, %cst_152 {dimension_numbers = #tpu.dot_dimension_numbers<[1], [1], [0], [0], [0, 0, 1, 0], [], []>} : vector<8x8xbf16>, vector<18x8xbf16>, vector<8x18xf32> -> vector<8x18xf32>
    %363 = arith.addf %362, %54 : vector<8x18xf32>
    %cst_153 = arith.constant dense<0xFF800000> : vector<8xf32>
    %364 = vector.multi_reduction <maximumf>, %363, %cst_153 [1] : vector<8x18xf32> to vector<8xf32>
    %365 = vector.shape_cast %364 : vector<8xf32> to vector<8x1xf32>
    %366 = vector.broadcast %365 : vector<8x1xf32> to vector<8x18xf32>
    %367 = arith.subf %363, %366 : vector<8x18xf32>
    %368 = math.exp %367 : vector<8x18xf32>
    %cst_154 = arith.constant dense<0.000000e+00> : vector<8xf32>
    %369 = vector.multi_reduction <add>, %368, %cst_154 [1] : vector<8x18xf32> to vector<8xf32>
    %370 = vector.shape_cast %369 : vector<8xf32> to vector<8x1xf32>
    %371 = tpu.reciprocal %370 {approx = true} : vector<8x1xf32> -> vector<8x1xf32>
    %372 = vector.broadcast %371 : vector<8x1xf32> to vector<8x18xf32>
    %373 = arith.mulf %368, %372 : vector<8x18xf32>
    %374 = vector.extract_strided_slice %304 {offsets = [0, 16], sizes = [18, 8], strides = [1, 1]} : vector<18x32xf32> to vector<18x8xf32>
    %375 = arith.truncf %373 : vector<8x18xf32> to vector<8x18xbf16>
    %376 = arith.truncf %374 : vector<18x8xf32> to vector<18x8xbf16>
    %cst_155 = arith.constant dense<0.000000e+00> : vector<8x8xf32>
    %377 = tpu.matmul %375, %376, %cst_155 {dimension_numbers = #tpu.dot_dimension_numbers<[1], [0], [0], [1], [0, 0, 1, 1], [], []>} : vector<8x18xbf16>, vector<18x8xbf16>, vector<8x8xf32> -> vector<8x8xf32>
    %378 = vector.extract_strided_slice %306 {offsets = [16, 0], sizes = [8, 32], strides = [1, 1]} : vector<32x32xf32> to vector<8x32xf32>
    %379 = arith.truncf %377 : vector<8x8xf32> to vector<8x8xbf16>
    %380 = arith.truncf %378 : vector<8x32xf32> to vector<8x32xbf16>
    %cst_156 = arith.constant dense<0.000000e+00> : vector<8x32xf32>
    %381 = tpu.matmul %379, %380, %cst_156 {dimension_numbers = #tpu.dot_dimension_numbers<[1], [0], [0], [1], [0, 0, 1, 1], [], []>} : vector<8x8xbf16>, vector<8x32xbf16>, vector<8x32xf32> -> vector<8x32xf32>
    %382 = arith.addf %357, %381 : vector<8x32xf32>
    %383 = vector.extract_strided_slice %293 {offsets = [0, 24], sizes = [8, 8], strides = [1, 1]} : vector<8x32xf32> to vector<8x8xf32>
    %384 = vector.extract_strided_slice %303 {offsets = [0, 24], sizes = [18, 8], strides = [1, 1]} : vector<18x32xf32> to vector<18x8xf32>
    %385 = arith.truncf %383 : vector<8x8xf32> to vector<8x8xbf16>
    %386 = arith.truncf %384 : vector<18x8xf32> to vector<18x8xbf16>
    %cst_157 = arith.constant dense<0.000000e+00> : vector<8x18xf32>
    %387 = tpu.matmul %385, %386, %cst_157 {dimension_numbers = #tpu.dot_dimension_numbers<[1], [1], [0], [0], [0, 0, 1, 0], [], []>} : vector<8x8xbf16>, vector<18x8xbf16>, vector<8x18xf32> -> vector<8x18xf32>
    %388 = arith.addf %387, %54 : vector<8x18xf32>
    %cst_158 = arith.constant dense<0xFF800000> : vector<8xf32>
    %389 = vector.multi_reduction <maximumf>, %388, %cst_158 [1] : vector<8x18xf32> to vector<8xf32>
    %390 = vector.shape_cast %389 : vector<8xf32> to vector<8x1xf32>
    %391 = vector.broadcast %390 : vector<8x1xf32> to vector<8x18xf32>
    %392 = arith.subf %388, %391 : vector<8x18xf32>
    %393 = math.exp %392 : vector<8x18xf32>
    %cst_159 = arith.constant dense<0.000000e+00> : vector<8xf32>
    %394 = vector.multi_reduction <add>, %393, %cst_159 [1] : vector<8x18xf32> to vector<8xf32>
    %395 = vector.shape_cast %394 : vector<8xf32> to vector<8x1xf32>
    %396 = tpu.reciprocal %395 {approx = true} : vector<8x1xf32> -> vector<8x1xf32>
    %397 = vector.broadcast %396 : vector<8x1xf32> to vector<8x18xf32>
    %398 = arith.mulf %393, %397 : vector<8x18xf32>
    %399 = vector.extract_strided_slice %304 {offsets = [0, 24], sizes = [18, 8], strides = [1, 1]} : vector<18x32xf32> to vector<18x8xf32>
    %400 = arith.truncf %398 : vector<8x18xf32> to vector<8x18xbf16>
    %401 = arith.truncf %399 : vector<18x8xf32> to vector<18x8xbf16>
    %cst_160 = arith.constant dense<0.000000e+00> : vector<8x8xf32>
    %402 = tpu.matmul %400, %401, %cst_160 {dimension_numbers = #tpu.dot_dimension_numbers<[1], [0], [0], [1], [0, 0, 1, 1], [], []>} : vector<8x18xbf16>, vector<18x8xbf16>, vector<8x8xf32> -> vector<8x8xf32>
    %403 = vector.extract_strided_slice %306 {offsets = [24, 0], sizes = [8, 32], strides = [1, 1]} : vector<32x32xf32> to vector<8x32xf32>
    %404 = arith.truncf %402 : vector<8x8xf32> to vector<8x8xbf16>
    %405 = arith.truncf %403 : vector<8x32xf32> to vector<8x32xbf16>
    %cst_161 = arith.constant dense<0.000000e+00> : vector<8x32xf32>
    %406 = tpu.matmul %404, %405, %cst_161 {dimension_numbers = #tpu.dot_dimension_numbers<[1], [0], [0], [1], [0, 0, 1, 1], [], []>} : vector<8x8xbf16>, vector<8x32xbf16>, vector<8x32xf32> -> vector<8x32xf32>
    %407 = arith.addf %382, %406 : vector<8x32xf32>
    %408 = vector.broadcast %308 : vector<1x32xf32> to vector<8x32xf32>
    %409 = arith.addf %407, %408 : vector<8x32xf32>
    %410 = arith.addf %256, %409 : vector<8x32xf32>
    %411 = vector.extract_strided_slice %108 {offsets = [2, 0], sizes = [1, 32], strides = [1, 1]} : vector<3x32xf32> to vector<1x32xf32>
    %412 = vector.shape_cast %411 : vector<1x32xf32> to vector<32xf32>
    %413 = vector.extract_strided_slice %110 {offsets = [2, 0], sizes = [1, 32], strides = [1, 1]} : vector<3x32xf32> to vector<1x32xf32>
    %414 = vector.shape_cast %413 : vector<1x32xf32> to vector<32xf32>
    %cst_162 = arith.constant dense<0.000000e+00> : vector<8xf32>
    %415 = vector.multi_reduction <add>, %410, %cst_162 [1] : vector<8x32xf32> to vector<8xf32>
    %416 = vector.shape_cast %415 : vector<8xf32> to vector<8x1xf32>
    %cst_163 = arith.constant 3.200000e+01 : f32
    %417 = vector.broadcast %cst_163 : f32 to vector<8x1xf32>
    %418 = arith.divf %416, %417 : vector<8x1xf32>
    %419 = vector.broadcast %418 : vector<8x1xf32> to vector<8x32xf32>
    %420 = arith.subf %410, %419 : vector<8x32xf32>
    %421 = arith.mulf %420, %420 : vector<8x32xf32>
    %cst_164 = arith.constant dense<0.000000e+00> : vector<8xf32>
    %422 = vector.multi_reduction <add>, %421, %cst_164 [1] : vector<8x32xf32> to vector<8xf32>
    %423 = vector.shape_cast %422 : vector<8xf32> to vector<8x1xf32>
    %cst_165 = arith.constant 3.200000e+01 : f32
    %424 = vector.broadcast %cst_165 : f32 to vector<8x1xf32>
    %425 = arith.divf %423, %424 : vector<8x1xf32>
    %cst_166 = arith.constant 9.99999974E-6 : f32
    %426 = vector.broadcast %cst_166 : f32 to vector<8x1xf32>
    %427 = arith.addf %425, %426 : vector<8x1xf32>
    %428 = math.rsqrt %427 : vector<8x1xf32>
    %429 = vector.broadcast %428 : vector<8x1xf32> to vector<8x32xf32>
    %430 = arith.mulf %420, %429 : vector<8x32xf32>
    %431 = vector.shape_cast %412 : vector<32xf32> to vector<1x32xf32>
    %432 = vector.broadcast %431 : vector<1x32xf32> to vector<8x32xf32>
    %433 = arith.mulf %430, %432 : vector<8x32xf32>
    %434 = vector.shape_cast %414 : vector<32xf32> to vector<1x32xf32>
    %435 = vector.broadcast %434 : vector<1x32xf32> to vector<8x32xf32>
    %436 = arith.addf %433, %435 : vector<8x32xf32>
    %c0_167 = arith.constant 0 : index
    %c0_168 = arith.constant 0 : index
    %c0_169 = arith.constant 0 : index
    %437 = vector.load %arg33[%c0_167, %c0_168, %c0_169] : memref<2x32x128xf32, #tpu.memory_space<vmem>>, vector<1x32x128xf32>
    %438 = vector.shape_cast %437 : vector<1x32x128xf32> to vector<32x128xf32>
    %439 = arith.truncf %436 : vector<8x32xf32> to vector<8x32xbf16>
    %440 = arith.truncf %438 : vector<32x128xf32> to vector<32x128xbf16>
    %cst_170 = arith.constant dense<0.000000e+00> : vector<8x128xf32>
    %441 = tpu.matmul %439, %440, %cst_170 {dimension_numbers = #tpu.dot_dimension_numbers<[1], [0], [0], [1], [0, 0, 1, 1], [], []>} : vector<8x32xbf16>, vector<32x128xbf16>, vector<8x128xf32> -> vector<8x128xf32>
    %c0_171 = arith.constant 0 : index
    %c0_172 = arith.constant 0 : index
    %c0_173 = arith.constant 0 : index
    %442 = vector.load %arg34[%c0_171, %c0_172, %c0_173] : memref<2x1x128xf32, #tpu.memory_space<vmem>>, vector<1x1x128xf32>
    %443 = vector.shape_cast %442 : vector<1x1x128xf32> to vector<1x128xf32>
    %444 = vector.broadcast %443 : vector<1x128xf32> to vector<8x128xf32>
    %445 = arith.addf %441, %444 : vector<8x128xf32>
    %cst_174 = arith.constant 5.000000e-01 : f32
    %446 = vector.broadcast %cst_174 : f32 to vector<8x128xf32>
    %447 = arith.mulf %446, %445 : vector<8x128xf32>
    %cst_175 = arith.constant 0.707106769 : f32
    %448 = vector.broadcast %cst_175 : f32 to vector<8x128xf32>
    %449 = arith.mulf %445, %448 : vector<8x128xf32>
    %cst_176 = arith.constant 0.000000e+00 : f32
    %450 = vector.broadcast %cst_176 : f32 to vector<8x128xf32>
    %451 = arith.cmpf oge, %449, %450 : vector<8x128xf32>
    %cst_177 = arith.constant 1.000000e+00 : f32
    %cst_178 = arith.constant -1.000000e+00 : f32
    %452 = vector.broadcast %cst_177 : f32 to vector<8x128xf32>
    %453 = vector.broadcast %cst_178 : f32 to vector<8x128xf32>
    %454 = arith.select %451, %452, %453 : vector<8x128xi1>, vector<8x128xf32>
    %455 = math.absf %449 : vector<8x128xf32>
    %cst_179 = arith.constant 0.327591091 : f32
    %456 = vector.broadcast %cst_179 : f32 to vector<8x128xf32>
    %457 = arith.mulf %456, %455 : vector<8x128xf32>
    %cst_180 = arith.constant 1.000000e+00 : f32
    %458 = vector.broadcast %cst_180 : f32 to vector<8x128xf32>
    %459 = arith.addf %458, %457 : vector<8x128xf32>
    %cst_181 = arith.constant 1.000000e+00 : f32
    %460 = vector.broadcast %cst_181 : f32 to vector<8x128xf32>
    %461 = arith.divf %460, %459 : vector<8x128xf32>
    %cst_182 = arith.constant 1.06140542 : f32
    %462 = vector.broadcast %cst_182 : f32 to vector<8x128xf32>
    %463 = arith.mulf %462, %461 : vector<8x128xf32>
    %cst_183 = arith.constant -1.45315206 : f32
    %464 = vector.broadcast %cst_183 : f32 to vector<8x128xf32>
    %465 = arith.addf %463, %464 : vector<8x128xf32>
    %466 = arith.mulf %465, %461 : vector<8x128xf32>
    %cst_184 = arith.constant 1.42141378 : f32
    %467 = vector.broadcast %cst_184 : f32 to vector<8x128xf32>
    %468 = arith.addf %466, %467 : vector<8x128xf32>
    %469 = arith.mulf %468, %461 : vector<8x128xf32>
    %cst_185 = arith.constant -0.284496725 : f32
    %470 = vector.broadcast %cst_185 : f32 to vector<8x128xf32>
    %471 = arith.addf %469, %470 : vector<8x128xf32>
    %472 = arith.mulf %471, %461 : vector<8x128xf32>
    %cst_186 = arith.constant 0.254829586 : f32
    %473 = vector.broadcast %cst_186 : f32 to vector<8x128xf32>
    %474 = arith.addf %472, %473 : vector<8x128xf32>
    %475 = arith.mulf %474, %461 : vector<8x128xf32>
    %cst_187 = arith.constant 0.000000e+00 : f32
    %476 = vector.broadcast %cst_187 : f32 to vector<8x128xf32>
    %477 = arith.subf %476, %455 : vector<8x128xf32>
    %478 = arith.mulf %477, %455 : vector<8x128xf32>
    %479 = math.exp %478 : vector<8x128xf32>
    %480 = arith.mulf %475, %479 : vector<8x128xf32>
    %cst_188 = arith.constant 1.000000e+00 : f32
    %481 = vector.broadcast %cst_188 : f32 to vector<8x128xf32>
    %482 = arith.subf %481, %480 : vector<8x128xf32>
    %483 = arith.mulf %454, %482 : vector<8x128xf32>
    %cst_189 = arith.constant 1.000000e+00 : f32
    %484 = vector.broadcast %cst_189 : f32 to vector<8x128xf32>
    %485 = arith.addf %484, %483 : vector<8x128xf32>
    %486 = arith.mulf %447, %485 : vector<8x128xf32>
    %c0_190 = arith.constant 0 : index
    %c0_191 = arith.constant 0 : index
    %c0_192 = arith.constant 0 : index
    %487 = vector.load %arg35[%c0_190, %c0_191, %c0_192] : memref<2x128x32xf32, #tpu.memory_space<vmem>>, vector<1x128x32xf32>
    %488 = vector.shape_cast %487 : vector<1x128x32xf32> to vector<128x32xf32>
    %489 = arith.truncf %486 : vector<8x128xf32> to vector<8x128xbf16>
    %490 = arith.truncf %488 : vector<128x32xf32> to vector<128x32xbf16>
    %cst_193 = arith.constant dense<0.000000e+00> : vector<8x32xf32>
    %491 = tpu.matmul %489, %490, %cst_193 {dimension_numbers = #tpu.dot_dimension_numbers<[1], [0], [0], [1], [0, 0, 1, 1], [], []>} : vector<8x128xbf16>, vector<128x32xbf16>, vector<8x32xf32> -> vector<8x32xf32>
    %492 = arith.addf %410, %491 : vector<8x32xf32>
    %c0_194 = arith.constant 0 : index
    %c0_195 = arith.constant 0 : index
    %c0_196 = arith.constant 0 : index
    %493 = vector.load %arg36[%c0_194, %c0_195, %c0_196] : memref<2x1x32xf32, #tpu.memory_space<vmem>>, vector<1x1x32xf32>
    %494 = vector.shape_cast %493 : vector<1x1x32xf32> to vector<1x32xf32>
    %495 = vector.broadcast %494 : vector<1x32xf32> to vector<8x32xf32>
    %496 = arith.addf %492, %495 : vector<8x32xf32>
    %c1 = arith.constant 1 : index
    %c0_197 = arith.constant 0 : index
    %c0_198 = arith.constant 0 : index
    %497 = vector.load %arg21[%c1, %c0_197, %c0_198] : memref<2x3x32xf32, #tpu.memory_space<vmem>>, vector<1x3x32xf32>
    %498 = vector.shape_cast %497 : vector<1x3x32xf32> to vector<3x32xf32>
    %c1_199 = arith.constant 1 : index
    %c0_200 = arith.constant 0 : index
    %c0_201 = arith.constant 0 : index
    %499 = vector.load %arg22[%c1_199, %c0_200, %c0_201] : memref<2x3x32xf32, #tpu.memory_space<vmem>>, vector<1x3x32xf32>
    %500 = vector.shape_cast %499 : vector<1x3x32xf32> to vector<3x32xf32>
    %501 = vector.extract_strided_slice %498 {offsets = [0, 0], sizes = [1, 32], strides = [1, 1]} : vector<3x32xf32> to vector<1x32xf32>
    %502 = vector.shape_cast %501 : vector<1x32xf32> to vector<32xf32>
    %503 = vector.extract_strided_slice %500 {offsets = [0, 0], sizes = [1, 32], strides = [1, 1]} : vector<3x32xf32> to vector<1x32xf32>
    %504 = vector.shape_cast %503 : vector<1x32xf32> to vector<32xf32>
    %cst_202 = arith.constant dense<0.000000e+00> : vector<8xf32>
    %505 = vector.multi_reduction <add>, %496, %cst_202 [1] : vector<8x32xf32> to vector<8xf32>
    %506 = vector.shape_cast %505 : vector<8xf32> to vector<8x1xf32>
    %cst_203 = arith.constant 3.200000e+01 : f32
    %507 = vector.broadcast %cst_203 : f32 to vector<8x1xf32>
    %508 = arith.divf %506, %507 : vector<8x1xf32>
    %509 = vector.broadcast %508 : vector<8x1xf32> to vector<8x32xf32>
    %510 = arith.subf %496, %509 : vector<8x32xf32>
    %511 = arith.mulf %510, %510 : vector<8x32xf32>
    %cst_204 = arith.constant dense<0.000000e+00> : vector<8xf32>
    %512 = vector.multi_reduction <add>, %511, %cst_204 [1] : vector<8x32xf32> to vector<8xf32>
    %513 = vector.shape_cast %512 : vector<8xf32> to vector<8x1xf32>
    %cst_205 = arith.constant 3.200000e+01 : f32
    %514 = vector.broadcast %cst_205 : f32 to vector<8x1xf32>
    %515 = arith.divf %513, %514 : vector<8x1xf32>
    %cst_206 = arith.constant 9.99999974E-6 : f32
    %516 = vector.broadcast %cst_206 : f32 to vector<8x1xf32>
    %517 = arith.addf %515, %516 : vector<8x1xf32>
    %518 = math.rsqrt %517 : vector<8x1xf32>
    %519 = vector.broadcast %518 : vector<8x1xf32> to vector<8x32xf32>
    %520 = arith.mulf %510, %519 : vector<8x32xf32>
    %521 = vector.shape_cast %502 : vector<32xf32> to vector<1x32xf32>
    %522 = vector.broadcast %521 : vector<1x32xf32> to vector<8x32xf32>
    %523 = arith.mulf %520, %522 : vector<8x32xf32>
    %524 = vector.shape_cast %504 : vector<32xf32> to vector<1x32xf32>
    %525 = vector.broadcast %524 : vector<1x32xf32> to vector<8x32xf32>
    %526 = arith.addf %523, %525 : vector<8x32xf32>
    %c1_207 = arith.constant 1 : index
    %c0_208 = arith.constant 0 : index
    %c0_209 = arith.constant 0 : index
    %527 = vector.load %arg23[%c1_207, %c0_208, %c0_209] : memref<2x32x96xf32, #tpu.memory_space<vmem>>, vector<1x32x96xf32>
    %528 = vector.shape_cast %527 : vector<1x32x96xf32> to vector<32x96xf32>
    %529 = arith.truncf %526 : vector<8x32xf32> to vector<8x32xbf16>
    %530 = arith.truncf %528 : vector<32x96xf32> to vector<32x96xbf16>
    %cst_210 = arith.constant dense<0.000000e+00> : vector<8x96xf32>
    %531 = tpu.matmul %529, %530, %cst_210 {dimension_numbers = #tpu.dot_dimension_numbers<[1], [0], [0], [1], [0, 0, 1, 1], [], []>} : vector<8x32xbf16>, vector<32x96xbf16>, vector<8x96xf32> -> vector<8x96xf32>
    %c1_211 = arith.constant 1 : index
    %c0_212 = arith.constant 0 : index
    %c0_213 = arith.constant 0 : index
    %532 = vector.load %arg24[%c1_211, %c0_212, %c0_213] : memref<2x1x96xf32, #tpu.memory_space<vmem>>, vector<1x1x96xf32>
    %533 = vector.shape_cast %532 : vector<1x1x96xf32> to vector<1x96xf32>
    %534 = vector.broadcast %533 : vector<1x96xf32> to vector<8x96xf32>
    %535 = arith.addf %531, %534 : vector<8x96xf32>
    %536 = vector.extract_strided_slice %535 {offsets = [0, 0], sizes = [8, 32], strides = [1, 1]} : vector<8x96xf32> to vector<8x32xf32>
    %cst_214 = arith.constant 0.353553385 : f32
    %537 = vector.broadcast %cst_214 : f32 to vector<8x32xf32>
    %538 = arith.mulf %536, %537 : vector<8x32xf32>
    %539 = vector.extract_strided_slice %535 {offsets = [0, 32], sizes = [8, 32], strides = [1, 1]} : vector<8x96xf32> to vector<8x32xf32>
    %540 = vector.extract_strided_slice %535 {offsets = [0, 64], sizes = [8, 32], strides = [1, 1]} : vector<8x96xf32> to vector<8x32xf32>
    %c1_215 = arith.constant 1 : index
    %c0_216 = arith.constant 0 : index
    %c0_217 = arith.constant 0 : index
    %541 = vector.load %arg25[%c1_215, %c0_216, %c0_217] : memref<2x32x32xf32, #tpu.memory_space<vmem>>, vector<1x32x32xf32>
    %542 = vector.shape_cast %541 : vector<1x32x32xf32> to vector<32x32xf32>
    %c1_218 = arith.constant 1 : index
    %c0_219 = arith.constant 0 : index
    %c0_220 = arith.constant 0 : index
    %543 = vector.load %arg26[%c1_218, %c0_219, %c0_220] : memref<2x1x32xf32, #tpu.memory_space<vmem>>, vector<1x1x32xf32>
    %544 = vector.shape_cast %543 : vector<1x1x32xf32> to vector<1x32xf32>
    %545 = vector.extract_strided_slice %538 {offsets = [0, 0], sizes = [8, 8], strides = [1, 1]} : vector<8x32xf32> to vector<8x8xf32>
    %546 = vector.extract_strided_slice %539 {offsets = [0, 0], sizes = [8, 8], strides = [1, 1]} : vector<8x32xf32> to vector<8x8xf32>
    %547 = arith.truncf %545 : vector<8x8xf32> to vector<8x8xbf16>
    %548 = arith.truncf %546 : vector<8x8xf32> to vector<8x8xbf16>
    %cst_221 = arith.constant dense<0.000000e+00> : vector<8x8xf32>
    %549 = tpu.matmul %547, %548, %cst_221 {dimension_numbers = #tpu.dot_dimension_numbers<[1], [1], [0], [0], [0, 0, 1, 0], [], []>} : vector<8x8xbf16>, vector<8x8xbf16>, vector<8x8xf32> -> vector<8x8xf32>
    %550 = arith.addf %549, %46 : vector<8x8xf32>
    %cst_222 = arith.constant dense<0xFF800000> : vector<8xf32>
    %551 = vector.multi_reduction <maximumf>, %550, %cst_222 [1] : vector<8x8xf32> to vector<8xf32>
    %552 = vector.shape_cast %551 : vector<8xf32> to vector<8x1xf32>
    %553 = vector.broadcast %552 : vector<8x1xf32> to vector<8x8xf32>
    %554 = arith.subf %550, %553 : vector<8x8xf32>
    %555 = math.exp %554 : vector<8x8xf32>
    %cst_223 = arith.constant dense<0.000000e+00> : vector<8xf32>
    %556 = vector.multi_reduction <add>, %555, %cst_223 [1] : vector<8x8xf32> to vector<8xf32>
    %557 = vector.shape_cast %556 : vector<8xf32> to vector<8x1xf32>
    %558 = tpu.reciprocal %557 {approx = true} : vector<8x1xf32> -> vector<8x1xf32>
    %559 = vector.broadcast %558 : vector<8x1xf32> to vector<8x8xf32>
    %560 = arith.mulf %555, %559 : vector<8x8xf32>
    %561 = vector.extract_strided_slice %540 {offsets = [0, 0], sizes = [8, 8], strides = [1, 1]} : vector<8x32xf32> to vector<8x8xf32>
    %562 = arith.truncf %560 : vector<8x8xf32> to vector<8x8xbf16>
    %563 = arith.truncf %561 : vector<8x8xf32> to vector<8x8xbf16>
    %cst_224 = arith.constant dense<0.000000e+00> : vector<8x8xf32>
    %564 = tpu.matmul %562, %563, %cst_224 {dimension_numbers = #tpu.dot_dimension_numbers<[1], [0], [0], [1], [0, 0, 1, 1], [], []>} : vector<8x8xbf16>, vector<8x8xbf16>, vector<8x8xf32> -> vector<8x8xf32>
    %565 = vector.extract_strided_slice %542 {offsets = [0, 0], sizes = [8, 32], strides = [1, 1]} : vector<32x32xf32> to vector<8x32xf32>
    %566 = arith.truncf %564 : vector<8x8xf32> to vector<8x8xbf16>
    %567 = arith.truncf %565 : vector<8x32xf32> to vector<8x32xbf16>
    %cst_225 = arith.constant dense<0.000000e+00> : vector<8x32xf32>
    %568 = tpu.matmul %566, %567, %cst_225 {dimension_numbers = #tpu.dot_dimension_numbers<[1], [0], [0], [1], [0, 0, 1, 1], [], []>} : vector<8x8xbf16>, vector<8x32xbf16>, vector<8x32xf32> -> vector<8x32xf32>
    %569 = vector.extract_strided_slice %538 {offsets = [0, 8], sizes = [8, 8], strides = [1, 1]} : vector<8x32xf32> to vector<8x8xf32>
    %570 = vector.extract_strided_slice %539 {offsets = [0, 8], sizes = [8, 8], strides = [1, 1]} : vector<8x32xf32> to vector<8x8xf32>
    %571 = arith.truncf %569 : vector<8x8xf32> to vector<8x8xbf16>
    %572 = arith.truncf %570 : vector<8x8xf32> to vector<8x8xbf16>
    %cst_226 = arith.constant dense<0.000000e+00> : vector<8x8xf32>
    %573 = tpu.matmul %571, %572, %cst_226 {dimension_numbers = #tpu.dot_dimension_numbers<[1], [1], [0], [0], [0, 0, 1, 0], [], []>} : vector<8x8xbf16>, vector<8x8xbf16>, vector<8x8xf32> -> vector<8x8xf32>
    %574 = arith.addf %573, %46 : vector<8x8xf32>
    %cst_227 = arith.constant dense<0xFF800000> : vector<8xf32>
    %575 = vector.multi_reduction <maximumf>, %574, %cst_227 [1] : vector<8x8xf32> to vector<8xf32>
    %576 = vector.shape_cast %575 : vector<8xf32> to vector<8x1xf32>
    %577 = vector.broadcast %576 : vector<8x1xf32> to vector<8x8xf32>
    %578 = arith.subf %574, %577 : vector<8x8xf32>
    %579 = math.exp %578 : vector<8x8xf32>
    %cst_228 = arith.constant dense<0.000000e+00> : vector<8xf32>
    %580 = vector.multi_reduction <add>, %579, %cst_228 [1] : vector<8x8xf32> to vector<8xf32>
    %581 = vector.shape_cast %580 : vector<8xf32> to vector<8x1xf32>
    %582 = tpu.reciprocal %581 {approx = true} : vector<8x1xf32> -> vector<8x1xf32>
    %583 = vector.broadcast %582 : vector<8x1xf32> to vector<8x8xf32>
    %584 = arith.mulf %579, %583 : vector<8x8xf32>
    %585 = vector.extract_strided_slice %540 {offsets = [0, 8], sizes = [8, 8], strides = [1, 1]} : vector<8x32xf32> to vector<8x8xf32>
    %586 = arith.truncf %584 : vector<8x8xf32> to vector<8x8xbf16>
    %587 = arith.truncf %585 : vector<8x8xf32> to vector<8x8xbf16>
    %cst_229 = arith.constant dense<0.000000e+00> : vector<8x8xf32>
    %588 = tpu.matmul %586, %587, %cst_229 {dimension_numbers = #tpu.dot_dimension_numbers<[1], [0], [0], [1], [0, 0, 1, 1], [], []>} : vector<8x8xbf16>, vector<8x8xbf16>, vector<8x8xf32> -> vector<8x8xf32>
    %589 = vector.extract_strided_slice %542 {offsets = [8, 0], sizes = [8, 32], strides = [1, 1]} : vector<32x32xf32> to vector<8x32xf32>
    %590 = arith.truncf %588 : vector<8x8xf32> to vector<8x8xbf16>
    %591 = arith.truncf %589 : vector<8x32xf32> to vector<8x32xbf16>
    %cst_230 = arith.constant dense<0.000000e+00> : vector<8x32xf32>
    %592 = tpu.matmul %590, %591, %cst_230 {dimension_numbers = #tpu.dot_dimension_numbers<[1], [0], [0], [1], [0, 0, 1, 1], [], []>} : vector<8x8xbf16>, vector<8x32xbf16>, vector<8x32xf32> -> vector<8x32xf32>
    %593 = arith.addf %568, %592 : vector<8x32xf32>
    %594 = vector.extract_strided_slice %538 {offsets = [0, 16], sizes = [8, 8], strides = [1, 1]} : vector<8x32xf32> to vector<8x8xf32>
    %595 = vector.extract_strided_slice %539 {offsets = [0, 16], sizes = [8, 8], strides = [1, 1]} : vector<8x32xf32> to vector<8x8xf32>
    %596 = arith.truncf %594 : vector<8x8xf32> to vector<8x8xbf16>
    %597 = arith.truncf %595 : vector<8x8xf32> to vector<8x8xbf16>
    %cst_231 = arith.constant dense<0.000000e+00> : vector<8x8xf32>
    %598 = tpu.matmul %596, %597, %cst_231 {dimension_numbers = #tpu.dot_dimension_numbers<[1], [1], [0], [0], [0, 0, 1, 0], [], []>} : vector<8x8xbf16>, vector<8x8xbf16>, vector<8x8xf32> -> vector<8x8xf32>
    %599 = arith.addf %598, %46 : vector<8x8xf32>
    %cst_232 = arith.constant dense<0xFF800000> : vector<8xf32>
    %600 = vector.multi_reduction <maximumf>, %599, %cst_232 [1] : vector<8x8xf32> to vector<8xf32>
    %601 = vector.shape_cast %600 : vector<8xf32> to vector<8x1xf32>
    %602 = vector.broadcast %601 : vector<8x1xf32> to vector<8x8xf32>
    %603 = arith.subf %599, %602 : vector<8x8xf32>
    %604 = math.exp %603 : vector<8x8xf32>
    %cst_233 = arith.constant dense<0.000000e+00> : vector<8xf32>
    %605 = vector.multi_reduction <add>, %604, %cst_233 [1] : vector<8x8xf32> to vector<8xf32>
    %606 = vector.shape_cast %605 : vector<8xf32> to vector<8x1xf32>
    %607 = tpu.reciprocal %606 {approx = true} : vector<8x1xf32> -> vector<8x1xf32>
    %608 = vector.broadcast %607 : vector<8x1xf32> to vector<8x8xf32>
    %609 = arith.mulf %604, %608 : vector<8x8xf32>
    %610 = vector.extract_strided_slice %540 {offsets = [0, 16], sizes = [8, 8], strides = [1, 1]} : vector<8x32xf32> to vector<8x8xf32>
    %611 = arith.truncf %609 : vector<8x8xf32> to vector<8x8xbf16>
    %612 = arith.truncf %610 : vector<8x8xf32> to vector<8x8xbf16>
    %cst_234 = arith.constant dense<0.000000e+00> : vector<8x8xf32>
    %613 = tpu.matmul %611, %612, %cst_234 {dimension_numbers = #tpu.dot_dimension_numbers<[1], [0], [0], [1], [0, 0, 1, 1], [], []>} : vector<8x8xbf16>, vector<8x8xbf16>, vector<8x8xf32> -> vector<8x8xf32>
    %614 = vector.extract_strided_slice %542 {offsets = [16, 0], sizes = [8, 32], strides = [1, 1]} : vector<32x32xf32> to vector<8x32xf32>
    %615 = arith.truncf %613 : vector<8x8xf32> to vector<8x8xbf16>
    %616 = arith.truncf %614 : vector<8x32xf32> to vector<8x32xbf16>
    %cst_235 = arith.constant dense<0.000000e+00> : vector<8x32xf32>
    %617 = tpu.matmul %615, %616, %cst_235 {dimension_numbers = #tpu.dot_dimension_numbers<[1], [0], [0], [1], [0, 0, 1, 1], [], []>} : vector<8x8xbf16>, vector<8x32xbf16>, vector<8x32xf32> -> vector<8x32xf32>
    %618 = arith.addf %593, %617 : vector<8x32xf32>
    %619 = vector.extract_strided_slice %538 {offsets = [0, 24], sizes = [8, 8], strides = [1, 1]} : vector<8x32xf32> to vector<8x8xf32>
    %620 = vector.extract_strided_slice %539 {offsets = [0, 24], sizes = [8, 8], strides = [1, 1]} : vector<8x32xf32> to vector<8x8xf32>
    %621 = arith.truncf %619 : vector<8x8xf32> to vector<8x8xbf16>
    %622 = arith.truncf %620 : vector<8x8xf32> to vector<8x8xbf16>
    %cst_236 = arith.constant dense<0.000000e+00> : vector<8x8xf32>
    %623 = tpu.matmul %621, %622, %cst_236 {dimension_numbers = #tpu.dot_dimension_numbers<[1], [1], [0], [0], [0, 0, 1, 0], [], []>} : vector<8x8xbf16>, vector<8x8xbf16>, vector<8x8xf32> -> vector<8x8xf32>
    %624 = arith.addf %623, %46 : vector<8x8xf32>
    %cst_237 = arith.constant dense<0xFF800000> : vector<8xf32>
    %625 = vector.multi_reduction <maximumf>, %624, %cst_237 [1] : vector<8x8xf32> to vector<8xf32>
    %626 = vector.shape_cast %625 : vector<8xf32> to vector<8x1xf32>
    %627 = vector.broadcast %626 : vector<8x1xf32> to vector<8x8xf32>
    %628 = arith.subf %624, %627 : vector<8x8xf32>
    %629 = math.exp %628 : vector<8x8xf32>
    %cst_238 = arith.constant dense<0.000000e+00> : vector<8xf32>
    %630 = vector.multi_reduction <add>, %629, %cst_238 [1] : vector<8x8xf32> to vector<8xf32>
    %631 = vector.shape_cast %630 : vector<8xf32> to vector<8x1xf32>
    %632 = tpu.reciprocal %631 {approx = true} : vector<8x1xf32> -> vector<8x1xf32>
    %633 = vector.broadcast %632 : vector<8x1xf32> to vector<8x8xf32>
    %634 = arith.mulf %629, %633 : vector<8x8xf32>
    %635 = vector.extract_strided_slice %540 {offsets = [0, 24], sizes = [8, 8], strides = [1, 1]} : vector<8x32xf32> to vector<8x8xf32>
    %636 = arith.truncf %634 : vector<8x8xf32> to vector<8x8xbf16>
    %637 = arith.truncf %635 : vector<8x8xf32> to vector<8x8xbf16>
    %cst_239 = arith.constant dense<0.000000e+00> : vector<8x8xf32>
    %638 = tpu.matmul %636, %637, %cst_239 {dimension_numbers = #tpu.dot_dimension_numbers<[1], [0], [0], [1], [0, 0, 1, 1], [], []>} : vector<8x8xbf16>, vector<8x8xbf16>, vector<8x8xf32> -> vector<8x8xf32>
    %639 = vector.extract_strided_slice %542 {offsets = [24, 0], sizes = [8, 32], strides = [1, 1]} : vector<32x32xf32> to vector<8x32xf32>
    %640 = arith.truncf %638 : vector<8x8xf32> to vector<8x8xbf16>
    %641 = arith.truncf %639 : vector<8x32xf32> to vector<8x32xbf16>
    %cst_240 = arith.constant dense<0.000000e+00> : vector<8x32xf32>
    %642 = tpu.matmul %640, %641, %cst_240 {dimension_numbers = #tpu.dot_dimension_numbers<[1], [0], [0], [1], [0, 0, 1, 1], [], []>} : vector<8x8xbf16>, vector<8x32xbf16>, vector<8x32xf32> -> vector<8x32xf32>
    %643 = arith.addf %618, %642 : vector<8x32xf32>
    %644 = vector.broadcast %544 : vector<1x32xf32> to vector<8x32xf32>
    %645 = arith.addf %643, %644 : vector<8x32xf32>
    %646 = arith.addf %496, %645 : vector<8x32xf32>
    %647 = vector.extract_strided_slice %498 {offsets = [1, 0], sizes = [1, 32], strides = [1, 1]} : vector<3x32xf32> to vector<1x32xf32>
    %648 = vector.shape_cast %647 : vector<1x32xf32> to vector<32xf32>
    %649 = vector.extract_strided_slice %500 {offsets = [1, 0], sizes = [1, 32], strides = [1, 1]} : vector<3x32xf32> to vector<1x32xf32>
    %650 = vector.shape_cast %649 : vector<1x32xf32> to vector<32xf32>
    %cst_241 = arith.constant dense<0.000000e+00> : vector<8xf32>
    %651 = vector.multi_reduction <add>, %646, %cst_241 [1] : vector<8x32xf32> to vector<8xf32>
    %652 = vector.shape_cast %651 : vector<8xf32> to vector<8x1xf32>
    %cst_242 = arith.constant 3.200000e+01 : f32
    %653 = vector.broadcast %cst_242 : f32 to vector<8x1xf32>
    %654 = arith.divf %652, %653 : vector<8x1xf32>
    %655 = vector.broadcast %654 : vector<8x1xf32> to vector<8x32xf32>
    %656 = arith.subf %646, %655 : vector<8x32xf32>
    %657 = arith.mulf %656, %656 : vector<8x32xf32>
    %cst_243 = arith.constant dense<0.000000e+00> : vector<8xf32>
    %658 = vector.multi_reduction <add>, %657, %cst_243 [1] : vector<8x32xf32> to vector<8xf32>
    %659 = vector.shape_cast %658 : vector<8xf32> to vector<8x1xf32>
    %cst_244 = arith.constant 3.200000e+01 : f32
    %660 = vector.broadcast %cst_244 : f32 to vector<8x1xf32>
    %661 = arith.divf %659, %660 : vector<8x1xf32>
    %cst_245 = arith.constant 9.99999974E-6 : f32
    %662 = vector.broadcast %cst_245 : f32 to vector<8x1xf32>
    %663 = arith.addf %661, %662 : vector<8x1xf32>
    %664 = math.rsqrt %663 : vector<8x1xf32>
    %665 = vector.broadcast %664 : vector<8x1xf32> to vector<8x32xf32>
    %666 = arith.mulf %656, %665 : vector<8x32xf32>
    %667 = vector.shape_cast %648 : vector<32xf32> to vector<1x32xf32>
    %668 = vector.broadcast %667 : vector<1x32xf32> to vector<8x32xf32>
    %669 = arith.mulf %666, %668 : vector<8x32xf32>
    %670 = vector.shape_cast %650 : vector<32xf32> to vector<1x32xf32>
    %671 = vector.broadcast %670 : vector<1x32xf32> to vector<8x32xf32>
    %672 = arith.addf %669, %671 : vector<8x32xf32>
    %c1_246 = arith.constant 1 : index
    %c0_247 = arith.constant 0 : index
    %c0_248 = arith.constant 0 : index
    %673 = vector.load %arg27[%c1_246, %c0_247, %c0_248] : memref<2x32x32xf32, #tpu.memory_space<vmem>>, vector<1x32x32xf32>
    %674 = vector.shape_cast %673 : vector<1x32x32xf32> to vector<32x32xf32>
    %675 = arith.truncf %672 : vector<8x32xf32> to vector<8x32xbf16>
    %676 = arith.truncf %674 : vector<32x32xf32> to vector<32x32xbf16>
    %cst_249 = arith.constant dense<0.000000e+00> : vector<8x32xf32>
    %677 = tpu.matmul %675, %676, %cst_249 {dimension_numbers = #tpu.dot_dimension_numbers<[1], [0], [0], [1], [0, 0, 1, 1], [], []>} : vector<8x32xbf16>, vector<32x32xbf16>, vector<8x32xf32> -> vector<8x32xf32>
    %c1_250 = arith.constant 1 : index
    %c0_251 = arith.constant 0 : index
    %c0_252 = arith.constant 0 : index
    %678 = vector.load %arg28[%c1_250, %c0_251, %c0_252] : memref<2x1x32xf32, #tpu.memory_space<vmem>>, vector<1x1x32xf32>
    %679 = vector.shape_cast %678 : vector<1x1x32xf32> to vector<1x32xf32>
    %680 = vector.broadcast %679 : vector<1x32xf32> to vector<8x32xf32>
    %681 = arith.addf %677, %680 : vector<8x32xf32>
    %cst_253 = arith.constant 0.353553385 : f32
    %682 = vector.broadcast %cst_253 : f32 to vector<8x32xf32>
    %683 = arith.mulf %681, %682 : vector<8x32xf32>
    %c1_254 = arith.constant 1 : index
    %c0_255 = arith.constant 0 : index
    %c0_256 = arith.constant 0 : index
    %684 = vector.load %arg29[%c1_254, %c0_255, %c0_256] : memref<2x32x64xf32, #tpu.memory_space<vmem>>, vector<1x32x64xf32>
    %685 = vector.shape_cast %684 : vector<1x32x64xf32> to vector<32x64xf32>
    %686 = arith.truncf %94 : vector<18x32xf32> to vector<18x32xbf16>
    %687 = arith.truncf %685 : vector<32x64xf32> to vector<32x64xbf16>
    %cst_257 = arith.constant dense<0.000000e+00> : vector<18x64xf32>
    %688 = tpu.matmul %686, %687, %cst_257 {dimension_numbers = #tpu.dot_dimension_numbers<[1], [0], [0], [1], [0, 0, 1, 1], [], []>} : vector<18x32xbf16>, vector<32x64xbf16>, vector<18x64xf32> -> vector<18x64xf32>
    %c1_258 = arith.constant 1 : index
    %c0_259 = arith.constant 0 : index
    %c0_260 = arith.constant 0 : index
    %689 = vector.load %arg30[%c1_258, %c0_259, %c0_260] : memref<2x1x64xf32, #tpu.memory_space<vmem>>, vector<1x1x64xf32>
    %690 = vector.shape_cast %689 : vector<1x1x64xf32> to vector<1x64xf32>
    %691 = vector.broadcast %690 : vector<1x64xf32> to vector<18x64xf32>
    %692 = arith.addf %688, %691 : vector<18x64xf32>
    %693 = vector.extract_strided_slice %692 {offsets = [0, 0], sizes = [18, 32], strides = [1, 1]} : vector<18x64xf32> to vector<18x32xf32>
    %694 = vector.extract_strided_slice %692 {offsets = [0, 32], sizes = [18, 32], strides = [1, 1]} : vector<18x64xf32> to vector<18x32xf32>
    %c1_261 = arith.constant 1 : index
    %c0_262 = arith.constant 0 : index
    %c0_263 = arith.constant 0 : index
    %695 = vector.load %arg31[%c1_261, %c0_262, %c0_263] : memref<2x32x32xf32, #tpu.memory_space<vmem>>, vector<1x32x32xf32>
    %696 = vector.shape_cast %695 : vector<1x32x32xf32> to vector<32x32xf32>
    %c1_264 = arith.constant 1 : index
    %c0_265 = arith.constant 0 : index
    %c0_266 = arith.constant 0 : index
    %697 = vector.load %arg32[%c1_264, %c0_265, %c0_266] : memref<2x1x32xf32, #tpu.memory_space<vmem>>, vector<1x1x32xf32>
    %698 = vector.shape_cast %697 : vector<1x1x32xf32> to vector<1x32xf32>
    %699 = vector.extract_strided_slice %683 {offsets = [0, 0], sizes = [8, 8], strides = [1, 1]} : vector<8x32xf32> to vector<8x8xf32>
    %700 = vector.extract_strided_slice %693 {offsets = [0, 0], sizes = [18, 8], strides = [1, 1]} : vector<18x32xf32> to vector<18x8xf32>
    %701 = arith.truncf %699 : vector<8x8xf32> to vector<8x8xbf16>
    %702 = arith.truncf %700 : vector<18x8xf32> to vector<18x8xbf16>
    %cst_267 = arith.constant dense<0.000000e+00> : vector<8x18xf32>
    %703 = tpu.matmul %701, %702, %cst_267 {dimension_numbers = #tpu.dot_dimension_numbers<[1], [1], [0], [0], [0, 0, 1, 0], [], []>} : vector<8x8xbf16>, vector<18x8xbf16>, vector<8x18xf32> -> vector<8x18xf32>
    %704 = arith.addf %703, %54 : vector<8x18xf32>
    %cst_268 = arith.constant dense<0xFF800000> : vector<8xf32>
    %705 = vector.multi_reduction <maximumf>, %704, %cst_268 [1] : vector<8x18xf32> to vector<8xf32>
    %706 = vector.shape_cast %705 : vector<8xf32> to vector<8x1xf32>
    %707 = vector.broadcast %706 : vector<8x1xf32> to vector<8x18xf32>
    %708 = arith.subf %704, %707 : vector<8x18xf32>
    %709 = math.exp %708 : vector<8x18xf32>
    %cst_269 = arith.constant dense<0.000000e+00> : vector<8xf32>
    %710 = vector.multi_reduction <add>, %709, %cst_269 [1] : vector<8x18xf32> to vector<8xf32>
    %711 = vector.shape_cast %710 : vector<8xf32> to vector<8x1xf32>
    %712 = tpu.reciprocal %711 {approx = true} : vector<8x1xf32> -> vector<8x1xf32>
    %713 = vector.broadcast %712 : vector<8x1xf32> to vector<8x18xf32>
    %714 = arith.mulf %709, %713 : vector<8x18xf32>
    %715 = vector.extract_strided_slice %694 {offsets = [0, 0], sizes = [18, 8], strides = [1, 1]} : vector<18x32xf32> to vector<18x8xf32>
    %716 = arith.truncf %714 : vector<8x18xf32> to vector<8x18xbf16>
    %717 = arith.truncf %715 : vector<18x8xf32> to vector<18x8xbf16>
    %cst_270 = arith.constant dense<0.000000e+00> : vector<8x8xf32>
    %718 = tpu.matmul %716, %717, %cst_270 {dimension_numbers = #tpu.dot_dimension_numbers<[1], [0], [0], [1], [0, 0, 1, 1], [], []>} : vector<8x18xbf16>, vector<18x8xbf16>, vector<8x8xf32> -> vector<8x8xf32>
    %719 = vector.extract_strided_slice %696 {offsets = [0, 0], sizes = [8, 32], strides = [1, 1]} : vector<32x32xf32> to vector<8x32xf32>
    %720 = arith.truncf %718 : vector<8x8xf32> to vector<8x8xbf16>
    %721 = arith.truncf %719 : vector<8x32xf32> to vector<8x32xbf16>
    %cst_271 = arith.constant dense<0.000000e+00> : vector<8x32xf32>
    %722 = tpu.matmul %720, %721, %cst_271 {dimension_numbers = #tpu.dot_dimension_numbers<[1], [0], [0], [1], [0, 0, 1, 1], [], []>} : vector<8x8xbf16>, vector<8x32xbf16>, vector<8x32xf32> -> vector<8x32xf32>
    %723 = vector.extract_strided_slice %683 {offsets = [0, 8], sizes = [8, 8], strides = [1, 1]} : vector<8x32xf32> to vector<8x8xf32>
    %724 = vector.extract_strided_slice %693 {offsets = [0, 8], sizes = [18, 8], strides = [1, 1]} : vector<18x32xf32> to vector<18x8xf32>
    %725 = arith.truncf %723 : vector<8x8xf32> to vector<8x8xbf16>
    %726 = arith.truncf %724 : vector<18x8xf32> to vector<18x8xbf16>
    %cst_272 = arith.constant dense<0.000000e+00> : vector<8x18xf32>
    %727 = tpu.matmul %725, %726, %cst_272 {dimension_numbers = #tpu.dot_dimension_numbers<[1], [1], [0], [0], [0, 0, 1, 0], [], []>} : vector<8x8xbf16>, vector<18x8xbf16>, vector<8x18xf32> -> vector<8x18xf32>
    %728 = arith.addf %727, %54 : vector<8x18xf32>
    %cst_273 = arith.constant dense<0xFF800000> : vector<8xf32>
    %729 = vector.multi_reduction <maximumf>, %728, %cst_273 [1] : vector<8x18xf32> to vector<8xf32>
    %730 = vector.shape_cast %729 : vector<8xf32> to vector<8x1xf32>
    %731 = vector.broadcast %730 : vector<8x1xf32> to vector<8x18xf32>
    %732 = arith.subf %728, %731 : vector<8x18xf32>
    %733 = math.exp %732 : vector<8x18xf32>
    %cst_274 = arith.constant dense<0.000000e+00> : vector<8xf32>
    %734 = vector.multi_reduction <add>, %733, %cst_274 [1] : vector<8x18xf32> to vector<8xf32>
    %735 = vector.shape_cast %734 : vector<8xf32> to vector<8x1xf32>
    %736 = tpu.reciprocal %735 {approx = true} : vector<8x1xf32> -> vector<8x1xf32>
    %737 = vector.broadcast %736 : vector<8x1xf32> to vector<8x18xf32>
    %738 = arith.mulf %733, %737 : vector<8x18xf32>
    %739 = vector.extract_strided_slice %694 {offsets = [0, 8], sizes = [18, 8], strides = [1, 1]} : vector<18x32xf32> to vector<18x8xf32>
    %740 = arith.truncf %738 : vector<8x18xf32> to vector<8x18xbf16>
    %741 = arith.truncf %739 : vector<18x8xf32> to vector<18x8xbf16>
    %cst_275 = arith.constant dense<0.000000e+00> : vector<8x8xf32>
    %742 = tpu.matmul %740, %741, %cst_275 {dimension_numbers = #tpu.dot_dimension_numbers<[1], [0], [0], [1], [0, 0, 1, 1], [], []>} : vector<8x18xbf16>, vector<18x8xbf16>, vector<8x8xf32> -> vector<8x8xf32>
    %743 = vector.extract_strided_slice %696 {offsets = [8, 0], sizes = [8, 32], strides = [1, 1]} : vector<32x32xf32> to vector<8x32xf32>
    %744 = arith.truncf %742 : vector<8x8xf32> to vector<8x8xbf16>
    %745 = arith.truncf %743 : vector<8x32xf32> to vector<8x32xbf16>
    %cst_276 = arith.constant dense<0.000000e+00> : vector<8x32xf32>
    %746 = tpu.matmul %744, %745, %cst_276 {dimension_numbers = #tpu.dot_dimension_numbers<[1], [0], [0], [1], [0, 0, 1, 1], [], []>} : vector<8x8xbf16>, vector<8x32xbf16>, vector<8x32xf32> -> vector<8x32xf32>
    %747 = arith.addf %722, %746 : vector<8x32xf32>
    %748 = vector.extract_strided_slice %683 {offsets = [0, 16], sizes = [8, 8], strides = [1, 1]} : vector<8x32xf32> to vector<8x8xf32>
    %749 = vector.extract_strided_slice %693 {offsets = [0, 16], sizes = [18, 8], strides = [1, 1]} : vector<18x32xf32> to vector<18x8xf32>
    %750 = arith.truncf %748 : vector<8x8xf32> to vector<8x8xbf16>
    %751 = arith.truncf %749 : vector<18x8xf32> to vector<18x8xbf16>
    %cst_277 = arith.constant dense<0.000000e+00> : vector<8x18xf32>
    %752 = tpu.matmul %750, %751, %cst_277 {dimension_numbers = #tpu.dot_dimension_numbers<[1], [1], [0], [0], [0, 0, 1, 0], [], []>} : vector<8x8xbf16>, vector<18x8xbf16>, vector<8x18xf32> -> vector<8x18xf32>
    %753 = arith.addf %752, %54 : vector<8x18xf32>
    %cst_278 = arith.constant dense<0xFF800000> : vector<8xf32>
    %754 = vector.multi_reduction <maximumf>, %753, %cst_278 [1] : vector<8x18xf32> to vector<8xf32>
    %755 = vector.shape_cast %754 : vector<8xf32> to vector<8x1xf32>
    %756 = vector.broadcast %755 : vector<8x1xf32> to vector<8x18xf32>
    %757 = arith.subf %753, %756 : vector<8x18xf32>
    %758 = math.exp %757 : vector<8x18xf32>
    %cst_279 = arith.constant dense<0.000000e+00> : vector<8xf32>
    %759 = vector.multi_reduction <add>, %758, %cst_279 [1] : vector<8x18xf32> to vector<8xf32>
    %760 = vector.shape_cast %759 : vector<8xf32> to vector<8x1xf32>
    %761 = tpu.reciprocal %760 {approx = true} : vector<8x1xf32> -> vector<8x1xf32>
    %762 = vector.broadcast %761 : vector<8x1xf32> to vector<8x18xf32>
    %763 = arith.mulf %758, %762 : vector<8x18xf32>
    %764 = vector.extract_strided_slice %694 {offsets = [0, 16], sizes = [18, 8], strides = [1, 1]} : vector<18x32xf32> to vector<18x8xf32>
    %765 = arith.truncf %763 : vector<8x18xf32> to vector<8x18xbf16>
    %766 = arith.truncf %764 : vector<18x8xf32> to vector<18x8xbf16>
    %cst_280 = arith.constant dense<0.000000e+00> : vector<8x8xf32>
    %767 = tpu.matmul %765, %766, %cst_280 {dimension_numbers = #tpu.dot_dimension_numbers<[1], [0], [0], [1], [0, 0, 1, 1], [], []>} : vector<8x18xbf16>, vector<18x8xbf16>, vector<8x8xf32> -> vector<8x8xf32>
    %768 = vector.extract_strided_slice %696 {offsets = [16, 0], sizes = [8, 32], strides = [1, 1]} : vector<32x32xf32> to vector<8x32xf32>
    %769 = arith.truncf %767 : vector<8x8xf32> to vector<8x8xbf16>
    %770 = arith.truncf %768 : vector<8x32xf32> to vector<8x32xbf16>
    %cst_281 = arith.constant dense<0.000000e+00> : vector<8x32xf32>
    %771 = tpu.matmul %769, %770, %cst_281 {dimension_numbers = #tpu.dot_dimension_numbers<[1], [0], [0], [1], [0, 0, 1, 1], [], []>} : vector<8x8xbf16>, vector<8x32xbf16>, vector<8x32xf32> -> vector<8x32xf32>
    %772 = arith.addf %747, %771 : vector<8x32xf32>
    %773 = vector.extract_strided_slice %683 {offsets = [0, 24], sizes = [8, 8], strides = [1, 1]} : vector<8x32xf32> to vector<8x8xf32>
    %774 = vector.extract_strided_slice %693 {offsets = [0, 24], sizes = [18, 8], strides = [1, 1]} : vector<18x32xf32> to vector<18x8xf32>
    %775 = arith.truncf %773 : vector<8x8xf32> to vector<8x8xbf16>
    %776 = arith.truncf %774 : vector<18x8xf32> to vector<18x8xbf16>
    %cst_282 = arith.constant dense<0.000000e+00> : vector<8x18xf32>
    %777 = tpu.matmul %775, %776, %cst_282 {dimension_numbers = #tpu.dot_dimension_numbers<[1], [1], [0], [0], [0, 0, 1, 0], [], []>} : vector<8x8xbf16>, vector<18x8xbf16>, vector<8x18xf32> -> vector<8x18xf32>
    %778 = arith.addf %777, %54 : vector<8x18xf32>
    %cst_283 = arith.constant dense<0xFF800000> : vector<8xf32>
    %779 = vector.multi_reduction <maximumf>, %778, %cst_283 [1] : vector<8x18xf32> to vector<8xf32>
    %780 = vector.shape_cast %779 : vector<8xf32> to vector<8x1xf32>
    %781 = vector.broadcast %780 : vector<8x1xf32> to vector<8x18xf32>
    %782 = arith.subf %778, %781 : vector<8x18xf32>
    %783 = math.exp %782 : vector<8x18xf32>
    %cst_284 = arith.constant dense<0.000000e+00> : vector<8xf32>
    %784 = vector.multi_reduction <add>, %783, %cst_284 [1] : vector<8x18xf32> to vector<8xf32>
    %785 = vector.shape_cast %784 : vector<8xf32> to vector<8x1xf32>
    %786 = tpu.reciprocal %785 {approx = true} : vector<8x1xf32> -> vector<8x1xf32>
    %787 = vector.broadcast %786 : vector<8x1xf32> to vector<8x18xf32>
    %788 = arith.mulf %783, %787 : vector<8x18xf32>
    %789 = vector.extract_strided_slice %694 {offsets = [0, 24], sizes = [18, 8], strides = [1, 1]} : vector<18x32xf32> to vector<18x8xf32>
    %790 = arith.truncf %788 : vector<8x18xf32> to vector<8x18xbf16>
    %791 = arith.truncf %789 : vector<18x8xf32> to vector<18x8xbf16>
    %cst_285 = arith.constant dense<0.000000e+00> : vector<8x8xf32>
    %792 = tpu.matmul %790, %791, %cst_285 {dimension_numbers = #tpu.dot_dimension_numbers<[1], [0], [0], [1], [0, 0, 1, 1], [], []>} : vector<8x18xbf16>, vector<18x8xbf16>, vector<8x8xf32> -> vector<8x8xf32>
    %793 = vector.extract_strided_slice %696 {offsets = [24, 0], sizes = [8, 32], strides = [1, 1]} : vector<32x32xf32> to vector<8x32xf32>
    %794 = arith.truncf %792 : vector<8x8xf32> to vector<8x8xbf16>
    %795 = arith.truncf %793 : vector<8x32xf32> to vector<8x32xbf16>
    %cst_286 = arith.constant dense<0.000000e+00> : vector<8x32xf32>
    %796 = tpu.matmul %794, %795, %cst_286 {dimension_numbers = #tpu.dot_dimension_numbers<[1], [0], [0], [1], [0, 0, 1, 1], [], []>} : vector<8x8xbf16>, vector<8x32xbf16>, vector<8x32xf32> -> vector<8x32xf32>
    %797 = arith.addf %772, %796 : vector<8x32xf32>
    %798 = vector.broadcast %698 : vector<1x32xf32> to vector<8x32xf32>
    %799 = arith.addf %797, %798 : vector<8x32xf32>
    %800 = arith.addf %646, %799 : vector<8x32xf32>
    %801 = vector.extract_strided_slice %498 {offsets = [2, 0], sizes = [1, 32], strides = [1, 1]} : vector<3x32xf32> to vector<1x32xf32>
    %802 = vector.shape_cast %801 : vector<1x32xf32> to vector<32xf32>
    %803 = vector.extract_strided_slice %500 {offsets = [2, 0], sizes = [1, 32], strides = [1, 1]} : vector<3x32xf32> to vector<1x32xf32>
    %804 = vector.shape_cast %803 : vector<1x32xf32> to vector<32xf32>
    %cst_287 = arith.constant dense<0.000000e+00> : vector<8xf32>
    %805 = vector.multi_reduction <add>, %800, %cst_287 [1] : vector<8x32xf32> to vector<8xf32>
    %806 = vector.shape_cast %805 : vector<8xf32> to vector<8x1xf32>
    %cst_288 = arith.constant 3.200000e+01 : f32
    %807 = vector.broadcast %cst_288 : f32 to vector<8x1xf32>
    %808 = arith.divf %806, %807 : vector<8x1xf32>
    %809 = vector.broadcast %808 : vector<8x1xf32> to vector<8x32xf32>
    %810 = arith.subf %800, %809 : vector<8x32xf32>
    %811 = arith.mulf %810, %810 : vector<8x32xf32>
    %cst_289 = arith.constant dense<0.000000e+00> : vector<8xf32>
    %812 = vector.multi_reduction <add>, %811, %cst_289 [1] : vector<8x32xf32> to vector<8xf32>
    %813 = vector.shape_cast %812 : vector<8xf32> to vector<8x1xf32>
    %cst_290 = arith.constant 3.200000e+01 : f32
    %814 = vector.broadcast %cst_290 : f32 to vector<8x1xf32>
    %815 = arith.divf %813, %814 : vector<8x1xf32>
    %cst_291 = arith.constant 9.99999974E-6 : f32
    %816 = vector.broadcast %cst_291 : f32 to vector<8x1xf32>
    %817 = arith.addf %815, %816 : vector<8x1xf32>
    %818 = math.rsqrt %817 : vector<8x1xf32>
    %819 = vector.broadcast %818 : vector<8x1xf32> to vector<8x32xf32>
    %820 = arith.mulf %810, %819 : vector<8x32xf32>
    %821 = vector.shape_cast %802 : vector<32xf32> to vector<1x32xf32>
    %822 = vector.broadcast %821 : vector<1x32xf32> to vector<8x32xf32>
    %823 = arith.mulf %820, %822 : vector<8x32xf32>
    %824 = vector.shape_cast %804 : vector<32xf32> to vector<1x32xf32>
    %825 = vector.broadcast %824 : vector<1x32xf32> to vector<8x32xf32>
    %826 = arith.addf %823, %825 : vector<8x32xf32>
    %c1_292 = arith.constant 1 : index
    %c0_293 = arith.constant 0 : index
    %c0_294 = arith.constant 0 : index
    %827 = vector.load %arg33[%c1_292, %c0_293, %c0_294] : memref<2x32x128xf32, #tpu.memory_space<vmem>>, vector<1x32x128xf32>
    %828 = vector.shape_cast %827 : vector<1x32x128xf32> to vector<32x128xf32>
    %829 = arith.truncf %826 : vector<8x32xf32> to vector<8x32xbf16>
    %830 = arith.truncf %828 : vector<32x128xf32> to vector<32x128xbf16>
    %cst_295 = arith.constant dense<0.000000e+00> : vector<8x128xf32>
    %831 = tpu.matmul %829, %830, %cst_295 {dimension_numbers = #tpu.dot_dimension_numbers<[1], [0], [0], [1], [0, 0, 1, 1], [], []>} : vector<8x32xbf16>, vector<32x128xbf16>, vector<8x128xf32> -> vector<8x128xf32>
    %c1_296 = arith.constant 1 : index
    %c0_297 = arith.constant 0 : index
    %c0_298 = arith.constant 0 : index
    %832 = vector.load %arg34[%c1_296, %c0_297, %c0_298] : memref<2x1x128xf32, #tpu.memory_space<vmem>>, vector<1x1x128xf32>
    %833 = vector.shape_cast %832 : vector<1x1x128xf32> to vector<1x128xf32>
    %834 = vector.broadcast %833 : vector<1x128xf32> to vector<8x128xf32>
    %835 = arith.addf %831, %834 : vector<8x128xf32>
    %cst_299 = arith.constant 5.000000e-01 : f32
    %836 = vector.broadcast %cst_299 : f32 to vector<8x128xf32>
    %837 = arith.mulf %836, %835 : vector<8x128xf32>
    %cst_300 = arith.constant 0.707106769 : f32
    %838 = vector.broadcast %cst_300 : f32 to vector<8x128xf32>
    %839 = arith.mulf %835, %838 : vector<8x128xf32>
    %cst_301 = arith.constant 0.000000e+00 : f32
    %840 = vector.broadcast %cst_301 : f32 to vector<8x128xf32>
    %841 = arith.cmpf oge, %839, %840 : vector<8x128xf32>
    %cst_302 = arith.constant 1.000000e+00 : f32
    %cst_303 = arith.constant -1.000000e+00 : f32
    %842 = vector.broadcast %cst_302 : f32 to vector<8x128xf32>
    %843 = vector.broadcast %cst_303 : f32 to vector<8x128xf32>
    %844 = arith.select %841, %842, %843 : vector<8x128xi1>, vector<8x128xf32>
    %845 = math.absf %839 : vector<8x128xf32>
    %cst_304 = arith.constant 0.327591091 : f32
    %846 = vector.broadcast %cst_304 : f32 to vector<8x128xf32>
    %847 = arith.mulf %846, %845 : vector<8x128xf32>
    %cst_305 = arith.constant 1.000000e+00 : f32
    %848 = vector.broadcast %cst_305 : f32 to vector<8x128xf32>
    %849 = arith.addf %848, %847 : vector<8x128xf32>
    %cst_306 = arith.constant 1.000000e+00 : f32
    %850 = vector.broadcast %cst_306 : f32 to vector<8x128xf32>
    %851 = arith.divf %850, %849 : vector<8x128xf32>
    %cst_307 = arith.constant 1.06140542 : f32
    %852 = vector.broadcast %cst_307 : f32 to vector<8x128xf32>
    %853 = arith.mulf %852, %851 : vector<8x128xf32>
    %cst_308 = arith.constant -1.45315206 : f32
    %854 = vector.broadcast %cst_308 : f32 to vector<8x128xf32>
    %855 = arith.addf %853, %854 : vector<8x128xf32>
    %856 = arith.mulf %855, %851 : vector<8x128xf32>
    %cst_309 = arith.constant 1.42141378 : f32
    %857 = vector.broadcast %cst_309 : f32 to vector<8x128xf32>
    %858 = arith.addf %856, %857 : vector<8x128xf32>
    %859 = arith.mulf %858, %851 : vector<8x128xf32>
    %cst_310 = arith.constant -0.284496725 : f32
    %860 = vector.broadcast %cst_310 : f32 to vector<8x128xf32>
    %861 = arith.addf %859, %860 : vector<8x128xf32>
    %862 = arith.mulf %861, %851 : vector<8x128xf32>
    %cst_311 = arith.constant 0.254829586 : f32
    %863 = vector.broadcast %cst_311 : f32 to vector<8x128xf32>
    %864 = arith.addf %862, %863 : vector<8x128xf32>
    %865 = arith.mulf %864, %851 : vector<8x128xf32>
    %cst_312 = arith.constant 0.000000e+00 : f32
    %866 = vector.broadcast %cst_312 : f32 to vector<8x128xf32>
    %867 = arith.subf %866, %845 : vector<8x128xf32>
    %868 = arith.mulf %867, %845 : vector<8x128xf32>
    %869 = math.exp %868 : vector<8x128xf32>
    %870 = arith.mulf %865, %869 : vector<8x128xf32>
    %cst_313 = arith.constant 1.000000e+00 : f32
    %871 = vector.broadcast %cst_313 : f32 to vector<8x128xf32>
    %872 = arith.subf %871, %870 : vector<8x128xf32>
    %873 = arith.mulf %844, %872 : vector<8x128xf32>
    %cst_314 = arith.constant 1.000000e+00 : f32
    %874 = vector.broadcast %cst_314 : f32 to vector<8x128xf32>
    %875 = arith.addf %874, %873 : vector<8x128xf32>
    %876 = arith.mulf %837, %875 : vector<8x128xf32>
    %c1_315 = arith.constant 1 : index
    %c0_316 = arith.constant 0 : index
    %c0_317 = arith.constant 0 : index
    %877 = vector.load %arg35[%c1_315, %c0_316, %c0_317] : memref<2x128x32xf32, #tpu.memory_space<vmem>>, vector<1x128x32xf32>
    %878 = vector.shape_cast %877 : vector<1x128x32xf32> to vector<128x32xf32>
    %879 = arith.truncf %876 : vector<8x128xf32> to vector<8x128xbf16>
    %880 = arith.truncf %878 : vector<128x32xf32> to vector<128x32xbf16>
    %cst_318 = arith.constant dense<0.000000e+00> : vector<8x32xf32>
    %881 = tpu.matmul %879, %880, %cst_318 {dimension_numbers = #tpu.dot_dimension_numbers<[1], [0], [0], [1], [0, 0, 1, 1], [], []>} : vector<8x128xbf16>, vector<128x32xbf16>, vector<8x32xf32> -> vector<8x32xf32>
    %882 = arith.addf %800, %881 : vector<8x32xf32>
    %c1_319 = arith.constant 1 : index
    %c0_320 = arith.constant 0 : index
    %c0_321 = arith.constant 0 : index
    %883 = vector.load %arg36[%c1_319, %c0_320, %c0_321] : memref<2x1x32xf32, #tpu.memory_space<vmem>>, vector<1x1x32xf32>
    %884 = vector.shape_cast %883 : vector<1x1x32xf32> to vector<1x32xf32>
    %885 = vector.broadcast %884 : vector<1x32xf32> to vector<8x32xf32>
    %886 = arith.addf %882, %885 : vector<8x32xf32>
    %c0_322 = arith.constant 0 : index
    %c0_323 = arith.constant 0 : index
    %887 = vector.load %arg37[%c0_322, %c0_323] : memref<1x32xf32, #tpu.memory_space<vmem>>, vector<1x32xf32>
    %c0_324 = arith.constant 0 : index
    %c0_325 = arith.constant 0 : index
    %888 = vector.load %arg38[%c0_324, %c0_325] : memref<1x32xf32, #tpu.memory_space<vmem>>, vector<1x32xf32>
    %cst_326 = arith.constant dense<0.000000e+00> : vector<8xf32>
    %889 = vector.multi_reduction <add>, %886, %cst_326 [1] : vector<8x32xf32> to vector<8xf32>
    %890 = vector.shape_cast %889 : vector<8xf32> to vector<8x1xf32>
    %cst_327 = arith.constant 3.200000e+01 : f32
    %891 = vector.broadcast %cst_327 : f32 to vector<8x1xf32>
    %892 = arith.divf %890, %891 : vector<8x1xf32>
    %893 = vector.broadcast %892 : vector<8x1xf32> to vector<8x32xf32>
    %894 = arith.subf %886, %893 : vector<8x32xf32>
    %895 = arith.mulf %894, %894 : vector<8x32xf32>
    %cst_328 = arith.constant dense<0.000000e+00> : vector<8xf32>
    %896 = vector.multi_reduction <add>, %895, %cst_328 [1] : vector<8x32xf32> to vector<8xf32>
    %897 = vector.shape_cast %896 : vector<8xf32> to vector<8x1xf32>
    %cst_329 = arith.constant 3.200000e+01 : f32
    %898 = vector.broadcast %cst_329 : f32 to vector<8x1xf32>
    %899 = arith.divf %897, %898 : vector<8x1xf32>
    %cst_330 = arith.constant 9.99999974E-6 : f32
    %900 = vector.broadcast %cst_330 : f32 to vector<8x1xf32>
    %901 = arith.addf %899, %900 : vector<8x1xf32>
    %902 = math.rsqrt %901 : vector<8x1xf32>
    %903 = vector.broadcast %902 : vector<8x1xf32> to vector<8x32xf32>
    %904 = arith.mulf %894, %903 : vector<8x32xf32>
    %905 = vector.broadcast %887 : vector<1x32xf32> to vector<8x32xf32>
    %906 = arith.mulf %904, %905 : vector<8x32xf32>
    %907 = vector.broadcast %888 : vector<1x32xf32> to vector<8x32xf32>
    %908 = arith.addf %906, %907 : vector<8x32xf32>
    %c0_331 = arith.constant 0 : index
    %c0_332 = arith.constant 0 : index
    %909 = vector.load %arg39[%c0_331, %c0_332] : memref<32x128xf32, #tpu.memory_space<vmem>>, vector<32x128xf32>
    %910 = arith.truncf %908 : vector<8x32xf32> to vector<8x32xbf16>
    %911 = arith.truncf %909 : vector<32x128xf32> to vector<32x128xbf16>
    %cst_333 = arith.constant dense<0.000000e+00> : vector<8x128xf32>
    %912 = tpu.matmul %910, %911, %cst_333 {dimension_numbers = #tpu.dot_dimension_numbers<[1], [0], [0], [1], [0, 0, 1, 1], [], []>} : vector<8x32xbf16>, vector<32x128xbf16>, vector<8x128xf32> -> vector<8x128xf32>
    %c0_334 = arith.constant 0 : index
    %c0_335 = arith.constant 0 : index
    %913 = vector.load %arg40[%c0_334, %c0_335] : memref<1x128xf32, #tpu.memory_space<vmem>>, vector<1x128xf32>
    %914 = vector.broadcast %913 : vector<1x128xf32> to vector<8x128xf32>
    %915 = arith.addf %912, %914 : vector<8x128xf32>
    %c0_336 = arith.constant 0 : index
    %c0_337 = arith.constant 0 : index
    %c0_338 = arith.constant 0 : index
    %916 = vector.load %arg41[%c0_336, %c0_337, %c0_338] : memref<1x8x128xf32, #tpu.memory_space<vmem>>, vector<1x8x128xf32>
    %917 = vector.shape_cast %916 : vector<1x8x128xf32> to vector<8x128xf32>
    %918 = vector.shape_cast %915 : vector<8x128xf32> to vector<1x8x128xf32>
    tpu.vector_store %arg41[%c0_336, %c0_337, %c0_338], %918 {strides = array<i32>} : memref<1x8x128xf32, #tpu.memory_space<vmem>>, vector<1x8x128xf32>,
    return
  }
  func.func @transform_0(%arg0: i32) -> (i32, i32, i32) {
    %c0_i32 = arith.constant 0 : i32
    %c0_i32_0 = arith.constant 0 : i32
    %c0_i32_1 = arith.constant 0 : i32
    return %arg0, %c0_i32, %c0_i32_0 : i32, i32, i32
  }
  func.func @transform_1(%arg0: i32) -> (i32, i32, i32) {
    %c0_i32 = arith.constant 0 : i32
    %c0_i32_0 = arith.constant 0 : i32
    %c0_i32_1 = arith.constant 0 : i32
    return %arg0, %c0_i32, %c0_i32_0 : i32, i32, i32
  }
  func.func @transform_2(%arg0: i32) -> (i32, i32, i32) {
    %c0_i32 = arith.constant 0 : i32
    %c0_i32_0 = arith.constant 0 : i32
    %c0_i32_1 = arith.constant 0 : i32
    return %arg0, %c0_i32, %c0_i32_0 : i32, i32, i32
  }
  func.func @transform_3(%arg0: i32) -> (i32, i32, i32) {
    %c0_i32 = arith.constant 0 : i32
    %c0_i32_0 = arith.constant 0 : i32
    %c0_i32_1 = arith.constant 0 : i32
    return %arg0, %c0_i32, %c0_i32_0 : i32, i32, i32
  }
  func.func @transform_4(%arg0: i32) -> (i32, i32) {
    %c0_i32 = arith.constant 0 : i32
    %c0_i32_0 = arith.constant 0 : i32
    %c0_i32_1 = arith.constant 0 : i32
    return %c0_i32, %c0_i32_0 : i32, i32
  }
  func.func @transform_5(%arg0: i32) -> (i32, i32) {
    %c0_i32 = arith.constant 0 : i32
    %c0_i32_0 = arith.constant 0 : i32
    %c0_i32_1 = arith.constant 0 : i32
    return %c0_i32, %c0_i32_0 : i32, i32
  }
  func.func @transform_6(%arg0: i32) -> (i32, i32) {
    %c0_i32 = arith.constant 0 : i32
    %c0_i32_0 = arith.constant 0 : i32
    %c0_i32_1 = arith.constant 0 : i32
    return %c0_i32, %c0_i32_0 : i32, i32
  }
  func.func @transform_7(%arg0: i32) -> (i32, i32) {
    %c0_i32 = arith.constant 0 : i32
    %c0_i32_0 = arith.constant 0 : i32
    %c0_i32_1 = arith.constant 0 : i32
    return %c0_i32, %c0_i32_0 : i32, i32
  }
  func.func @transform_8(%arg0: i32) -> (i32, i32) {
    %c0_i32 = arith.constant 0 : i32
    %c0_i32_0 = arith.constant 0 : i32
    %c0_i32_1 = arith.constant 0 : i32
    return %c0_i32, %c0_i32_0 : i32, i32
  }
  func.func @transform_9(%arg0: i32) -> (i32, i32) {
    %c0_i32 = arith.constant 0 : i32
    %c0_i32_0 = arith.constant 0 : i32
    %c0_i32_1 = arith.constant 0 : i32
    return %c0_i32, %c0_i32_0 : i32, i32
  }
  func.func @transform_10(%arg0: i32) -> (i32, i32) {
    %c0_i32 = arith.constant 0 : i32
    %c0_i32_0 = arith.constant 0 : i32
    %c0_i32_1 = arith.constant 0 : i32
    return %c0_i32, %c0_i32_0 : i32, i32
  }
  func.func @transform_11(%arg0: i32) -> (i32, i32) {
    %c0_i32 = arith.constant 0 : i32
    %c0_i32_0 = arith.constant 0 : i32
    %c0_i32_1 = arith.constant 0 : i32
    return %c0_i32, %c0_i32_0 : i32, i32
  }
  func.func @transform_12(%arg0: i32) -> (i32, i32, i32) {
    %c0_i32 = arith.constant 0 : i32
    %c0_i32_0 = arith.constant 0 : i32
    %c0_i32_1 = arith.constant 0 : i32
    %c0_i32_2 = arith.constant 0 : i32
    return %c0_i32, %c0_i32_0, %c0_i32_1 : i32, i32, i32
  }
  func.func @transform_13(%arg0: i32) -> (i32, i32) {
    %c0_i32 = arith.constant 0 : i32
    %c0_i32_0 = arith.constant 0 : i32
    %c0_i32_1 = arith.constant 0 : i32
    return %c0_i32, %c0_i32_0 : i32, i32
  }
  func.func @transform_14(%arg0: i32) -> (i32, i32) {
    %c0_i32 = arith.constant 0 : i32
    %c0_i32_0 = arith.constant 0 : i32
    %c0_i32_1 = arith.constant 0 : i32
    return %c0_i32, %c0_i32_0 : i32, i32
  }
  func.func @transform_15(%arg0: i32) -> (i32, i32, i32) {
    %c0_i32 = arith.constant 0 : i32
    %c0_i32_0 = arith.constant 0 : i32
    %c0_i32_1 = arith.constant 0 : i32
    %c0_i32_2 = arith.constant 0 : i32
    return %c0_i32, %c0_i32_0, %c0_i32_1 : i32, i32, i32
  }
  func.func @transform_16(%arg0: i32) -> (i32, i32) {
    %c0_i32 = arith.constant 0 : i32
    %c0_i32_0 = arith.constant 0 : i32
    %c0_i32_1 = arith.constant 0 : i32
    return %c0_i32, %c0_i32_0 : i32, i32
  }
  func.func @transform_17(%arg0: i32) -> (i32, i32) {
    %c0_i32 = arith.constant 0 : i32
    %c0_i32_0 = arith.constant 0 : i32
    %c0_i32_1 = arith.constant 0 : i32
    return %c0_i32, %c0_i32_0 : i32, i32
  }
  func.func @transform_18(%arg0: i32) -> (i32, i32) {
    %c0_i32 = arith.constant 0 : i32
    %c0_i32_0 = arith.constant 0 : i32
    %c0_i32_1 = arith.constant 0 : i32
    return %c0_i32, %c0_i32_0 : i32, i32
  }
  func.func @transform_19(%arg0: i32) -> (i32, i32) {
    %c0_i32 = arith.constant 0 : i32
    %c0_i32_0 = arith.constant 0 : i32
    %c0_i32_1 = arith.constant 0 : i32
    return %c0_i32, %c0_i32_0 : i32, i32
  }
  func.func @transform_20(%arg0: i32) -> (i32, i32, i32) {
    %c0_i32 = arith.constant 0 : i32
    %c0_i32_0 = arith.constant 0 : i32
    %c0_i32_1 = arith.constant 0 : i32
    %c0_i32_2 = arith.constant 0 : i32
    return %c0_i32, %c0_i32_0, %c0_i32_1 : i32, i32, i32
  }
  func.func @transform_21(%arg0: i32) -> (i32, i32, i32) {
    %c0_i32 = arith.constant 0 : i32
    %c0_i32_0 = arith.constant 0 : i32
    %c0_i32_1 = arith.constant 0 : i32
    %c0_i32_2 = arith.constant 0 : i32
    return %c0_i32, %c0_i32_0, %c0_i32_1 : i32, i32, i32
  }
  func.func @transform_22(%arg0: i32) -> (i32, i32, i32) {
    %c0_i32 = arith.constant 0 : i32
    %c0_i32_0 = arith.constant 0 : i32
    %c0_i32_1 = arith.constant 0 : i32
    %c0_i32_2 = arith.constant 0 : i32
    return %c0_i32, %c0_i32_0, %c0_i32_1 : i32, i32, i32
  }
  func.func @transform_23(%arg0: i32) -> (i32, i32, i32) {
    %c0_i32 = arith.constant 0 : i32
    %c0_i32_0 = arith.constant 0 : i32
    %c0_i32_1 = arith.constant 0 : i32
    %c0_i32_2 = arith.constant 0 : i32
    return %c0_i32, %c0_i32_0, %c0_i32_1 : i32, i32, i32
  }
  func.func @transform_24(%arg0: i32) -> (i32, i32, i32) {
    %c0_i32 = arith.constant 0 : i32
    %c0_i32_0 = arith.constant 0 : i32
    %c0_i32_1 = arith.constant 0 : i32
    %c0_i32_2 = arith.constant 0 : i32
    return %c0_i32, %c0_i32_0, %c0_i32_1 : i32, i32, i32
  }
  func.func @transform_25(%arg0: i32) -> (i32, i32, i32) {
    %c0_i32 = arith.constant 0 : i32
    %c0_i32_0 = arith.constant 0 : i32
    %c0_i32_1 = arith.constant 0 : i32
    %c0_i32_2 = arith.constant 0 : i32
    return %c0_i32, %c0_i32_0, %c0_i32_1 : i32, i32, i32
  }
  func.func @transform_26(%arg0: i32) -> (i32, i32, i32) {
    %c0_i32 = arith.constant 0 : i32
    %c0_i32_0 = arith.constant 0 : i32
    %c0_i32_1 = arith.constant 0 : i32
    %c0_i32_2 = arith.constant 0 : i32
    return %c0_i32, %c0_i32_0, %c0_i32_1 : i32, i32, i32
  }
  func.func @transform_27(%arg0: i32) -> (i32, i32, i32) {
    %c0_i32 = arith.constant 0 : i32
    %c0_i32_0 = arith.constant 0 : i32
    %c0_i32_1 = arith.constant 0 : i32
    %c0_i32_2 = arith.constant 0 : i32
    return %c0_i32, %c0_i32_0, %c0_i32_1 : i32, i32, i32
  }
  func.func @transform_28(%arg0: i32) -> (i32, i32, i32) {
    %c0_i32 = arith.constant 0 : i32
    %c0_i32_0 = arith.constant 0 : i32
    %c0_i32_1 = arith.constant 0 : i32
    %c0_i32_2 = arith.constant 0 : i32
    return %c0_i32, %c0_i32_0, %c0_i32_1 : i32, i32, i32
  }
  func.func @transform_29(%arg0: i32) -> (i32, i32, i32) {
    %c0_i32 = arith.constant 0 : i32
    %c0_i32_0 = arith.constant 0 : i32
    %c0_i32_1 = arith.constant 0 : i32
    %c0_i32_2 = arith.constant 0 : i32
    return %c0_i32, %c0_i32_0, %c0_i32_1 : i32, i32, i32
  }
  func.func @transform_30(%arg0: i32) -> (i32, i32, i32) {
    %c0_i32 = arith.constant 0 : i32
    %c0_i32_0 = arith.constant 0 : i32
    %c0_i32_1 = arith.constant 0 : i32
    %c0_i32_2 = arith.constant 0 : i32
    return %c0_i32, %c0_i32_0, %c0_i32_1 : i32, i32, i32
  }
  func.func @transform_31(%arg0: i32) -> (i32, i32, i32) {
    %c0_i32 = arith.constant 0 : i32
    %c0_i32_0 = arith.constant 0 : i32
    %c0_i32_1 = arith.constant 0 : i32
    %c0_i32_2 = arith.constant 0 : i32
    return %c0_i32, %c0_i32_0, %c0_i32_1 : i32, i32, i32
  }
  func.func @transform_32(%arg0: i32) -> (i32, i32, i32) {
    %c0_i32 = arith.constant 0 : i32
    %c0_i32_0 = arith.constant 0 : i32
    %c0_i32_1 = arith.constant 0 : i32
    %c0_i32_2 = arith.constant 0 : i32
    return %c0_i32, %c0_i32_0, %c0_i32_1 : i32, i32, i32
  }
  func.func @transform_33(%arg0: i32) -> (i32, i32, i32) {
    %c0_i32 = arith.constant 0 : i32
    %c0_i32_0 = arith.constant 0 : i32
    %c0_i32_1 = arith.constant 0 : i32
    %c0_i32_2 = arith.constant 0 : i32
    return %c0_i32, %c0_i32_0, %c0_i32_1 : i32, i32, i32
  }
  func.func @transform_34(%arg0: i32) -> (i32, i32, i32) {
    %c0_i32 = arith.constant 0 : i32
    %c0_i32_0 = arith.constant 0 : i32
    %c0_i32_1 = arith.constant 0 : i32
    %c0_i32_2 = arith.constant 0 : i32
    return %c0_i32, %c0_i32_0, %c0_i32_1 : i32, i32, i32
  }
  func.func @transform_35(%arg0: i32) -> (i32, i32, i32) {
    %c0_i32 = arith.constant 0 : i32
    %c0_i32_0 = arith.constant 0 : i32
    %c0_i32_1 = arith.constant 0 : i32
    %c0_i32_2 = arith.constant 0 : i32
    return %c0_i32, %c0_i32_0, %c0_i32_1 : i32, i32, i32
  }
  func.func @transform_36(%arg0: i32) -> (i32, i32) {
    %c0_i32 = arith.constant 0 : i32
    %c0_i32_0 = arith.constant 0 : i32
    %c0_i32_1 = arith.constant 0 : i32
    return %c0_i32, %c0_i32_0 : i32, i32
  }
  func.func @transform_37(%arg0: i32) -> (i32, i32) {
    %c0_i32 = arith.constant 0 : i32
    %c0_i32_0 = arith.constant 0 : i32
    %c0_i32_1 = arith.constant 0 : i32
    return %c0_i32, %c0_i32_0 : i32, i32
  }
  func.func @transform_38(%arg0: i32) -> (i32, i32) {
    %c0_i32 = arith.constant 0 : i32
    %c0_i32_0 = arith.constant 0 : i32
    %c0_i32_1 = arith.constant 0 : i32
    return %c0_i32, %c0_i32_0 : i32, i32
  }
  func.func @transform_39(%arg0: i32) -> (i32, i32) {
    %c0_i32 = arith.constant 0 : i32
    %c0_i32_0 = arith.constant 0 : i32
    %c0_i32_1 = arith.constant 0 : i32
    return %c0_i32, %c0_i32_0 : i32, i32
  }
  func.func @transform_40(%arg0: i32) -> (i32, i32, i32) {
    %c0_i32 = arith.constant 0 : i32
    %c0_i32_0 = arith.constant 0 : i32
    %c0_i32_1 = arith.constant 0 : i32
    return %arg0, %c0_i32, %c0_i32_0 : i32, i32, i32
  }
  func.func @transform_41(%arg0: i32) -> (i32, i32, i32) {
    %c0_i32 = arith.constant 0 : i32
    %c0_i32_0 = arith.constant 0 : i32
    %c0_i32_1 = arith.constant 0 : i32
    return %arg0, %c0_i32, %c0_i32_0 : i32, i32, i32
  }
  func.func @transform_42(%arg0: i32) -> (i32, i32, i32) {
    %c0_i32 = arith.constant 0 : i32
    %c0_i32_0 = arith.constant 0 : i32
    %c0_i32_1 = arith.constant 0 : i32
    return %arg0, %c0_i32, %c0_i32_0 : i32, i32, i32
  }
  func.func @transform_43(%arg0: i32) -> (i32, i32, i32) {
    %c0_i32 = arith.constant 0 : i32
    %c0_i32_0 = arith.constant 0 : i32
    %c0_i32_1 = arith.constant 0 : i32
    return %arg0, %c0_i32, %c0_i32_0 : i32, i32, i32
  }
}

</mosaic_0001>

<bundles_post_ra>
// kernel: traj_predict_policy_forward.1
= control target key start
LH: loop header
LB: loop body
LE: loop exit
PB: predicated region body
PF: predicated region fallthrough
CT: control target
= control target key end

     0   :  { %s4520_s6 = smov 1   ;;  %s4521_s10 = smov 2   ;;  %s5557_s0 = inlined_call_operand.smem [shape: u32[44], index: -1, kind: input, shape index: {}] }
   0x1   :  { %s4589_s5 = sld [smem:[%s5557_s0]]   ;;  %s4522_s14 = smov 3  }
   0x2   :  { %s4594_s9 = sld [smem:[%s5557_s0 + %s4520_s6]]   ;;  %s4523_s18 = smov 4  }
   0x3   :  { %s4599_s13 = sld [smem:[%s5557_s0 + %s4521_s10]]   ;;  %s4524_s22 = smov 5  }
   0x4   :  { %s4604_s17 = sld [smem:[%s5557_s0 + %s4522_s14]]   ;;  %s4525_s26 = smov 6  }
   0x5   :  { %s4609_s21 = sld [smem:[%s5557_s0 + %s4523_s18]]   ;;  %s4526_s30 = smov 7  }
   0x6   :  { %s4614_s25 = sld [smem:[%s5557_s0 + %s4524_s22]]   ;;  %s4527_s4 = smov 8  }
   0x7   :  { %5618 = sst [smem:[#allocation9_spill]] %s4589_s5  ;;  %s4528_s10 = smov 9  }
   0x8   :  { %5619 = sst [smem:[#allocation10_spill]] %s4594_s9  ;;  %s4529_s15 = smov 10  }
   0x9   :  { %5620 = sst [smem:[#allocation11_spill]] %s4599_s13  ;;  %s4530_s20 = smov 11  }
   0xa   :  { %5621 = sst [smem:[#allocation12_spill]] %s4604_s17  ;;  %s4532_s1 = smov 13  }
   0xb   :  { %5622 = sst [smem:[#allocation13_spill]] %s4609_s21  ;;  %s4533_s7 = smov 14  }
   0xc   :  { %5623 = sst [smem:[#allocation14_spill]] %s4614_s25  ;;  %s4535_s22 = smov 16  }
   0xd   :  { %s4619_s29 = sld [smem:[%s5557_s0 + %s4525_s26]]   ;;  %s4531_s26 = smov 12  }
   0xe   :  { %s4624_s3 = sld [smem:[%s5557_s0 + %s4526_s30]]   ;;  %s4536_s28 = smov 17  }
   0xf   :  { %s4629_s8 = sld [smem:[%s5557_s0 + %s4527_s4]]  }
  0x10   :  { %s4634_s14 = sld [smem:[%s5557_s0 + %s4528_s10]]  }
  0x11   :  { %s4639_s19 = sld [smem:[%s5557_s0 + %s4529_s15]]   ;;  %s4534_s15 = smov 15  }
  0x12   :  { %s4644_s24 = sld [smem:[%s5557_s0 + %s4530_s20]]  }
  0x13   :  { %5624 = sst [smem:[#allocation15_spill]] %s4619_s29 }
  0x14   :  { %5625 = sst [smem:[#allocation16_spill]] %s4624_s3 }
  0x15   :  { %5626 = sst [smem:[#allocation17_spill]] %s4629_s8 }
  0x16   :  { %5627 = sst [smem:[#allocation18_spill]] %s4634_s14 }
  0x17   :  { %5628 = sst [smem:[#allocation19_spill]] %s4639_s19 }
  0x18   :  { %5629 = sst [smem:[#allocation20_spill]] %s4644_s24 }
  0x19   :  { %s4649_s30 = sld [smem:[%s5557_s0 + %s4531_s26]]  }
  0x1a   :  { %s4654_s6 = sld [smem:[%s5557_s0 + %s4532_s1]]  }
  0x1b   :  { %s4659_s12 = sld [smem:[%s5557_s0 + %s4533_s7]]   ;;  %s4537_s7 = smov 18  }
  0x1c   :  { %s4664_s20 = sld [smem:[%s5557_s0 + %s4534_s15]]   ;;  %s4538_s15 = smov 19  }
  0x1d   :  { %s4669_s27 = sld [smem:[%s5557_s0 + %s4535_s22]]   ;;  %s4539_s22 = smov 20  }
  0x1e   :  { %s4674_s4 = sld [smem:[%s5557_s0 + %s4536_s28]]   ;;  %s4540_s28 = smov 21  }
  0x1f   :  { %5630 = sst [smem:[#allocation21_spill]] %s4649_s30 }
  0x20   :  { %5631 = sst [smem:[#allocation22_spill]] %s4654_s6 }
  0x21   :  { %5632 = sst [smem:[#allocation23_spill]] %s4659_s12 }
  0x22   :  { %5633 = sst [smem:[#allocation24_spill]] %s4664_s20 }
  0x23   :  { %5634 = sst [smem:[#allocation25_spill]] %s4669_s27 }
  0x24   :  { %5635 = sst [smem:[#allocation26_spill]] %s4674_s4 }
  0x25   :  { %s4679_s30 = sld [smem:[%s5557_s0 + %s4537_s7]]   ;;  %s4541_s7 = smov 22  }
  0x26   :  { %s4684_s24 = sld [smem:[%s5557_s0 + %s4538_s15]]   ;;  %s4542_s15 = smov 23  }
  0x27   :  { %s4689_s17 = sld [smem:[%s5557_s0 + %s4539_s22]]   ;;  %s4543_s22 = smov 24  }
  0x28   :  { %s4694_s19 = sld [smem:[%s5557_s0 + %s4540_s28]]   ;;  %s4544_s28 = smov 25  }
  0x29   :  { %s4699_s4 = sld [smem:[%s5557_s0 + %s4541_s7]]   ;;  %s4545_s7 = smov 26  }
  0x2b   :  { %5636 = sst [smem:[#allocation27_spill]] %s4679_s30 }
  0x2c   :  { %5637 = sst [smem:[#allocation28_spill]] %s4684_s24 }
  0x2d   :  { %5638 = sst [smem:[#allocation29_spill]] %s4689_s17 }
  0x2e   :  { %5639 = sst [smem:[#allocation30_spill]] %s4694_s19 }
  0x2f   :  { %5640 = sst [smem:[#allocation31_spill]] %s4699_s4 }
  0x30   :  { %s4704_s24 = sld [smem:[%s5557_s0 + %s4542_s15]]   ;;  %s4546_s15 = smov 27  }
  0x31   :  { %s4709_s17 = sld [smem:[%s5557_s0 + %s4543_s22]]   ;;  %s4547_s22 = smov 28  }
  0x32   :  { %s4714_s19 = sld [smem:[%s5557_s0 + %s4544_s28]]   ;;  %s4548_s28 = smov 29  }
  0x33   :  { %s4719_s4 = sld [smem:[%s5557_s0 + %s4545_s7]]   ;;  %s4549_s7 = smov 30  }
  0x36   :  { %5641 = sst [smem:[#allocation32_spill]] %s4704_s24 }
  0x37   :  { %5642 = sst [smem:[#allocation33_spill]] %s4709_s17 }
  0x38   :  { %5643 = sst [smem:[#allocation34_spill]] %s4714_s19 }
  0x39   :  { %5644 = sst [smem:[#allocation35_spill]] %s4719_s4 }
  0x3a   :  { %s4724_s24 = sld [smem:[%s5557_s0 + %s4546_s15]]   ;;  %s4550_s15 = smov 31  }
  0x3b   :  { %s4729_s17 = sld [smem:[%s5557_s0 + %s4547_s22]]   ;;  %s4551_s22 = smov 32  }
  0x3c   :  { %s4734_s19 = sld [smem:[%s5557_s0 + %s4548_s28]]   ;;  %s4552_s28 = smov 33  }
  0x3d   :  { %s4739_s4 = sld [smem:[%s5557_s0 + %s4549_s7]]   ;;  %s4553_s7 = smov 34  }
  0x40   :  { %5645 = sst [smem:[#allocation36_spill]] %s4724_s24 }
  0x41   :  { %5646 = sst [smem:[#allocation37_spill]] %s4729_s17 }
  0x42   :  { %5647 = sst [smem:[#allocation38_spill]] %s4734_s19 }
  0x43   :  { %5648 = sst [smem:[#allocation39_spill]] %s4739_s4 }
  0x44   :  { %s4744_s24 = sld [smem:[%s5557_s0 + %s4550_s15]]   ;;  %s4554_s15 = smov 35  }
  0x45   :  { %s4749_s17 = sld [smem:[%s5557_s0 + %s4551_s22]]   ;;  %s4555_s22 = smov 36  }
  0x46   :  { %s4754_s19 = sld [smem:[%s5557_s0 + %s4552_s28]]   ;;  %s4556_s28 = smov 37  }
  0x47   :  { %s4759_s4 = sld [smem:[%s5557_s0 + %s4553_s7]]   ;;  %s4557_s7 = smov 38  }
  0x4a   :  { %5649 = sst [smem:[#allocation40_spill]] %s4744_s24 }
  0x4b   :  { %5650 = sst [smem:[#allocation41_spill]] %s4749_s17 }
  0x4c   :  { %5651 = sst [smem:[#allocation42_spill]] %s4754_s19 }
  0x4d   :  { %5652 = sst [smem:[#allocation43_spill]] %s4759_s4 }
  0x4e   :  { %s4764_s24 = sld [smem:[%s5557_s0 + %s4554_s15]]   ;;  %s4558_s15 = smov 39  }
  0x4f   :  { %s4769_s17 = sld [smem:[%s5557_s0 + %s4555_s22]]   ;;  %s4559_s22 = smov 40  }
  0x50   :  { %s4774_s19 = sld [smem:[%s5557_s0 + %s4556_s28]]   ;;  %s4560_s28 = smov 41  }
  0x51   :  { %s4779_s4 = sld [smem:[%s5557_s0 + %s4557_s7]]   ;;  %s4561_s7 = smov 42  }
  0x54   :  { %5653 = sst [smem:[#allocation44_spill]] %s4764_s24 }
  0x55   :  { %5654 = sst [smem:[#allocation45_spill]] %s4769_s17 }
  0x56   :  { %5655 = sst [smem:[#allocation46_spill]] %s4774_s19 }
  0x57   :  { %5656 = sst [smem:[#allocation47_spill]] %s4779_s4 }
  0x58   :  { %s4784_s24 = sld [smem:[%s5557_s0 + %s4558_s15]]   ;;  %s4562_s15 = smov 43  }
  0x59   :  { %s4789_s17 = sld [smem:[%s5557_s0 + %s4559_s22]]  }
  0x5a   :  { %s4794_s19 = sld [smem:[%s5557_s0 + %s4560_s28]]  }
  0x5b   :  { %s4799_s4 = sld [smem:[%s5557_s0 + %s4561_s7]]  }
  0x5e   :  { %5657 = sst [smem:[#allocation48_spill]] %s4784_s24 }
  0x5f   :  { %5658 = sst [smem:[#allocation49_spill]] %s4789_s17 }
  0x60   :  { %s4804_s24 = sld [smem:[%s5557_s0 + %s4562_s15]]  }
  0x61   :  { %5659 = sst [smem:[#allocation50_spill]] %s4799_s4 }
  0x66   :  { %5660 = sst [smem:[#allocation51_spill]] %s4804_s24 }
  0x67   :  { %93 = vsyncpa [#allocation3], 0 }
  0x68   :  { %95 = vsyncpa [#allocation3 + $0x1], 0 }
  0x69   :  { %96 = vsyncpa [#allocation5], 0 }
  0x6a   :  { %98 = vsyncpa [#allocation5 + $0x1], 0  ;;  %s4806_s22 = smov 0   ;;  %s4808_s23 = smov 0  }
  0x6b   :  { %s4810_s26 = smov 0   ;;  %s4812_s28 = smov 0  }
  0x6c LB: > { %s5661_s4 = sld [smem:[#allocation50_spill]]  ;;  %s4827_s0 = sadd.s32 4294967295, %s4518_s28   ;;  %s4518_s28 = sphi %s4812_s28, %s5737_s28   ;;  %s4514_s26 = sphi %s4810_s26, %s5740_s26   ;;  %s4510_s23 = sphi %s4808_s23, %s5739_s23   ;;  %s4506_s22 = sphi %s4806_s22, %s5738_s22  }
  0x6d   : > { %s5662_s30 = sld [smem:[#allocation27_spill]]  ;;  %s5575_s1 = sadd.s32 4294967294, %s4518_s28  }
  0x6e   : > { %s5663_s29 = sld [smem:[#allocation15_spill]]  ;;  %s4831_s2 = sadd.s32 1, %s4518_s28  }
  0x6f   : > { %s5664_s27 = sld [smem:[#allocation25_spill]]  ;;  %s997_s7 = sadd.s32 1, %s4514_s26 }
  0x70   : > { %s5665_s21 = sld [smem:[#allocation13_spill]]  ;;  %s994_s10 = ssub.s32 %s4518_s28, %s4831_s2 }
  0x71   : > { %s5666_s20 = sld [smem:[#allocation24_spill]]  ;;  %p1007_p0 = scmp.ne.s32.totalorder %s4514_s26, %s4510_s23 }
  0x72   : > { %s5667_s8 = sld [smem:[#allocation17_spill]]  ;;  %p995_p1 = scmp.eq.s32.totalorder %s994_s10, 0 }
  0x73   : > { %s5668_s6 = sld [smem:[#allocation22_spill]]  ;;  %p1008_p2 = scmp.eq.s32.totalorder %s4827_s0, 1 }
  0x74   : > { %5669 = sst [smem:[#allocation52_spill]] %s4506_s22  ;;  %p1013_p3 = scmp.ne.s32.totalorder %s4510_s23, %s4506_s22 }
  0x75   : > { %5670 = sst [smem:[#allocation53_spill]] %s4510_s23  ;;  %p1014_p4 = scmp.eq.s32.totalorder %s5575_s1, 1 }
  0x76   : > { %5671 = sst [smem:[#allocation54_spill]] %s4514_s26  ;;  %p4846_p5 = por %p1008_p2, %p1007_p0 }
  0x77   : > { %5672 = sst [smem:[#allocation55_spill]] %s4518_s28  ;;  %p4850_p6 = por %p1014_p4, %p1013_p3 }
  0x78   : > { %5673 = sst [smem:[#allocation56_spill]] %s4831_s2  ;;  %p4023_p7 = scmp.ge.s32.totalorder %s4518_s28, 1 }
  0x79   : > { %s4844_s11 = scalar_select %p995_p1, %s4514_s26, %s997_s7  }
  0x7a   : > { %s5676_s16 = scalar_select %p4850_p6, 1, 0 }
  0x7b   : > { %5674 = sst [smem:[#allocation57_spill]] %s4844_s11  ;;  %p1220_p8 = scmp.lt.s32.totalorder %s4518_s28, 3 }
  0x7c   : > { %5677 = sst [smem:[#allocation58_spill]] %s5676_s16 }
  0x7d   : > { %p1221_p9 = pnand %p4023_p7, %p1220_p8 }
  0x7f   : > { %1224 = sbr.rel (%p1221_p9) target bundleno = 9170 (0x23d2), region = 180 }
  0x84   : > { %v1429_v0 = vld [vmem:[%s5663_s29 + $0x70] sm:$0xff]  ;;  %v1430_v1 = vld [vmem:[%s5663_s29 + $0x78] sm:$0xff]  ;;  %v1427_v2 = vld [vmem:[%s5663_s29 + $0x60] sm:$0xff]  ;;  %p1347_p10 = scmp.lt.s32.totalorder %s4827_s0, 1  ;;  %s5678_s5 = sld [smem:[#allocation9_spill]]  ;;  %vm1457_vm0 = vcmask 523264  }
  0x85   : > { %v1448_v3 = vpack.c.bf16 %v1430_v1, %v1429_v0  ;;  %v1428_v4 = vld [vmem:[%s5663_s29 + $0x68] sm:$0xff]  ;;  %v1437_v5 = vld [vmem:[%s5663_s29 + $0xb0] sm:$0xff]  ;;  %v1438_v6 = vld [vmem:[%s5663_s29 + $0xb8] sm:$0xff]  ;;  %s5679_s9 = sld [smem:[#allocation10_spill]]  ;;  %vm1369_vm1 = vcmask 261120   ;;  %v4563_v60 = vmov 8.0  }
  0x86   : > { %v1452_v7 = vpack.c.bf16 %v1438_v6, %v1437_v5  ;;  %v1435_v8 = vld [vmem:[%s5663_s29 + $0xa0] sm:$0xff]  ;;  %s4865_s18 = scalar_select %p1347_p10, %s4827_s0, 1  ;;  %v1447_v9 = vpack.c.bf16 %v1428_v4, %v1427_v2  ;;  %v1436_v10 = vld [vmem:[%s5663_s29 + $0xa8] sm:$0xff]  ;;  %v1425_v11 = vld [vmem:[%s5663_s29 + $0x50] sm:$0xff]  ;;  %4286 = vrcp.f32 %v4563_v60  ;;  %vm1506_vm4 = vcmask 516096  }
  0x87   : > { %1461 = vmatpush.bf16.msra.mxu1 %v1448_v3  ;;  %v1426_v12 = vld [vmem:[%s5663_s29 + $0x58] sm:$0xff]  ;;  %v1451_v13 = vpack.c.bf16 %v1436_v10, %v1435_v8  ;;  %v1433_v14 = vld [vmem:[%s5663_s29 + $0x90] sm:$0xff]  ;;  %v1423_v17 = vld [vmem:[%s5663_s29 + $0x40] sm:$0xff]  ;;  %s5681_s3 = sld [smem:[#allocation16_spill]]  ;;  %v4564_v8 = vmov 16.0   ;;  %vm1409_vm5 = vcmask 253952  }
  0x88   : > { %1479 = vmatpush.bf16.msra.mxu2 %v1452_v7  ;;  %s4151_s7 = sshll.u32 %s4865_s18, 5  ;;  %v1434_v15 = vld [vmem:[%s5663_s29 + $0x98] sm:$0xff]  ;;  %v1446_v16 = vpack.c.bf16 %v1426_v12, %v1425_v11  ;;  %v1424_v18 = vld [vmem:[%s5663_s29 + $0x48] sm:$0xff]  ;;  %v1431_v20 = vld [vmem:[%s5663_s29 + $0x80] sm:$0xff]  ;;  %4288 = vrcp.f32 %v4564_v8  ;;  %s5682_s14 = sld [smem:[#allocation18_spill]]  ;;  %vm1593_vm6 = vcmask 1040384  }
  0x89   : > { %v1450_v19 = vpack.c.bf16 %v1434_v15, %v1433_v14  ;;  %v1432_v21 = vld [vmem:[%s5663_s29 + $0x88] sm:$0xff]  ;;  %v1421_v22 = vld [vmem:[%s5663_s29 + $0x30] sm:$0xff]  ;;  %v1422_v23 = vld [vmem:[%s5663_s29 + $0x38] sm:$0xff]  ;;  %v1445_v26 = vpack.c.bf16 %v1424_v18, %v1423_v17  ;;  %s5683_s25 = sld [smem:[#allocation14_spill]]  ;;  %vm1734_vm7 = vcmask 15360   ;;  %vm1829_vm12 = vcmask 64512  }
  0x8a   : > { %s4874_s10 = scalar_lea.vmem %s5678_s5, %s4151_s7  ;;  %v1449_v27 = vpack.c.bf16 %v1432_v21, %v1431_v20  ;;  %v1419_v28 = vld [vmem:[%s5663_s29 + $0x20] sm:$0xff]  ;;  %v1420_v29 = vld [vmem:[%s5663_s29 + $0x28] sm:$0xff]  ;;  %v1444_v30 = vpack.c.bf16 %v1422_v23, %v1421_v22  ;;  %v1417_v33 = vld [vmem:[%s5663_s29 + $0x10] sm:$0xff]  ;;  %s4902_s7 = sshll.u32 %s4865_s18, 3  ;;  %vm1866_vm14 = vcmask 1043456  }
  0x8b   : > { %1462 = vmatpush.bf16.msra.mxu1 %v1447_v9  ;;  %v1412_v24 = vld [vmem:[%s4874_s10 + $0x8] sm:$0xff]  ;;  %v1414_v25 = vld [vmem:[%s4874_s10 + $0x18] sm:$0xff]  ;;  %v1443_v32 = vpack.c.bf16 %v1420_v29, %v1419_v28  ;;  %v1415_v36 = vld [vmem:[%s5663_s29] sm:$0xff]  ;;  %5680 = sst [smem:[#allocation59_spill]] %s4902_s7  ;;  %s5707_s11 = smov 88  }
  0x8c   : > { %1480 = vmatpush.bf16.msra.mxu2 %v1451_v13  ;;  %v1440_v31 = vpack.c.bf16 %v1414_v25, %v1412_v24  ;;  %v1418_v34 = vld [vmem:[%s5663_s29 + $0x18] sm:$0xff]  ;;  %v1416_v37 = vld [vmem:[%s5663_s29 + $0x8] sm:$0xff]  ;;  %v1411_v39 = vld [vmem:[%s4874_s10] sm:$0xff]  ;;  %v4287_v1 = vpop.eup %4286  ;;  %s5684_s12 = sld [smem:[#allocation23_spill]]  ;;  %s5705_s29 = smov 112  }
  0x8d   : > { %v1442_v35 = vpack.c.bf16 %v1418_v34, %v1417_v33  ;;  %v1441_v38 = vpack.c.bf16 %v1416_v37, %v1415_v36  ;;  %v1413_v40 = vld [vmem:[%s4874_s10 + $0x10] sm:$0xff]  ;;  %v1515_v43 = vld [vmem:[%s5667_s8 + $0x38] sm:$0xff]  ;;  %v1512_v45 = vld [vmem:[%s5667_s8 + $0x20] sm:$0xff]  ;;  %s1355_s10 = scalar_lea.vmem %s5679_s9, %s4902_s7  ;;  %v1378_v3 = vmul.f32 8.0, %v4287_v1  ;;  %vm1382_vm2 = vweird.f32 %v4287_v1  ;;  %s5685_s13 = sld [smem:[#allocation11_spill]] }
  0x8e   : > { %v1439_v41 = vpack.c.bf16 %v1413_v40, %v1411_v39  ;;  %v1514_v42 = vld [vmem:[%s5667_s8 + $0x30] sm:$0xff]  ;;  %v1513_v46 = vld [vmem:[%s5667_s8 + $0x28] sm:$0xff]  ;;  %v1511_v49 = vld [vmem:[%s5667_s8 + $0x18] sm:$0xff]  ;;  %v4289_v15 = vpop.eup %4288  ;;  %s5586_s9 = smov 96   ;;  %s5708_s26 = smov 72  }
  0x8f   : > { %1463 = vmatpush.bf16.msra.mxu1 %v1446_v16  ;;  %v1520_v44 = vpack.c.bf16 %v1515_v43, %v1514_v42  ;;  %v1519_v47 = vpack.c.bf16 %v1513_v46, %v1512_v45  ;;  %v1510_v48 = vld [vmem:[%s5667_s8 + $0x10] sm:$0xff]  ;;  %v1508_v51 = vld [vmem:[%s5667_s8] sm:$0xff]  ;;  %v1509_v52 = vld [vmem:[%s5667_s8 + $0x8] sm:$0xff]  ;;  %v1379_v7 = vsub.f32 1.0, %v1378_v3  ;;  %v1499_v22 = vmul.f32 16.0, %v4289_v15  ;;  %s5582_s8 = smov 88  }
  0x90   : > { %1481 = vmatpush.bf16.msra.mxu2 %v1450_v19  ;;  %v1518_v50 = vpack.c.bf16 %v1511_v49, %v1510_v48  ;;  %v1517_v53 = vpack.c.bf16 %v1509_v52, %v1508_v51  ;;  %v1387_v54 = vld [vmem:[%s5665_s21 + $0x10] sm:$0xff]  ;;  %v1388_v55 = vld [vmem:[%s5665_s21 + $0x18] sm:$0xff]  ;;  %v1385_v56 = vld [vmem:[%s5665_s21] sm:$0xff]  ;;  %vm1503_vm3 = vweird.f32 %v4289_v15  ;;  %s5710_s2 = sld [smem:[#allocation40_spill]] }
  0x91   : > { %1532 = vmatpush.bf16.msra.mxu3 %v1520_v44  ;;  %v1391_v57 = vpack.c.bf16 %v1388_v55, %v1387_v54  ;;  %v1386_v58 = vld [vmem:[%s5665_s21 + $0x8] sm:$0xff]  ;;  %v1368_v59 = vld [vmem:[%s1355_s10] sm:$0xff]  ;;  %v1380_v11 = vmul.f32 %v4287_v1, %v1379_v7  ;;  %v1500_v28 = vsub.f32 1.0, %v1499_v22  ;;  %s4917_s10 = sand.u32 1, %s4510_s23   ;;  %v1555_v40 = vld [vmem:[%s5668_s6 + $0x10] sm:$0xff]  ;;  %s5702_s21 = smov 120  }
  0x92   : > { %v1370_v61 = vsel %vm1369_vm1, %v1368_v59, 0.0  ;;  %v1390_v62 = vpack.c.bf16 %v1386_v58, %v1385_v56  ;;  %v4263_v9 = vld [vmem:[%s5681_s3] ss:$0 sm:$0xff]  ;;  %s5576_s1 = scalar_lea.vmem [#allocation4], %s4917_s10  ;;  %v1554_v44 = vld [vmem:[%s5668_s6 + $0x8] sm:$0xff]  ;;  %s4024_s3 = sshll.u32 %s4917_s10, 4 }
  0x93   : > { %1464 = vmatpush.bf16.msra.mxu1 %v1445_v26  ;;  %1402 = vmatpush.bf16.msra.mxu0 %v1391_v57  ;;  %v1371_v63 = vrot.slane %v1370_v61, 4  ;;  %v1381_v13 = vadd.f32 %v4287_v1, %v1380_v11  ;;  %v1553_v43 = vld [vmem:[%s5668_s6] sm:$0xff]  ;;  %v1611_v57 = vld [vmem:[%s5664_s27 + $0x10] sm:$0xff]  ;;  %v1612_v58 = vld [vmem:[%s5664_s27 + $0x18] sm:$0xff]  ;;  %s1358_s5 = scalar_lea.vmem %s5685_s13, %s4865_s18  ;;  %s5687_s18 = sld [smem:[#allocation19_spill]] }
  0x94   : > { %1482 = vmatpush.bf16.msra.mxu2 %v1449_v27  ;;  %v1559_v45 = vpack.c.bf16 %v1554_v44, %v1553_v43  ;;  %v1392_v52 = vld [vmem:[%s5683_s25] sm:$0x1]  ;;  %v1616_v59 = vpack.c.bf16 %v1612_v58, %v1611_v57  ;;  %v1692_v22 = vld [vmem:[%s5662_s30 + $0x70] sm:$0xff]  ;;  %s5584_s13 = smov 112   ;;  %s5703_s25 = sld [smem:[#allocation36_spill]] }
  0x95   : > { %1533 = vmatpush.bf16.msra.mxu3 %v1519_v47  ;;  %v1372_v0 = vadd.f32 %v1371_v63, %v1370_v61  ;;  %v1383_v16 = vsel %vm1382_vm2, %v4287_v1, %v1381_v13  ;;  %v4264_v47 = vld [vmem:[%s5682_s14] ss:$0 sm:$0xff]  ;;  %v1610_v61 = vld [vmem:[%s5664_s27 + $0x8] sm:$0xff]  ;;  %s5595_s14 = smov 104   ;;  %s5709_s23 = smov 80  }
  0x96   : > { %v1609_v60 = vld [vmem:[%s5664_s27] sm:$0xff]  ;;  %s5704_s27 = smov 104   ;;  %s5711_s16 = sld [smem:[#allocation41_spill]] }
  0x97   : > { %1465 = vmatpush.bf16.msra.mxu1 %v1444_v30  ;;  %4031 = vmatmul.msk.bf16.vlgmr.msra.gmra.mxu2 %vm1457_vm0, %v1440_v31  ;;  %v1373_v2 = vrot.slane %v1372_v0, 2  ;;  %v1501_v31 = vmul.f32 %v4289_v15, %v1500_v28  ;;  %v4265_v63 = vld [vmem:[%s5684_s12] ss:$0 sm:$0xff]  ;;  %v1688_v28 = vld [vmem:[%s5662_s30 + $0x50] sm:$0xff]  ;;  %s5580_s12 = smov 80   ;;  %s5712_s22 = sld [smem:[#allocation43_spill]] }
  0x98   : > { %1403 = vmatpush.bf16.msra.mxu0 %v1390_v62  ;;  %1633 = vmatpush.bf16.msrb.mxu2 %v1616_v59  ;;  %v1615_v62 = vpack.c.bf16 %v1610_v61, %v1609_v60  ;;  %v1589_v3 = vld [vmem:[%s1358_s5] sm:$0x1]  ;;  %s5686_s5 = sld [smem:[#allocation26_spill]] }
  0x99   : > { %1534 = vmatpush.bf16.msra.mxu3 %v1518_v50  ;;  %v1374_v4 = vadd.f32 %v1373_v2, %v1372_v0  ;;  %v1502_v34 = vadd.f32 %v4289_v15, %v1501_v31  ;;  %v1603_v7 = vld [vmem:[%s5666_s20] sm:$0xff]  ;;  %s5714_s28 = sld [smem:[#allocation42_spill]] }
  0x9a   : > { %v1686_v31 = vld [vmem:[%s5662_s30 + $0x40] sm:$0xff] }
  0x9b   : > { %1466 = vmatpush.bf16.msra.mxu1 %v1443_v32  ;;  %v1375_v10 = vrot.slane %v1374_v4, 1  ;;  %v1504_v37 = vsel %vm1503_vm3, %v4289_v15, %v1502_v34 }
  0x9c   : > { %1634 = vmatpush.bf16.msrb.mxu2 %v1615_v62 }
  0x9d   : > { %1535 = vmatpush.bf16.msra.mxu3 %v1517_v53  ;;  %v1376_v12 = vadd.f32 %v1375_v10, %v1374_v4  ;;  %s5713_s17 = smov %s5712_s22 }
  0x9e   : > { %v4266_v34 = vld [vmem:[%s5686_s5] ss:$0 sm:$0xff]  ;;  %s5688_s5 = sld [smem:[#allocation12_spill]] }
  0x9f   : > { %1467 = vmatpush.bf16.msra.mxu1 %v1442_v35  ;;  %v1384_v17 = vmul.f32 %v1383_v16, %v1376_v12 }
  0xa1   : > { %v1389_v21 = vpack.c.bf16 %v1384_v17, %v1384_v17 }
  0xa3   : > { %1468 = vmatpush.bf16.msra.mxu1 %v1441_v38  ;;  %4030 = vmatmul.msk.bf16.vlgmr.msra.gmra.mxu0 %vm1369_vm1, %v1389_v21 }
  0xa6   : > { %1469 = vmatmul.bf16.vlgmr.msra.gmra.mxu1 %v1439_v41  ;;  %v1556_v41 = vld [vmem:[%s5668_s6 + $0x18] sm:$0xff]  ;;  %s1362_s6 = scalar_lea.vmem %s5688_s5, %s4902_s7  ;;  %s5693_s5 = sld [smem:[#allocation30_spill]] }
  0xa7   : > { %v1560_v42 = vpack.c.bf16 %v1556_v41, %v1555_v40  ;;  %v1682_v40 = vld [vmem:[%s5662_s30 + $0x20] sm:$0xff]  ;;  %v1683_v41 = vld [vmem:[%s5662_s30 + $0x28] sm:$0xff]  ;;  %s5715_s7 = smov %s5714_s28 }
  0xa8   : > { %v1698_v43 = vpack.c.bf16 %v1683_v41, %v1682_v40  ;;  %v4565_v41 = vmov 32.0  }
  0xa9   : > { %1577 = vmatpush.bf16.msrb.mxu0 %v1560_v42 }
  0xad   : > { %1578 = vmatpush.bf16.msrb.mxu0 %v1559_v45  ;;  %v1680_v45 = vld [vmem:[%s5662_s30 + $0x10] sm:$0xff] }
 0x11a   : > { %v1484_v5 = vpop.f32.mrf.mxu2 }
 0x120   : > { %v1405_v46 = vpop.f32.mrf.mxu0 }
 0x121   : > { %v1406_v55 = vadd.f32 %v1405_v46, %v1392_v52  ;;  %v1681_v46 = vld [vmem:[%s5662_s30 + $0x18] sm:$0xff]  ;;  %v1679_v52 = vld [vmem:[%s5662_s30 + $0x8] sm:$0xff] }
 0x122   : > { %v1486_v23 = vpop.f32.mrf.mxu2 }
 0x123   : > { %v1470_v6 = vpop.f32.mrf.mxu1  ;;  %v1558_v56 = vpack.c.bf16 %v1406_v55, %v1406_v55 }
 0x124   : > { %v1471_v14 = vadd.f32 %v4263_v9, %v1470_v6 }
 0x126   : > { %v1485_v19 = vadd.f32 %v1484_v5, %v1471_v14 }
 0x128   : > { %v1489_v25 = vsel %vm1457_vm0, %v1485_v19, 0.0  ;;  %v1407_v48 = vpop.f32.mrf.mxu0 }
 0x129   : > { %v1697_v48 = vpack.c.bf16 %v1681_v46, %v1680_v45 }
 0x12b   : > { %v1472_v18 = vpop.f32.mrf.mxu1 }
 0x12c   : > { %v1473_v20 = vadd.f32 %v4263_v9, %v1472_v18  ;;  %v1604_v9 = vld [vmem:[%s5666_s20 + $0x8] sm:$0xff] }
 0x12e   : > { %v1487_v24 = vadd.f32 %v1486_v23, %v1473_v20  ;;  %v1693_v23 = vld [vmem:[%s5662_s30 + $0x78] sm:$0xff] }
 0x130   : > { %v1490_v26 = vsel %vm1457_vm0, %v1487_v24, 0.0  ;;  %v1516_v27 = vpack.c.bf16 %v1487_v24, %v1485_v19  ;;  %v1605_v19 = vld [vmem:[%s5666_s20 + $0x10] sm:$0x3]  ;;  %v1703_v24 = vpack.c.bf16 %v1693_v23, %v1692_v22  ;;  %s5696_s20 = sld [smem:[#allocation37_spill]] }
 0x131   : > { %v1491_v29 = vadd.f32 %v1490_v26, %v1489_v25  ;;  %v1690_v25 = vld [vmem:[%s5662_s30 + $0x60] sm:$0xff]  ;;  %v1691_v26 = vld [vmem:[%s5662_s30 + $0x68] sm:$0xff] }
 0x132   : > { %4032 = vmatmul.msk.bf16.vlgmr.msra.gmra.mxu3 %vm1457_vm0, %v1516_v27  ;;  %v1702_v27 = vpack.c.bf16 %v1691_v26, %v1690_v25 }
 0x133   : > { %v1492_v30 = vrot.slane %v1491_v29, 4  ;;  %1708 = vmatpush.bf16.msrb.mxu3 %v1703_v24 }
 0x135   : > { %v1493_v32 = vadd.f32 %v1492_v30, %v1491_v29  ;;  %v1689_v29 = vld [vmem:[%s5662_s30 + $0x58] sm:$0xff] }
 0x136   : > { %v1701_v30 = vpack.c.bf16 %v1689_v29, %v1688_v28  ;;  %v1726_v28 = vld [vmem:[%s1362_s6] sm:$0xff]  ;;  %s5691_s6 = sld [smem:[#allocation31_spill]] }
 0x137   : > { %v1494_v33 = vrot.slane %v1493_v32, 2  ;;  %1709 = vmatpush.bf16.msrb.mxu3 %v1702_v27  ;;  %v1728_v29 = vpack.c.bf16 %v1726_v28, %v1726_v28 }
 0x139   : > { %v1495_v35 = vadd.f32 %v1494_v33, %v1493_v32  ;;  %v1687_v32 = vld [vmem:[%s5662_s30 + $0x48] sm:$0xff] }
 0x13a   : > { %v1700_v33 = vpack.c.bf16 %v1687_v32, %v1686_v31 }
 0x13b   : > { %v1496_v36 = vrot.slane %v1495_v35, 1  ;;  %1710 = vmatpush.bf16.msrb.mxu3 %v1701_v30 }
 0x13d   : > { %v1497_v38 = vadd.f32 %v1496_v36, %v1495_v35  ;;  %v1684_v35 = vld [vmem:[%s5662_s30 + $0x30] sm:$0xff]  ;;  %v1685_v36 = vld [vmem:[%s5662_s30 + $0x38] sm:$0xff] }
 0x13f   : > { %v1505_v39 = vmul.f32 %v1504_v37, %v1497_v38  ;;  %1711 = vmatpush.bf16.msrb.mxu3 %v1700_v33  ;;  %v1699_v37 = vpack.c.bf16 %v1685_v36, %v1684_v35 }
 0x141   : > { %1507 = vst.msk [vmem:[%s5576_s1] sm:$0x1] %vm1506_vm4, %v1505_v39  ;;  %s4928_s1 = scalar_lea.vmem [#allocation6], %s4024_s3  ;;  %s5577_s3 = scalar_lea.vmem [#allocation2], %s4917_s10  ;;  %vm2263_vm4 = vcmask 146432  }
 0x142   : > { %1410 = vst.msk [vmem:[%s5577_s3] sm:$0x1] %vm1409_vm5, %v1406_v55  ;;  %s5690_s3 = sld [smem:[#allocation21_spill]] }
 0x143   : > { %1712 = vmatpush.bf16.msrb.mxu3 %v1699_v37 }
 0x147   : > { %1713 = vmatpush.bf16.msrb.mxu3 %v1698_v43 }
 0x148   : > { %v1754_v36 = vld [vmem:[%s5690_s3] sm:$0xff]  ;;  %s5692_s3 = sld [smem:[#allocation29_spill]] }
 0x14b   : > { %1714 = vmatpush.bf16.msrb.mxu3 %v1697_v48 }
 0x1b5   : > { %v1537_v49 = vpop.f32.mrf.mxu3 }
 0x1b6   : > { %v1538_v50 = vadd.f32 %v4264_v47, %v1537_v49 }
 0x1b8   : > { %1542 = vst.msk [vmem:[%s4928_s1] sm:$0xff] %vm1369_vm1, %v1538_v50 }
 0x1bd   : > { %v1539_v51 = vpop.f32.mrf.mxu3 }
 0x1be   : > { %v1540_v53 = vadd.f32 %v4264_v47, %v1539_v51  ;;  %v1678_v51 = vld [vmem:[%s5662_s30] sm:$0xff]  ;;  %s5706_s30 = sld [smem:[#allocation39_spill]] }
 0x1c0   : > { %1543 = vst.msk [vmem:[%s4928_s1 + $0x8] sm:$0xff] %vm1369_vm1, %v1540_v53  ;;  %v1557_v54 = vpack.c.bf16 %v1540_v53, %v1538_v50 }
 0x1c2   : > { %4033 = vmatmul.msk.bf16.vlgmr.msrb.gmra.mxu0 %vm1369_vm1, %v1557_v54  ;;  %v1696_v54 = vpack.c.bf16 %v1679_v52, %v1678_v51 }
 0x1c4   : > { %1715 = vmatpush.bf16.msrb.mxu3 %v1696_v54  ;;  %v1794_v54 = vld [vmem:[%s5691_s6 + $0x18] sm:$0xff] }
 0x1d2   : > { %4034 = vmatmul.msk.bf16.gmra.mxu0 %vm1369_vm1, %v1558_v56 }
 0x23f   : > { %v1580_v0 = vpop.f32.mrf.mxu0 }
 0x240   : > { %v1581_v1 = vadd.f32 %v4265_v63, %v1580_v0 }
 0x242   : > { %v1594_v2 = vrot.slane %v1581_v1, 7 }
 0x244   : > { %v1602_v6 = vsel %vm1593_vm6, %v1589_v3, %v1594_v2 }
 0x245   : > { %v1606_v11 = vadd.f32 %v1603_v7, %v1602_v6 }
 0x247   : > { %v1582_v4 = vpop.f32.mrf.mxu0 }
 0x248   : > { %v1583_v5 = vadd.f32 %v4265_v63, %v1582_v4 }
 0x24a   : > { %v1595_v8 = vrot.slane %v1583_v5, 7 }
 0x24c   : > { %v1596_v10 = vsel %vm1593_vm6, %v1594_v2, %v1595_v8 }
 0x24d   : > { %v1607_v12 = vadd.f32 %v1604_v9, %v1596_v10  ;;  %v1727_v10 = vld [vmem:[%s5687_s18] sm:$0x3]  ;;  %s5689_s18 = sld [smem:[#allocation20_spill]] }
 0x24f   : > { %v1585_v13 = vpop.f32.mrf.mxu0  ;;  %v1613_v14 = vpack.c.bf16 %v1607_v12, %v1606_v11 }
 0x250   : > { %v1586_v15 = vadd.f32 %v4265_v63, %v1585_v13  ;;  %v1729_v13 = vpack.c.bf16 %v1727_v10, %v1727_v10 }
 0x251   : > { %4035 = vmatmul.msk.bf16.vlgmr.msrb.gmra.mxu2 %vm1369_vm1, %v1613_v14 }
 0x252   : > { %v1597_v16 = vrot.slane %v1586_v15, 7  ;;  %v1739_v15 = vsel %vm1593_vm6, %v1729_v13, 0 }
 0x253   : > { %1748 = vmatpush.bf16.msra.mxu3 %v1739_v15 }
 0x254   : > { %v1598_v18 = vsel %vm1593_vm6, %v1595_v8, %v1597_v16 }
 0x255   : > { %v1608_v20 = vadd.f32 %v1605_v19, %v1598_v18 }
 0x257   : > { %v1587_v17 = vpop.f32.mrf.mxu0  ;;  %v1614_v21 = vpack.c.bf16 %v1608_v20, %v1608_v20 }
 0x261   : > { %4036 = vmatmul.msk.bf16.gmra.mxu2 %vm1369_vm1, %v1614_v21 }
 0x2d4   : > { %v1636_v38 = vpop.f32.mrf.mxu2 }
 0x2d5   : > { %v1637_v39 = vadd.f32 %v4266_v34, %v1636_v38 }
 0x2d7   : > { %v1648_v42 = vand.u32 2147483647, %v1637_v39  ;;  %v1645_v5 = vmax.f32 %v1637_v39, 0.0 }
 0x2d9   : > { %v1651_v44 = vsub.f32 0.0, %v1648_v42 }
 0x2db   : > { %v1654_v47 = vmul.f32 1.442695, %v1651_v44 }
 0x2dc   : > { %v1638_v49 = vpop.f32.mrf.mxu2 }
 0x2dd   : > { %4290 = vpow2.f32 %v1654_v47  ;;  %v1639_v50 = vadd.f32 %v4266_v34, %v1638_v49 }
 0x2df   : > { %v1649_v53 = vand.u32 2147483647, %v1639_v50  ;;  %v1646_v11 = vmax.f32 %v1639_v50, 0.0 }
 0x2e1   : > { %v1652_v55 = vsub.f32 0.0, %v1649_v53  ;;  %v1793_v53 = vld [vmem:[%s5691_s6 + $0x10] sm:$0xff] }
 0x2e3   : > { %v4291_v56 = vpop.eup %4290  ;;  %v1656_v57 = vmul.f32 1.442695, %v1652_v55  ;;  %v1797_v55 = vpack.c.bf16 %v1794_v54, %v1793_v53 }
 0x2e4   : > { %v1660_v58 = vadd.f32 1.0, %v4291_v56  ;;  %v1641_v59 = vpop.f32.mrf.mxu2  ;;  %v1791_v56 = vld [vmem:[%s5691_s6] sm:$0xff] }
 0x2e5   : > { %4292 = vpow2.f32 %v1656_v57  ;;  %v1642_v60 = vadd.f32 %v4266_v34, %v1641_v59  ;;  %v4268_v34 = vld [vmem:[%s5689_s18] ss:$0 sm:$0xff]  ;;  %1811 = vmatpush.bf16.msra.mxu0 %v1797_v55  ;;  %v1792_v57 = vld [vmem:[%s5691_s6 + $0x8] sm:$0xff]  ;;  %s5694_s18 = sld [smem:[#allocation32_spill]] }
 0x2e6   : > { %4294 = vlog2.f32 %v1660_v58  ;;  %v1796_v58 = vpack.c.bf16 %v1792_v57, %v1791_v56 }
 0x2e7   : > { %v1650_v61 = vand.u32 2147483647, %v1642_v60  ;;  %v1647_v20 = vmax.f32 %v1642_v60, 0.0 }
 0x2e9   : > { %v1653_v62 = vsub.f32 0.0, %v1650_v61  ;;  %1812 = vmatpush.bf16.msra.mxu0 %v1796_v58  ;;  %v2199_v58 = vld [vmem:[%s5696_s20 + $0x10] sm:$0xff] }
 0x2eb   : > { %v4293_v63 = vpop.eup %4292  ;;  %v1658_v0 = vmul.f32 1.442695, %v1653_v62  ;;  %v4269_v13 = vld [vmem:[%s5694_s18] ss:$0 sm:$0xff] }
 0x2ec   : > { %v4295_v1 = vpop.eup %4294  ;;  %v1661_v2 = vadd.f32 1.0, %v4293_v63  ;;  %v1643_v3 = vpop.f32.mrf.mxu2 }
 0x2ed   : > { %4296 = vpow2.f32 %v1658_v0  ;;  %v1664_v4 = vmul.f32 0.6931472, %v4295_v1 }
 0x2ee   : > { %4298 = vlog2.f32 %v1661_v2  ;;  %v4999_v2 = vld [vmem:[%s5692_s3] sm:$0x7] }
 0x2ef   : > { %v1669_v7 = vadd.f32 %v1664_v4, %v1645_v5  ;;  %v5002_v5 = vld [vmem:[%s5693_s5] sm:$0x7] }
 0x2f3   : > { %v4297_v6 = vpop.eup %4296 }
 0x2f4   : > { %v4299_v8 = vpop.eup %4298  ;;  %v1662_v9 = vadd.f32 1.0, %v4297_v6  ;;  %v1787_v6 = vperm.slane %v4999_v2, 0 }
 0x2f5   : > { %v1666_v12 = vmul.f32 0.6931472, %v4299_v8 }
 0x2f6   : > { %4300 = vlog2.f32 %v1662_v9  ;;  %v1789_v9 = vperm.slane %v5002_v5, 0 }
 0x2f7   : > { %4302 = vtanh.f32 %v1669_v7  ;;  %v1670_v14 = vadd.f32 %v1666_v12, %v1646_v11 }
 0x2f9   : > { %4304 = vtanh.f32 %v1670_v14 }
 0x2fc   : > { %v4301_v16 = vpop.eup %4300 }
 0x2fd   : > { %v4303_v17 = vpop.eup %4302  ;;  %v1668_v18 = vmul.f32 0.6931472, %v4301_v16 }
 0x2fe   : > { %v1675_v21 = vmul.f32 %v4303_v17, %v1637_v39 }
 0x2ff   : > { %v4305_v19 = vpop.eup %4304  ;;  %v1671_v23 = vadd.f32 %v1668_v18, %v1647_v20 }
 0x300   : > { %v1676_v22 = vmul.f32 %v4305_v19, %v1639_v50 }
 0x301   : > { %4306 = vtanh.f32 %v1671_v23 }
 0x302   : > { %v1694_v24 = vpack.c.bf16 %v1676_v22, %v1675_v21  ;;  %4308 = vrcp.f32 %v4565_v41 }
 0x304   : > { %1716 = vmatmul.bf16.vlgmr.msrb.gmra.mxu3 %v1694_v24 }
 0x307   : > { %v4307_v25 = vpop.eup %4306 }
 0x308   : > { %v1677_v26 = vmul.f32 %v4307_v25, %v1642_v60  ;;  %v4309_v42 = vpop.eup %4308 }
 0x309   : > { %v1762_v43 = vmul.f32 32.0, %v4309_v42  ;;  %vm1766_vm8 = vweird.f32 %v4309_v42 }
 0x30a   : > { %v1695_v27 = vpack.c.bf16 %v1677_v26, %v1677_v26  ;;  %v1544_v26 = vlaneseq }
 0x30b   : > { %v1763_v44 = vsub.f32 1.0, %v1762_v43 }
 0x30c   : > { %v5023_v28 = vand.u32 127, %v1544_v26 }
 0x30d   : > { %v1764_v45 = vmul.f32 %v4309_v42, %v1763_v44 }
 0x30f   : > { %v1765_v46 = vadd.f32 %v4309_v42, %v1764_v45 }
 0x311   : > { %v4988_v47 = vsel %vm1766_vm8, %v4309_v42, %v1765_v46 }
 0x314   : > { %1721 = vmatmul.bf16.gmra.mxu3 %v1695_v27  ;;  %v5021_v27 = vshrl.u32 %v1544_v26, 7 }
 0x316   : > { %vm1548_vm13 = vcmp.gt.s32.totalorder %v5023_v28, %v5021_v27 }
 0x324   : > { %4037 = vmatmul.msk.bf16.vlgmr.msra.gmra.mxu3 %vm1734_vm7, %v1728_v29  ;;  %v4570_v29 = vmov 0.0  }
 0x387   : > { %v4976_v30 = vpop.f32.mrf.mxu3 }
 0x38f   : > { %v4978_v31 = vpop.f32.mrf.mxu3 }
 0x397   : > { %v4980_v32 = vpop.f32.mrf.mxu3 }
 0x39f   : > { %v1724_v33 = vpop.f32.mrf.mxu3 }
 0x3a0   : > { %v5028_v33 = vsel %vm1548_vm13, -1e+30, %v4570_v29 }
 0x3a7   : > { %v1750_v35 = vpop.f32.mrf.mxu3 }
 0x3a8   : > { %v1751_v37 = vadd.f32 %v4268_v34, %v1750_v35 }
 0x3aa   : > { %v4984_v38 = vadd.f32 %v1754_v36, %v1751_v37 }
 0x3ac   : > { %v1758_v39 = vsel %vm1369_vm1, %v4984_v38, 0.0 }
 0x3ad   : > { %1759 = vadd.xlane.f32.xlu0 %v1758_v39 }
 0x3af   : > { %v1752_v40 = vpop.f32.mrf.mxu3 }
 0x420   : > { %v1760_v48 = vpop.xlane.xlu0 %1759 }
 0x421   : > { %v1768_v49 = vmul.f32 %v4988_v47, %v1760_v48 }
 0x423   : > { %v1769_v50 = vsub.f32 %v4984_v38, %v1768_v49 }
 0x425   : > { %v1770_v51 = vmul.f32 %v1769_v50, %v1769_v50 }
 0x427   : > { %v1771_v52 = vsel %vm1369_vm1, %v1770_v51, 0.0 }
 0x428   : > { %1772 = vadd.xlane.f32.xlu0 %v1771_v52 }
 0x49b   : > { %v1773_v59 = vpop.xlane.xlu0 %1772 }
 0x49c   : > { %v1774_v60 = vmul.f32 %v1773_v59, %v4988_v47  ;;  %v2200_v59 = vld [vmem:[%s5696_s20 + $0x18] sm:$0xff] }
 0x49e   : > { %v1775_v61 = vadd.f32 1e-05, %v1774_v60 }
 0x4a0   : > { %4310 = vrsqrt.f32 %v1775_v61  ;;  %vm1782_vm10 = vweird.f32 %v1775_v61 }
 0x4a6   : > { %v4311_v62 = vpop.eup %4310 }
 0x4a7   : > { %v1777_v63 = vmul.f32 %v4311_v62, %v1775_v61  ;;  %vm1783_vm9 = vweird.f32 %v4311_v62 }
 0x4a8   : > { %vm1784_vm11 = vmor %vm1782_vm10, %vm1783_vm9 }
 0x4a9   : > { %v1778_v0 = vmul.f32 %v4311_v62, %v1777_v63  ;;  %v2204_v63 = vpack.c.bf16 %v2200_v59, %v2199_v58 }
 0x4ab   : > { %v1779_v1 = vmul.f32 0.5, %v1778_v0 }
 0x4ad   : > { %v1780_v3 = vsub.f32 1.5, %v1779_v1 }
 0x4af   : > { %v1781_v4 = vmul.f32 %v4311_v62, %v1780_v3  ;;  %v2197_v3 = vld [vmem:[%s5696_s20] sm:$0xff] }
 0x4b1   : > { %v1785_v7 = vsel %vm1784_vm11, %v4311_v62, %v1781_v4  ;;  %v2198_v4 = vld [vmem:[%s5696_s20 + $0x8] sm:$0xff] }
 0x4b2   : > { %v1786_v8 = vmul.f32 %v1785_v7, %v1769_v50 }
 0x4b4   : > { %v1788_v10 = vmul.f32 %v1787_v6, %v1786_v8  ;;  %v2203_v6 = vpack.c.bf16 %v2198_v4, %v2197_v3 }
 0x4b6   : > { %v1790_v11 = vadd.f32 %v1789_v9, %v1788_v10 }
 0x4b8   : > { %v1795_v12 = vpack.c.bf16 %v1790_v11, %v1790_v11 }
 0x4ba   : > { %4038 = vmatmul.msk.bf16.vlgmr.msra.gmra.mxu0 %vm1369_vm1, %v1795_v12 }
 0x537   : > { %v1814_v14 = vpop.f32.mrf.mxu0 }
 0x538   : > { %v1815_v15 = vadd.f32 %v4269_v13, %v1814_v14 }
 0x53a   : > { %v5008_v16 = vpack.c.bf16 %v1815_v15, %v1815_v15  ;;  %v1818_v18 = vmul.f32 0.35355338, %v1815_v15 }
 0x53c   : > { %1888 = vrot.lane.b32.xlu0 %v5008_v16, %s5582_s8  ;;  %1827 = vrot.lane.b32.xlu1 %v5008_v16, %s5586_s9  ;;  %v1824_v19 = vpack.c.bf16 %v1818_v18, %v1818_v18  ;;  %s5589_s8 = smov 64   ;;  %s5590_s9 = smov 72  }
 0x53f   : > { %v1816_v17 = vpop.f32.mrf.mxu0 }
 0x544   : > { %1984 = vrot.lane.b32.xlu0 %v5008_v16, %s5580_s12  ;;  %s5695_s12 = sld [smem:[#allocation33_spill]] }
 0x54a   : > { %v1819_v44 = vld [vmem:[%s5695_s12] sm:$0xff] }
 0x54b   : > { %v1884_v45 = vpack.c.bf16 %v1819_v44, %v1819_v44 }
 0x54c   : > { %1982 = vrot.lane.b32.xlu0 %v1824_v19, %s5584_s13  ;;  %s5597_s13 = smov 120  }
 0x54d   : > { %v1967_v46 = vsel %vm1866_vm14, %v1884_v45, 0 }
 0x54e   : > { %1976 = vmatpush.bf16.msrb.mxu3 %v1967_v46 }
 0x5ae   : > { %v1889_v20 = vpop.permute.xlu0 %1888  ;;  %v1828_v21 = vpop.permute.xlu1 %1827 }
 0x5af   : > { %v1894_v22 = vsel %vm1829_vm12, %v1889_v20, 0  ;;  %v1834_v23 = vsel %vm1829_vm12, %v1828_v21, 0 }
 0x5b0   : > { %1843 = vmatpush.bf16.xpose.msrb.mxu1 %v1834_v23  ;;  %1903 = vmatpush.bf16.xpose.msrb.mxu0 %v1894_v22 }
 0x5b6   : > { %v1985_v24 = vpop.permute.xlu0 %1984 }
 0x5b7   : > { %v1990_v25 = vsel %vm1829_vm12, %v1985_v24, 0  ;;  %4039 = vmatmul.msk.bf16.vlgmr.msrb.gmra.mxu1 %vm1829_vm12, %v1824_v19 }
 0x5b8   : > { %1999 = vmatpush.bf16.xpose.msra.mxu0 %v1990_v25 }
 0x5be   : > { %v1983_v57 = vpop.permute.xlu0 %1982 }
 0x634   : > { %v1845_v34 = vpop.f32.mrf.mxu1 }
 0x635   : > { %v1846_v35 = vadd.f32 %v1845_v34, %v5028_v33 }
 0x637   : > { %v1849_v36 = vsel %vm1829_vm12, %v1846_v35, -inf }
 0x638   : > { %1850 = vmax.xlane.f32.xlu1 %v1849_v36 }
 0x63c   : > { %v1847_v37 = vpop.f32.mrf.mxu1 }
 0x6ab   : > { %v1851_v39 = vpop.xlane.xlu1 %1850 }
 0x6ac   : > { %v1852_v40 = vsub.f32 %v1846_v35, %v1851_v39 }
 0x6ae   : > { %v1853_v41 = vmul.f32 1.442695, %v1852_v40 }
 0x6b0   : > { %4312 = vpow2.f32 %v1853_v41 }
 0x6b6   : > { %v4313_v42 = vpop.eup %4312 }
 0x6b7   : > { %v1855_v43 = vsel %vm1829_vm12, %v4313_v42, 0.0 }
 0x6b8   : > { %1856 = vadd.xlane.f32.xlu2 %v1855_v43 }
 0x6d0   : > { %1861 = vrot.lane.b32.xlu2 %v5008_v16, %s5589_s8  ;;  %s5697_s8 = sld [smem:[#allocation28_spill]] }
 0x6d6   : > { %v4267_v14 = vld [vmem:[%s5697_s8] ss:$0 sm:$0xff]  ;;  %s5698_s8 = sld [smem:[#allocation38_spill]] }
 0x6d7   : > { %v1720_v15 = vadd.f32 %v4267_v14, %v4978_v31  ;;  %v1718_v17 = vadd.f32 %v4267_v14, %v4976_v30 }
 0x6d8   : > { %1886 = vrot.lane.b32.xlu2 %v1824_v19, %s5597_s13  ;;  %s5701_s13 = smov 96  }
 0x6d9   : > { %v5059_v18 = vpack.c.bf16 %v1720_v15, %v1718_v17 }
 0x6dc   : > { %v4270_v37 = vld [vmem:[%s5698_s8] ss:$0 sm:$0xff] }
 0x6e0   : > { %2062 = vrot.lane.b32.xlu2 %v5008_v16, %s5590_s9  ;;  %s5592_s9 = smov 48  }
 0x6e8   : > { %2060 = vrot.lane.b32.xlu2 %v1824_v19, %s5595_s14  ;;  %v1723_v19 = vadd.f32 %v4267_v14, %v4980_v32  ;;  %s5700_s14 = sld [smem:[#allocation35_spill]] }
 0x6ea   : > { %v5066_v20 = vpack.c.bf16 %v1723_v19, %v1723_v19 }
 0x72b   : > { %v1857_v48 = vpop.xlane.xlu2 %1856 }
 0x72c   : > { %4314 = vrcp.f32 %v1857_v48 }
 0x732   : > { %v4315_v49 = vpop.eup %4314 }
 0x733   : > { %v1859_v50 = vmul.f32 %v4315_v49, %v4313_v42  ;;  %v1862_v51 = vpop.permute.xlu2 %1861 }
 0x734   : > { %v1868_v52 = vsel %vm1866_vm14, %v1862_v51, 0 }
 0x735   : > { %v1860_v53 = vpack.c.bf16 %v1859_v50, %v1859_v50  ;;  %1877 = vmatpush.bf16.msra.mxu2 %v1868_v52 }
 0x738   : > { %4040 = vmatmul.msk.bf16.vlgmr.msra.gmra.mxu2 %vm1829_vm12, %v1860_v53 }
 0x73b   : > { %v1887_v54 = vpop.permute.xlu2 %1886 }
 0x73c   : > { %4041 = vmatmul.msk.bf16.vlgmr.msrb.gmra.mxu0 %vm1829_vm12, %v1887_v54 }
 0x743   : > { %v2063_v55 = vpop.permute.xlu2 %2062 }
 0x744   : > { %v2068_v56 = vsel %vm1829_vm12, %v2063_v55, 0 }
 0x745   : > { %2077 = vmatpush.bf16.xpose.msra.mxu3 %v2068_v56 }
 0x74b   : > { %v2061_v12 = vpop.permute.xlu2 %2060 }
 0x74c   : > { %4045 = vmatmul.msk.bf16.vlgmr.msra.gmra.mxu0 %vm1829_vm12, %v1983_v57 }
 0x7b9   : > { %v1905_v60 = vpop.f32.mrf.mxu0 }
 0x7ba   : > { %v1906_v61 = vadd.f32 %v1905_v60, %v5028_v33 }
 0x7bb   : > { %v1879_v62 = vpop.f32.mrf.mxu2 }
 0x7bc   : > { %v1883_v0 = vpack.c.bf16 %v1879_v62, %v1879_v62  ;;  %v1909_v1 = vsel %vm1829_vm12, %v1906_v61, -inf }
 0x7bd   : > { %1910 = vmax.xlane.f32.xlu1 %v1909_v1 }
 0x7be   : > { %4044 = vmatmul.msk.bf16.vlgmr.msrb.gmra.mxu3 %vm1829_vm12, %v1883_v0 }
 0x7bf   : > { %2221 = vmatpush.bf16.msrb.mxu3 %v2204_v63 }
 0x7c1   : > { %v1907_v7 = vpop.f32.mrf.mxu0 }
 0x7c3   : > { %v1881_v8 = vpop.f32.mrf.mxu2  ;;  %2222 = vmatpush.bf16.msrb.mxu3 %v2203_v6  ;;  %v1820_v6 = vld [vmem:[%s5695_s12 + $0x8] sm:$0xff] }
 0x7c4   : > { %v1943_v7 = vpack.c.bf16 %v1820_v6, %v1820_v6 }
 0x7c6   : > { %v1948_v8 = vsel %vm1866_vm14, %v1943_v7, 0 }
 0x7c7   : > { %1957 = vmatpush.bf16.msrb.mxu2 %v1948_v8 }
 0x7c9   : > { %v2001_v9 = vpop.f32.mrf.mxu0 }
 0x7ca   : > { %v2002_v10 = vadd.f32 %v2001_v9, %v5028_v33 }
 0x7cc   : > { %v2005_v11 = vsel %vm1829_vm12, %v2002_v10, -inf }
 0x7cd   : > { %2006 = vmax.xlane.f32.xlu0 %v2005_v11 }
 0x7ce   : > { %4048 = vmatmul.msk.bf16.vlgmr.msra.gmra.mxu3 %vm1829_vm12, %v2061_v12 }
 0x7d1   : > { %v2003_v13 = vpop.f32.mrf.mxu0 }
 0x7de   : > { %4052 = vmatmul.msk.bf16.vlgmr.msrb.gmra.mxu3 %vm1369_vm1, %v5059_v18 }
 0x7e1   : > { %2017 = vrot.lane.b32.xlu0 %v5008_v16, %s5592_s9  ;;  %s5593_s9 = smov 56  }
 0x7ee   : > { %4053 = vmatmul.msk.bf16.gmra.mxu3 %vm1369_vm1, %v5066_v20 }
 0x830   : > { %v1911_v21 = vpop.xlane.xlu1 %1910 }
 0x831   : > { %v1912_v31 = vsub.f32 %v1906_v61, %v1911_v21 }
 0x833   : > { %v1913_v30 = vmul.f32 1.442695, %v1912_v31 }
 0x835   : > { %4316 = vpow2.f32 %v1913_v30  ;;  %v1821_v30 = vld [vmem:[%s5695_s12 + $0x10] sm:$0xff] }
 0x83b   : > { %v4317_v22 = vpop.eup %4316 }
 0x83c   : > { %v1915_v23 = vsel %vm1829_vm12, %v4317_v22, 0.0 }
 0x83d   : > { %1916 = vadd.xlane.f32.xlu1 %v1915_v23 }
 0x840   : > { %v2007_v42 = vpop.xlane.xlu0 %2006 }
 0x841   : > { %v5071_v24 = vpop.f32.mrf.mxu3  ;;  %v2008_v44 = vsub.f32 %v2002_v10, %v2007_v42 }
 0x843   : > { %v2009_v46 = vmul.f32 1.442695, %v2008_v44 }
 0x845   : > { %4318 = vpow2.f32 %v2009_v46 }
 0x849   : > { %v1980_v25 = vpop.f32.mrf.mxu3 }
 0x84b   : > { %v4319_v49 = vpop.eup %4318 }
 0x84c   : > { %v2011_v50 = vsel %vm1829_vm12, %v4319_v49, 0.0 }
 0x851   : > { %v2079_v26 = vpop.f32.mrf.mxu3 }
 0x852   : > { %v2080_v32 = vadd.f32 %v2079_v26, %v5028_v33 }
 0x853   : > { %v2018_v53 = vpop.permute.xlu0 %2017 }
 0x854   : > { %v2083_v34 = vsel %vm1829_vm12, %v2080_v32, -inf  ;;  %v2023_v59 = vsel %vm1866_vm14, %v2018_v53, 0 }
 0x855   : > { %2084 = vmax.xlane.f32.xlu2 %v2083_v34 }
 0x856   : > { %1921 = vrot.lane.b32.xlu1 %v5008_v16, %s5593_s9  ;;  %s5594_s9 = smov 40  }
 0x859   : > { %v2081_v35 = vpop.f32.mrf.mxu3 }
 0x85a   : > { %v1822_v35 = vld [vmem:[%s5695_s12 + $0x18] sm:$0xff] }
 0x861   : > { %v2224_v36 = vpop.f32.mrf.mxu3 }
 0x862   : > { %v2225_v40 = vadd.f32 %v4270_v37, %v2224_v36  ;;  %v2117_v36 = vpack.c.bf16 %v1822_v35, %v1822_v35 }
 0x869   : > { %v2226_v39 = vpop.f32.mrf.mxu3 }
 0x86a   : > { %v2227_v41 = vadd.f32 %v4270_v37, %v2226_v39 }
 0x86c   : > { %v5078_v43 = vpack.c.bf16 %v2227_v41, %v2225_v40 }
 0x86e   : > { %v2245_v23 = vsel %vm1829_vm12, %v5078_v43, 0 }
 0x871   : > { %v2229_v45 = vpop.f32.mrf.mxu3 }
 0x872   : > { %v2230_v10 = vadd.f32 %v4270_v37, %v2229_v45  ;;  %v2122_v37 = vsel %vm1866_vm14, %v2117_v36, 0 }
 0x879   : > { %v2231_v48 = vpop.f32.mrf.mxu3 }
 0x880   : > { %2012 = vadd.xlane.f32.xlu1 %v2011_v50 }
 0x8b0   : > { %v1917_v51 = vpop.xlane.xlu1 %1916 }
 0x8b1   : > { %4320 = vrcp.f32 %v1917_v51 }
 0x8b7   : > { %v4321_v52 = vpop.eup %4320 }
 0x8b8   : > { %v1919_v54 = vmul.f32 %v4321_v52, %v4317_v22  ;;  %v2039_v22 = vpack.c.bf16 %v1821_v30, %v1821_v30 }
 0x8ba   : > { %v1920_v60 = vpack.c.bf16 %v1919_v54, %v1919_v54  ;;  %v2044_v25 = vsel %vm1866_vm14, %v2039_v22, 0 }
 0x8bb   : > { %2053 = vmatpush.bf16.msra.mxu2 %v2044_v25 }
 0x8c8   : > { %v1922_v55 = vpop.permute.xlu1 %1921  ;;  %v2085_v56 = vpop.xlane.xlu2 %2084 }
 0x8c9   : > { %v1927_v57 = vsel %vm1866_vm14, %v1922_v55, 0  ;;  %v2086_v58 = vsub.f32 %v2080_v32, %v2085_v56 }
 0x8ca   : > { %1936 = vmatpush.bf16.msra.mxu1 %v1927_v57 }
 0x8cb   : > { %v2087_v61 = vmul.f32 1.442695, %v2086_v58 }
 0x8cd   : > { %4322 = vpow2.f32 %v2087_v61  ;;  %4042 = vmatmul.msk.bf16.vlgmr.msra.gmra.mxu1 %vm1829_vm12, %v1920_v60  ;;  %v2172_v61 = vld [vmem:[%s5700_s14 + $0x18] sm:$0xff] }
 0x8ce   : > { %2032 = vmatpush.bf16.msrb.mxu1 %v2023_v59 }
 0x8d2   : > { %2131 = vmatpush.bf16.msra.mxu1 %v2122_v37 }
 0x8d3   : > { %v4323_v62 = vpop.eup %4322 }
 0x8d4   : > { %v2089_v63 = vsel %vm1829_vm12, %v4323_v62, 0.0 }
 0x8d5   : > { %2090 = vadd.xlane.f32.xlu2 %v2089_v63  ;;  %v2169_v63 = vld [vmem:[%s5700_s14] sm:$0xff] }
 0x8ed   : > { %2095 = vrot.lane.b32.xlu2 %v5008_v16, %s5594_s9  ;;  %v5091_v16 = vpack.c.bf16 %v2230_v10, %v2230_v10  ;;  %s5699_s9 = sld [smem:[#allocation34_spill]] }
 0x8ef   : > { %v2248_v31 = vsel %vm1829_vm12, %v5091_v16, 0 }
 0x8f3   : > { %v2013_v0 = vpop.xlane.xlu1 %2012  ;;  %v4271_v50 = vld [vmem:[%s5699_s9] ss:$0 sm:$0xff] }
 0x8f4   : > { %4324 = vrcp.f32 %v2013_v0  ;;  %v2170_v0 = vld [vmem:[%s5700_s14 + $0x8] sm:$0xff] }
 0x8fa   : > { %v4325_v1 = vpop.eup %4324 }
 0x8fb   : > { %v2015_v3 = vmul.f32 %v4325_v1, %v4319_v49  ;;  %v2174_v1 = vpack.c.bf16 %v2170_v0, %v2169_v63 }
 0x8fd   : > { %v2016_v4 = vpack.c.bf16 %v2015_v3, %v2015_v3 }
 0x8ff   : > { %4046 = vmatmul.msk.bf16.vlgmr.msrb.gmra.mxu1 %vm1829_vm12, %v2016_v4 }
 0x948   : > { %v2091_v9 = vpop.xlane.xlu2 %2090 }
 0x949   : > { %4326 = vrcp.f32 %v2091_v9 }
 0x94a   : > { %v1938_v11 = vpop.f32.mrf.mxu1 }
 0x94b   : > { %v1942_v12 = vpack.c.bf16 %v1938_v11, %v1938_v11 }
 0x94d   : > { %4043 = vmatmul.msk.bf16.vlgmr.msrb.gmra.mxu2 %vm1829_vm12, %v1942_v12 }
 0x94f   : > { %v4327_v13 = vpop.eup %4326 }
 0x950   : > { %v2093_v14 = vmul.f32 %v4327_v13, %v4323_v62  ;;  %v2096_v15 = vpop.permute.xlu2 %2095 }
 0x951   : > { %v2101_v17 = vsel %vm1866_vm14, %v2096_v15, 0  ;;  %v2165_v15 = vperm.slane %v4999_v2, 1 }
 0x952   : > { %v2094_v19 = vpack.c.bf16 %v2093_v14, %v2093_v14  ;;  %v1940_v21 = vpop.f32.mrf.mxu1  ;;  %2110 = vmatpush.bf16.msrb.mxu0 %v2101_v17 }
 0x953   : > { %v2167_v21 = vperm.slane %v5002_v5, 1 }
 0x955   : > { %4049 = vmatmul.msk.bf16.vlgmr.msrb.gmra.mxu0 %vm1829_vm12, %v2094_v19 }
 0x956   : > { %2256 = vmatpush.bf16.xpose.msra.mxu0 %v2248_v31 }
 0x95e   : > { %2257 = vmatpush.bf16.xpose.msra.mxu0 %v2245_v23  ;;  %v4272_v23 = vld [vmem:[%s5703_s25] ss:$0 sm:$0xff] }
 0x97c   : > { %v2034_v26 = vpop.f32.mrf.mxu1 }
 0x97d   : > { %v2038_v32 = vpack.c.bf16 %v2034_v26, %v2034_v26 }
 0x97f   : > { %4047 = vmatmul.msk.bf16.vlgmr.msra.gmra.mxu2 %vm1829_vm12, %v2038_v32 }
 0x984   : > { %v2036_v34 = vpop.f32.mrf.mxu1 }
 0x9d0   : > { %v1959_v39 = vpop.f32.mrf.mxu2 }
 0x9d1   : > { %v1979_v45 = vadd.f32 %v5071_v24, %v1959_v39  ;;  %v1550_v39 = vadd.s32 1, %v5021_v27 }
 0x9d2   : > { %v2112_v40 = vpop.f32.mrf.mxu0 }
 0x9d3   : > { %v2116_v41 = vpack.c.bf16 %v2112_v40, %v2112_v40  ;;  %vm1551_vm3 = vcmp.gt.s32.totalorder %v5023_v28, %v1550_v39 }
 0x9d5   : > { %4050 = vmatmul.msk.bf16.vlgmr.msra.gmra.mxu1 %vm1829_vm12, %v2116_v41 }
 0x9d8   : > { %v1961_v42 = vpop.f32.mrf.mxu2 }
 0x9d9   : > { %v5140_v42 = vsel %vm1551_vm3, -1e+30, %v4570_v29 }
 0x9da   : > { %v2114_v44 = vpop.f32.mrf.mxu0 }
 0xa02   : > { %v2055_v46 = vpop.f32.mrf.mxu2 }
 0xa03   : > { %v2059_v48 = vadd.f32 %v2055_v46, %v1979_v45 }
 0xa0a   : > { %v2057_v49 = vpop.f32.mrf.mxu2 }
 0xa52   : > { %v2133_v51 = vpop.f32.mrf.mxu1 }
 0xa53   : > { %v2137_v52 = vadd.f32 %v2133_v51, %v2059_v48 }
 0xa55   : > { %v2141_v53 = vadd.f32 %v4271_v50, %v2137_v52 }
 0xa57   : > { %v5108_v54 = vadd.f32 %v2141_v53, %v4984_v38  ;;  %v2171_v38 = vld [vmem:[%s5700_s14 + $0x10] sm:$0xff] }
 0xa58   : > { %v2175_v62 = vpack.c.bf16 %v2172_v61, %v2171_v38 }
 0xa59   : > { %v2143_v55 = vsel %vm1369_vm1, %v5108_v54, 0.0 }
 0xa5a   : > { %2144 = vadd.xlane.f32.xlu0 %v2143_v55  ;;  %v2135_v56 = vpop.f32.mrf.mxu1  ;;  %2189 = vmatpush.bf16.msrb.mxu2 %v2175_v62 }
 0xa5e   : > { %2190 = vmatpush.bf16.msrb.mxu2 %v2174_v1 }
 0xa6e   : > { %2278 = vrot.lane.b32.xlu0 %v5078_v43, %s5701_s13 }
 0xacd   : > { %v2145_v24 = vpop.xlane.xlu0 %2144 }
 0xace   : > { %v2146_v57 = vmul.f32 %v2145_v24, %v4988_v47 }
 0xad0   : > { %v2147_v58 = vsub.f32 %v5108_v54, %v2146_v57  ;;  %v2233_v57 = vld [vmem:[%s5706_s30] sm:$0xff] }
 0xad2   : > { %v2148_v59 = vmul.f32 %v2147_v58, %v2147_v58 }
 0xad4   : > { %v2149_v60 = vsel %vm1369_vm1, %v2148_v59, 0.0  ;;  %v2303_v59 = vpack.c.bf16 %v2233_v57, %v2233_v57 }
 0xad5   : > { %2150 = vadd.xlane.f32.xlu2 %v2149_v60 }
 0xad6   : > { %v2394_v61 = vsel %vm1866_vm14, %v2303_v59, 0 }
 0xae0   : > { %v2279_v36 = vpop.permute.xlu0 %2278 }
 0xaed   : > { %2309 = vrot.lane.b32.xlu2 %v5091_v16, %s5702_s21 }
 0xb48   : > { %v2151_v3 = vpop.xlane.xlu2 %2150 }
 0xb49   : > { %v2152_v4 = vmul.f32 %v2151_v3, %v4988_v47 }
 0xb4b   : > { %v2153_v6 = vadd.f32 1e-05, %v2152_v4 }
 0xb4d   : > { %4328 = vrsqrt.f32 %v2153_v6  ;;  %vm2160_vm0 = vweird.f32 %v2153_v6 }
 0xb50   : > { %v2310_v7 = vpop.permute.xlu2 %2309 }
 0xb51   : > { %v2318_v8 = vsel %vm1829_vm12, %v2310_v7, 0 }
 0xb52   : > { %2326 = vmatpush.bf16.xpose.msra.mxu2 %v2318_v8 }
 0xb53   : > { %v4329_v9 = vpop.eup %4328 }
 0xb54   : > { %v2155_v10 = vmul.f32 %v4329_v9, %v2153_v6  ;;  %vm2161_vm15 = vweird.f32 %v4329_v9 }
 0xb55   : > { %vm2162_vm2 = vmor %vm2160_vm0, %vm2161_vm15 }
 0xb56   : > { %v2156_v11 = vmul.f32 %v4329_v9, %v2155_v10 }
 0xb58   : > { %v2157_v12 = vmul.f32 0.5, %v2156_v11 }
 0xb5a   : > { %v2158_v13 = vsub.f32 1.5, %v2157_v12 }
 0xb5c   : > { %v2159_v14 = vmul.f32 %v4329_v9, %v2158_v13 }
 0xb5e   : > { %v2163_v17 = vsel %vm2162_vm2, %v4329_v9, %v2159_v14 }
 0xb5f   : > { %v2164_v19 = vmul.f32 %v2163_v17, %v2147_v58 }
 0xb61   : > { %v2166_v31 = vmul.f32 %v2165_v15, %v2164_v19 }
 0xb63   : > { %v2168_v30 = vadd.f32 %v2167_v21, %v2166_v31 }
 0xb65   : > { %v2173_v22 = vpack.c.bf16 %v2168_v30, %v2168_v30 }
 0xb67   : > { %4051 = vmatmul.msk.bf16.vlgmr.msrb.gmra.mxu2 %vm1369_vm1, %v2173_v22 }
 0xbea   : > { %v2192_v25 = vpop.f32.mrf.mxu2 }
 0xbeb   : > { %v2193_v26 = vadd.f32 %v4272_v23, %v2192_v25 }
 0xbed   : > { %v2196_v32 = vmul.f32 0.35355338, %v2193_v26 }
 0xbef   : > { %v2238_v34 = vpack.c.bf16 %v2196_v32, %v2196_v32 }
 0xbf1   : > { %2495 = vrot.lane.b32.xlu2 %v2238_v34, %s5704_s27  ;;  %2305 = vrot.lane.b32.xlu0 %v2238_v34, %s5702_s21 }
 0xbf2   : > { %4054 = vmatmul.msk.bf16.vlgmr.msra.gmra.mxu0 %vm1829_vm12, %v2238_v34  ;;  %v2194_v35 = vpop.f32.mrf.mxu2 }
 0xbf9   : > { %2413 = vrot.lane.b32.xlu0 %v5091_v16, %s5705_s29 }
 0xc01   : > { %2411 = vrot.lane.b32.xlu0 %v5078_v43, %s5705_s29 }
 0xc4b   : > { %v2496_v12 = vpop.permute.xlu2 %2495 }
 0xc63   : > { %v2306_v37 = vpop.permute.xlu0 %2305 }
 0xc6b   : > { %v2414_v40 = vpop.permute.xlu0 %2413 }
 0xc6c   : > { %v2422_v41 = vsel %vm1829_vm12, %v2414_v40, 0 }
 0xc6d   : > { %2430 = vmatpush.bf16.xpose.msra.mxu3 %v2422_v41 }
 0xc6f   : > { %v2259_v44 = vpop.f32.mrf.mxu0 }
 0xc70   : > { %v2260_v45 = vadd.f32 %v2259_v44, %v5140_v42 }
 0xc72   : > { %v2264_v46 = vsel %vm2263_vm4, %v2260_v45, -inf }
 0xc73   : > { %2265 = vmax.xlane.f32.xlu1 %v2264_v46  ;;  %v2412_v48 = vpop.permute.xlu0 %2411 }
 0xc74   : > { %v2419_v49 = vsel %vm1829_vm12, %v2412_v48, 0 }
 0xc75   : > { %2431 = vmatpush.bf16.xpose.msra.mxu3 %v2419_v49 }
 0xc77   : > { %v2261_v27 = vpop.f32.mrf.mxu0 }
 0xce6   : > { %v2266_v28 = vpop.xlane.xlu1 %2265 }
 0xce7   : > { %v2267_v50 = vsub.f32 %v2260_v45, %v2266_v28 }
 0xce9   : > { %v2268_v51 = vmul.f32 1.442695, %v2267_v50 }
 0xceb   : > { %4330 = vpow2.f32 %v2268_v51 }
 0xcf1   : > { %v4331_v52 = vpop.eup %4330 }
 0xcf2   : > { %v2270_v29 = vsel %vm2263_vm4, %v4331_v52, 0.0 }
 0xcf3   : > { %2271 = vadd.xlane.f32.xlu1 %v2270_v29 }
 0xd0c   : > { %2280 = vrot.lane.b32.xlu1 %v5091_v16, %s5701_s13 }
 0xd14   : > { %2307 = vrot.lane.b32.xlu1 %v5078_v43, %s5702_s21 }
 0xd1c   : > { %2499 = vrot.lane.b32.xlu1 %v5091_v16, %s5704_s27 }
 0xd24   : > { %2497 = vrot.lane.b32.xlu1 %v5078_v43, %s5704_s27 }
 0xd2c   : > { %2409 = vrot.lane.b32.xlu1 %v2238_v34, %s5705_s29 }
 0xd66   : > { %v2272_v53 = vpop.xlane.xlu1 %2271 }
 0xd67   : > { %4332 = vrcp.f32 %v2272_v53 }
 0xd6d   : > { %v4333_v55 = vpop.eup %4332 }
 0xd6e   : > { %v2274_v58 = vmul.f32 %v4333_v55, %v4331_v52 }
 0xd70   : > { %v2275_v60 = vpack.c.bf16 %v2274_v58, %v2274_v58 }
 0xd7e   : > { %v2281_v56 = vpop.permute.xlu1 %2280 }
 0xd7f   : > { %v2287_v24 = vsel %vm1593_vm6, %v2281_v56, 0 }
 0xd80   : > { %2295 = vmatpush.bf16.msrb.mxu1 %v2287_v24 }
 0xd84   : > { %2296 = vmatpush.bf16.msrb.mxu1 %v2279_v36 }
 0xd86   : > { %v2308_v38 = vpop.permute.xlu1 %2307 }
 0xd87   : > { %v2315_v62 = vsel %vm1829_vm12, %v2308_v38, 0  ;;  %4055 = vmatmul.msk.bf16.vlgmr.msrb.gmra.mxu1 %vm2263_vm4, %v2275_v60  ;;  %v2234_v38 = vld [vmem:[%s5706_s30 + $0x8] sm:$0xff] }
 0xd88   : > { %2327 = vmatpush.bf16.xpose.msra.mxu2 %v2315_v62 }
 0xd8e   : > { %v2500_v63 = vpop.permute.xlu1 %2499 }
 0xd8f   : > { %v2508_v0 = vsel %vm1829_vm12, %v2500_v63, 0  ;;  %4056 = vmatmul.msk.bf16.vlgmr.msra.gmra.mxu2 %vm1829_vm12, %v2306_v37  ;;  %v2235_v63 = vld [vmem:[%s5706_s30 + $0x10] sm:$0xff] }
 0xd90   : > { %2403 = vmatpush.bf16.msrb.mxu2 %v2394_v61  ;;  %v2370_v61 = vpack.c.bf16 %v2234_v38, %v2234_v38 }
 0xd92   : > { %v2375_v62 = vsel %vm1866_vm14, %v2370_v61, 0  ;;  %v2608_v61 = vperm.slane %v4999_v2, 2  ;;  %v2691_v2 = vld [vmem:[%s5713_s17 + $0x60] sm:$0xff] }
 0xd93   : > { %2384 = vmatpush.bf16.msra.mxu1 %v2375_v62 }
 0xd94   : > { %2516 = vmatpush.bf16.xpose.msra.mxu2 %v2508_v0  ;;  %v2474_v0 = vpack.c.bf16 %v2235_v63, %v2235_v63 }
 0xd96   : > { %v2498_v1 = vpop.permute.xlu1 %2497 }
 0xd97   : > { %v2505_v3 = vsel %vm1829_vm12, %v2498_v1, 0  ;;  %v2479_v1 = vsel %vm1866_vm14, %v2474_v0, 0  ;;  %v2610_v0 = vperm.slane %v5002_v5, 2 }
 0xd98   : > { %2488 = vmatpush.bf16.msrb.mxu1 %v2479_v1 }
 0xd9c   : > { %2517 = vmatpush.bf16.xpose.msra.mxu2 %v2505_v3 }
 0xd9e   : > { %v2410_v4 = vpop.permute.xlu1 %2409 }
 0xd9f   : > { %4060 = vmatmul.msk.bf16.vlgmr.msra.gmra.mxu3 %vm1829_vm12, %v2410_v4 }
 0xe04   : > { %v2298_v6 = vpop.f32.mrf.mxu1 }
 0xe05   : > { %v2302_v7 = vpack.c.bf16 %v2298_v6, %v2298_v6 }
 0xe07   : > { %4059 = vmatmul.msk.bf16.vlgmr.msrb.gmra.mxu2 %vm1829_vm12, %v2302_v7 }
 0xe0c   : > { %v2300_v8 = vpop.f32.mrf.mxu1 }
 0xe12   : > { %v2329_v9 = vpop.f32.mrf.mxu2 }
 0xe13   : > { %v2330_v10 = vadd.f32 %v2329_v9, %v5140_v42 }
 0xe15   : > { %v2333_v11 = vsel %vm2263_vm4, %v2330_v10, -inf }
 0xe16   : > { %2334 = vmax.xlane.f32.xlu0 %v2333_v11 }
 0xe17   : > { %4063 = vmatmul.msk.bf16.vlgmr.msra.gmra.mxu2 %vm1829_vm12, %v2496_v12 }
 0xe1a   : > { %v2331_v13 = vpop.f32.mrf.mxu2 }
 0xe22   : > { %v2433_v14 = vpop.f32.mrf.mxu3 }
 0xe23   : > { %v2434_v15 = vadd.f32 %v2433_v14, %v5140_v42 }
 0xe25   : > { %v2437_v17 = vsel %vm2263_vm4, %v2434_v15, -inf }
 0xe26   : > { %2438 = vmax.xlane.f32.xlu1 %v2437_v17  ;;  %v2236_v17 = vld [vmem:[%s5706_s30 + $0x18] sm:$0xff] }
 0xe2a   : > { %v2435_v19 = vpop.f32.mrf.mxu3 }
 0xe2b   : > { %v2560_v19 = vpack.c.bf16 %v2236_v17, %v2236_v17 }
 0xe3f   : > { %2345 = vrot.lane.b32.xlu1 %v5078_v43, %s5707_s11 }
 0xe47   : > { %2535 = vrot.lane.b32.xlu1 %v5078_v43, %s5708_s26 }
 0xe89   : > { %v2335_v21 = vpop.xlane.xlu0 %2334 }
 0xe8a   : > { %v2336_v31 = vsub.f32 %v2330_v10, %v2335_v21  ;;  %v5174_v30 = vpop.f32.mrf.mxu2  ;;  %v2565_v21 = vsel %vm1866_vm14, %v2560_v19, 0  ;;  %v2687_v19 = vld [vmem:[%s5713_s17 + $0x40] sm:$0xff] }
 0xe8c   : > { %v2337_v22 = vmul.f32 1.442695, %v2336_v31 }
 0xe8e   : > { %4334 = vpow2.f32 %v2337_v22 }
 0xe92   : > { %v2407_v23 = vpop.f32.mrf.mxu2 }
 0xe94   : > { %v4335_v25 = vpop.eup %4334 }
 0xe95   : > { %v2339_v26 = vsel %vm2263_vm4, %v4335_v25, 0.0 }
 0xe96   : > { %2340 = vadd.xlane.f32.xlu0 %v2339_v26 }
 0xe99   : > { %v2439_v32 = vpop.xlane.xlu1 %2438 }
 0xe9a   : > { %v2440_v34 = vsub.f32 %v2434_v15, %v2439_v32  ;;  %v2519_v35 = vpop.f32.mrf.mxu2 }
 0xe9b   : > { %v2520_v36 = vadd.f32 %v2519_v35, %v5140_v42 }
 0xe9c   : > { %v2441_v37 = vmul.f32 1.442695, %v2440_v34 }
 0xe9d   : > { %v2523_v39 = vsel %vm2263_vm4, %v2520_v36, -inf }
 0xe9e   : > { %4336 = vpow2.f32 %v2441_v37  ;;  %2524 = vmax.xlane.f32.xlu2 %v2523_v39  ;;  %v4273_v37 = vld [vmem:[%s5710_s2] ss:$0 sm:$0xff] }
 0xea2   : > { %v2521_v40 = vpop.f32.mrf.mxu2 }
 0xea4   : > { %v4337_v41 = vpop.eup %4336 }
 0xea5   : > { %v2443_v44 = vsel %vm2263_vm4, %v4337_v41, 0.0 }
 0xea6   : > { %2444 = vadd.xlane.f32.xlu0 %v2443_v44 }
 0xeb1   : > { %v2346_v53 = vpop.permute.xlu1 %2345 }
 0xeb6   : > { %2347 = vrot.lane.b32.xlu2 %v5091_v16, %s5707_s11 }
 0xeb9   : > { %v2536_v11 = vpop.permute.xlu1 %2535 }
 0xebe   : > { %2451 = vrot.lane.b32.xlu2 %v5091_v16, %s5709_s23 }
 0xec6   : > { %2449 = vrot.lane.b32.xlu2 %v5078_v43, %s5709_s23 }
 0xf09   : > { %v2341_v45 = vpop.xlane.xlu0 %2340 }
 0xf0a   : > { %4338 = vrcp.f32 %v2341_v45 }
 0xf10   : > { %v4339_v27 = vpop.eup %4338 }
 0xf11   : > { %v2525_v46 = vpop.xlane.xlu2 %2524  ;;  %v2343_v52 = vmul.f32 %v4339_v27, %v4335_v25 }
 0xf12   : > { %v2526_v48 = vsub.f32 %v2520_v36, %v2525_v46 }
 0xf13   : > { %v2344_v43 = vpack.c.bf16 %v2343_v52, %v2343_v52 }
 0xf14   : > { %v2527_v49 = vmul.f32 1.442695, %v2526_v48 }
 0xf16   : > { %4340 = vpow2.f32 %v2527_v49 }
 0xf19   : > { %v2348_v28 = vpop.permute.xlu2 %2347  ;;  %v2445_v55 = vpop.xlane.xlu0 %2444 }
 0xf1a   : > { %v2354_v50 = vsel %vm1593_vm6, %v2348_v28, 0  ;;  %4342 = vrcp.f32 %v2445_v55 }
 0xf1b   : > { %2362 = vmatpush.bf16.msrb.mxu0 %v2354_v50  ;;  %v2614_v50 = vld [vmem:[%s5711_s16 + $0x10] sm:$0xff] }
 0xf1c   : > { %v4341_v51 = vpop.eup %4340 }
 0xf1d   : > { %v2529_v29 = vsel %vm2263_vm4, %v4341_v51, 0.0 }
 0xf1e   : > { %2530 = vadd.xlane.f32.xlu0 %v2529_v29  ;;  %v2613_v29 = vld [vmem:[%s5711_s16 + $0x8] sm:$0xff] }
 0xf1f   : > { %2363 = vmatpush.bf16.msrb.mxu0 %v2346_v53 }
 0xf20   : > { %v4343_v57 = vpop.eup %4342 }
 0xf21   : > { %v2452_v56 = vpop.permute.xlu2 %2451  ;;  %v2447_v59 = vmul.f32 %v4343_v57, %v4337_v41 }
 0xf22   : > { %v2458_v24 = vsel %vm1593_vm6, %v2452_v56, 0  ;;  %4057 = vmatmul.msk.bf16.vlgmr.msrb.gmra.mxu0 %vm2263_vm4, %v2344_v43 }
 0xf23   : > { %2466 = vmatpush.bf16.msra.mxu0 %v2458_v24  ;;  %v2448_v60 = vpack.c.bf16 %v2447_v59, %v2447_v59 }
 0xf29   : > { %v2450_v58 = vpop.permute.xlu2 %2449 }
 0xf2a   : > { %2467 = vmatpush.bf16.msra.mxu0 %v2450_v58 }
 0xf2e   : > { %2574 = vmatpush.bf16.msrb.mxu0 %v2565_v21  ;;  %v2688_v21 = vld [vmem:[%s5713_s17 + $0x48] sm:$0xff] }
 0xf32   : > { %2537 = vrot.lane.b32.xlu0 %v5091_v16, %s5708_s26  ;;  %4061 = vmatmul.msk.bf16.vlgmr.msra.gmra.mxu0 %vm2263_vm4, %v2448_v60 }
 0xf91   : > { %v2531_v3 = vpop.xlane.xlu0 %2530 }
 0xf92   : > { %4344 = vrcp.f32 %v2531_v3 }
 0xf98   : > { %v4345_v16 = vpop.eup %4344 }
 0xf99   : > { %v2533_v9 = vmul.f32 %v4345_v16, %v4341_v51  ;;  %v2615_v51 = vld [vmem:[%s5711_s16 + $0x18] sm:$0xff] }
 0xf9a   : > { %v2618_v52 = vpack.c.bf16 %v2615_v51, %v2614_v50  ;;  %v2694_v16 = vld [vmem:[%s5713_s17 + $0x78] sm:$0xff] }
 0xf9b   : > { %v2534_v12 = vpack.c.bf16 %v2533_v9, %v2533_v9  ;;  %v2692_v9 = vld [vmem:[%s5713_s17 + $0x68] sm:$0xff] }
 0xf9f   : > { %v2365_v4 = vpop.f32.mrf.mxu0 }
 0xfa0   : > { %v2369_v6 = vpack.c.bf16 %v2365_v4, %v2365_v4 }
 0xfa2   : > { %4058 = vmatmul.msk.bf16.vlgmr.msra.gmra.mxu1 %vm1829_vm12, %v2369_v6  ;;  %v2693_v6 = vld [vmem:[%s5712_s22 + $0x70] sm:$0xff]  ;;  %s5716_s22 = sld [smem:[#allocation44_spill]] }
 0xfa3   : > { %2632 = vmatpush.bf16.msra.mxu1 %v2618_v52 }
 0xfa4   : > { %v2538_v7 = vpop.permute.xlu0 %2537 }
 0xfa5   : > { %v2544_v8 = vsel %vm1593_vm6, %v2538_v7, 0  ;;  %v2703_v7 = vpack.c.bf16 %v2694_v16, %v2693_v6 }
 0xfa6   : > { %2552 = vmatpush.bf16.msrb.mxu3 %v2544_v8  ;;  %v4274_v8 = vld [vmem:[%s5714_s28] ss:$0 sm:$0xff]  ;;  %s5718_s28 = smov 64  }
 0xfa7   : > { %v2367_v10 = vpop.f32.mrf.mxu0  ;;  %2704 = vmatpush.bf16.msrb.mxu2 %v2703_v7 }
 0xfa8   : > { %v2702_v10 = vpack.c.bf16 %v2692_v9, %v2691_v2  ;;  %s5717_s24 = smov %s5716_s22 }
 0xfaa   : > { %2553 = vmatpush.bf16.msrb.mxu3 %v2536_v11 }
 0xfab   : > { %2705 = vmatpush.bf16.msrb.mxu2 %v2702_v10  ;;  %v4275_v10 = vld [vmem:[%s5716_s22] ss:$0 sm:$0xff]  ;;  %s5719_s22 = smov 56  }
 0xfad   : > { %4064 = vmatmul.msk.bf16.vlgmr.msrb.gmra.mxu3 %vm2263_vm4, %v2534_v12  ;;  %v2689_v12 = vld [vmem:[%s5713_s17 + $0x50] sm:$0xff] }
 0xfaf   : > { %v2469_v13 = vpop.f32.mrf.mxu0 }
 0xfb0   : > { %v2473_v14 = vpack.c.bf16 %v2469_v13, %v2469_v13  ;;  %v2690_v13 = vld [vmem:[%s5713_s17 + $0x58] sm:$0xff] }
 0xfb2   : > { %4062 = vmatmul.msk.bf16.vlgmr.msrb.gmra.mxu1 %vm1829_vm12, %v2473_v14  ;;  %v2701_v14 = vpack.c.bf16 %v2690_v13, %v2689_v12 }
 0xfb4   : > { %2706 = vmatpush.bf16.msrb.mxu2 %v2701_v14 }
 0xfb7   : > { %v2471_v15 = vpop.f32.mrf.mxu0 }
0x101f   : > { %v2386_v31 = vpop.f32.mrf.mxu1 }
0x1020   : > { %v2406_v23 = vadd.f32 %v5174_v30, %v2386_v31  ;;  %v2700_v31 = vpack.c.bf16 %v2688_v21, %v2687_v19 }
0x1022   : > { %2707 = vmatpush.bf16.msrb.mxu2 %v2700_v31 }
0x1027   : > { %v2388_v22 = vpop.f32.mrf.mxu1 }
0x102f   : > { %v2490_v25 = vpop.f32.mrf.mxu1 }
0x1030   : > { %v2494_v26 = vadd.f32 %v2490_v25, %v2406_v23  ;;  %v2555_v32 = vpop.f32.mrf.mxu3 }
0x1031   : > { %v2559_v34 = vpack.c.bf16 %v2555_v32, %v2555_v32  ;;  %v2686_v32 = vld [vmem:[%s5713_s17 + $0x38] sm:$0xff] }
0x1033   : > { %4065 = vmatmul.msk.bf16.vlgmr.msrb.gmra.mxu0 %vm1829_vm12, %v2559_v34 }
0x1037   : > { %v2492_v35 = vpop.f32.mrf.mxu1 }
0x1038   : > { %v2557_v36 = vpop.f32.mrf.mxu3  ;;  %v2683_v35 = vld [vmem:[%s5713_s17 + $0x20] sm:$0xff] }
0x1039   : > { %v2684_v36 = vld [vmem:[%s5713_s17 + $0x28] sm:$0xff] }
0x10b0   : > { %v2576_v39 = vpop.f32.mrf.mxu0 }
0x10b1   : > { %v2580_v40 = vadd.f32 %v2576_v39, %v2494_v26  ;;  %v2685_v26 = vld [vmem:[%s5713_s17 + $0x30] sm:$0xff] }
0x10b2   : > { %v2699_v34 = vpack.c.bf16 %v2686_v32, %v2685_v26  ;;  %v4070_v26 = vld [vmem:[%s5691_s6 + $0x28] sm:$0xff] }
0x10b3   : > { %v2584_v41 = vadd.f32 %v4273_v37, %v2580_v40  ;;  %v2698_v37 = vpack.c.bf16 %v2684_v36, %v2683_v35  ;;  %v2681_v40 = vld [vmem:[%s5713_s17 + $0x10] sm:$0xff] }
0x10b4   : > { %2708 = vmatpush.bf16.msrb.mxu2 %v2699_v34 }
0x10b5   : > { %v5207_v44 = vadd.f32 %v2584_v41, %v5108_v54  ;;  %v2612_v54 = vld [vmem:[%s5711_s16] sm:$0xff]  ;;  %v2682_v41 = vld [vmem:[%s5713_s17 + $0x18] sm:$0xff] }
0x10b6   : > { %v2617_v53 = vpack.c.bf16 %v2613_v29, %v2612_v54 }
0x10b7   : > { %v2586_v30 = vsel %vm1369_vm1, %v5207_v44, 0.0 }
0x10b8   : > { %2587 = vadd.xlane.f32.xlu1 %v2586_v30  ;;  %v2578_v45 = vpop.f32.mrf.mxu0  ;;  %2633 = vmatpush.bf16.msra.mxu1 %v2617_v53 }
0x10b9   : > { %2709 = vmatpush.bf16.msrb.mxu2 %v2698_v37  ;;  %v2697_v45 = vpack.c.bf16 %v2682_v41, %v2681_v40 }
0x10bd   : > { %2710 = vmatpush.bf16.msrb.mxu2 %v2697_v45 }
0x112b   : > { %v2588_v46 = vpop.xlane.xlu1 %2587 }
0x112c   : > { %v2589_v48 = vmul.f32 %v2588_v46, %v4988_v47 }
0x112e   : > { %v2590_v49 = vsub.f32 %v5207_v44, %v2589_v48 }
0x1130   : > { %v2591_v27 = vmul.f32 %v2590_v49, %v2590_v49 }
0x1132   : > { %v2592_v28 = vsel %vm1369_vm1, %v2591_v27, 0.0  ;;  %v2680_v27 = vld [vmem:[%s5713_s17 + $0x8] sm:$0xff] }
0x1133   : > { %2593 = vadd.xlane.f32.xlu2 %v2592_v28 }
0x11a6   : > { %v2594_v43 = vpop.xlane.xlu2 %2593 }
0x11a7   : > { %v2595_v55 = vmul.f32 %v2594_v43, %v4988_v47 }
0x11a9   : > { %v2596_v56 = vadd.f32 1e-05, %v2595_v55 }
0x11ab   : > { %4346 = vrsqrt.f32 %v2596_v56  ;;  %vm2603_vm7 = vweird.f32 %v2596_v56 }
0x11b1   : > { %v4347_v24 = vpop.eup %4346 }
0x11b2   : > { %v2598_v57 = vmul.f32 %v4347_v24, %v2596_v56  ;;  %vm2604_vm5 = vweird.f32 %v4347_v24 }
0x11b3   : > { %vm2605_vm8 = vmor %vm2603_vm7, %vm2604_vm5 }
0x11b4   : > { %v2599_v58 = vmul.f32 %v4347_v24, %v2598_v57 }
0x11b6   : > { %v2600_v59 = vmul.f32 0.5, %v2599_v58 }
0x11b8   : > { %v2601_v60 = vsub.f32 1.5, %v2600_v59 }
0x11ba   : > { %v2602_v38 = vmul.f32 %v4347_v24, %v2601_v60 }
0x11bc   : > { %v2606_v62 = vsel %vm2605_vm8, %v4347_v24, %v2602_v38 }
0x11bd   : > { %v2607_v63 = vmul.f32 %v2606_v62, %v2590_v49  ;;  %v2679_v49 = vld [vmem:[%s5713_s17] sm:$0xff] }
0x11be   : > { %v2696_v51 = vpack.c.bf16 %v2680_v27, %v2679_v49 }
0x11bf   : > { %v2609_v1 = vmul.f32 %v2608_v61, %v2607_v63 }
0x11c0   : > { %2711 = vmatpush.bf16.msrb.mxu2 %v2696_v51 }
0x11c1   : > { %v2611_v3 = vadd.f32 %v2610_v0, %v2609_v1 }
0x11c3   : > { %v2616_v4 = vpack.c.bf16 %v2611_v3, %v2611_v3 }
0x11c5   : > { %4066 = vmatmul.msk.bf16.vlgmr.msra.gmra.mxu1 %vm1369_vm1, %v2616_v4  ;;  %v4578_v4 = vmov -1.0  }
0x1242   : > { %v2635_v11 = vpop.f32.mrf.mxu1 }
0x1243   : > { %v5227_v5 = vadd.f32 %v4274_v8, %v2635_v11 }
0x1245   : > { %v2640_v15 = vmul.f32 0.70710677, %v5227_v5  ;;  %v2639_v7 = vmul.f32 0.5, %v5227_v5 }
0x1247   : > { %v2643_v17 = vand.u32 2147483647, %v2640_v15  ;;  %vm2641_vm15 = vcmp.ge.f32.partialorder %v2640_v15, 0.0 }
0x1248   : > { %v2642_v6 = vsel %vm2641_vm15, 1.0, %v4578_v4 }
0x1249   : > { %v2644_v22 = vmul.f32 0.3275911, %v2643_v17  ;;  %v2670_v43 = vsub.f32 0.0, %v2643_v17 }
0x124a   : > { %v2637_v23 = vpop.f32.mrf.mxu1 }
0x124b   : > { %v2645_v25 = vadd.f32 1.0, %v2644_v22  ;;  %v2671_v24 = vmul.f32 %v2670_v43, %v2643_v17  ;;  %v4071_v22 = vld [vmem:[%s5691_s6 + $0x30] sm:$0xff] }
0x124d   : > { %4348 = vrcp.f32 %v2645_v25  ;;  %v2657_v48 = vand.u32 2147483648, %v2645_v25  ;;  %v2655_v50 = vand.u32 2147483647, %v2645_v25  ;;  %vm2651_vm10 = vweird.f32 %v2645_v25 }
0x124e   : > { %v2672_v59 = vmul.f32 1.442695, %v2671_v24 }
0x124f   : > { %v2658_v54 = vor.u32 1.1754944e-38, %v2657_v48  ;;  %vm2656_vm13 = vcmp.eq.f32.partialorder %v2655_v50, 8.507059e+37  ;;  %v5262_v48 = vld [vmem:[%s5693_s5 + $0x4] sm:$0x7] }
0x1250   : > { %4350 = vpow2.f32 %v2672_v59  ;;  %v2751_v50 = vperm.slane %v5262_v48, 0 }
0x1253   : > { %v4349_v39 = vpop.eup %4348 }
0x1254   : > { %v2647_v30 = vmul.f32 %v4349_v39, %v2645_v25  ;;  %vm2652_vm9 = vweird.f32 %v4349_v39  ;;  %v4069_v25 = vld [vmem:[%s5691_s6 + $0x20] sm:$0xff] }
0x1255   : > { %vm2653_vm11 = vmor %vm2651_vm10, %vm2652_vm9  ;;  %v2759_v32 = vpack.c.bf16 %v4070_v26, %v4069_v25  ;;  %v4101_v25 = vld [vmem:[%s5696_s20 + $0x38] sm:$0xff] }
0x1256   : > { %v2648_v46 = vsub.f32 1.0, %v2647_v30  ;;  %v4351_v0 = vpop.eup %4350  ;;  %v5259_v30 = vld [vmem:[%s5692_s3 + $0x4] sm:$0x7] }
0x1257   : > { %v2749_v49 = vperm.slane %v5259_v30, 0 }
0x1258   : > { %v2649_v28 = vmul.f32 %v4349_v39, %v2648_v46 }
0x125a   : > { %v2650_v52 = vadd.f32 %v4349_v39, %v2649_v28 }
0x125c   : > { %v2654_v29 = vsel %vm2653_vm11, %v4349_v39, %v2650_v52 }
0x125d   : > { %v2659_v53 = vsel %vm2656_vm13, %v2658_v54, %v2654_v29  ;;  %v4276_v29 = vld [vmem:[%s5694_s18 + $0x1] ss:$0 sm:$0xff] }
0x125e   : > { %v2661_v55 = vmul.f32 1.0614054, %v2659_v53 }
0x1260   : > { %v2662_v56 = vadd.f32 -1.4531521, %v2661_v55 }
0x1262   : > { %v2663_v57 = vmul.f32 %v2662_v56, %v2659_v53 }
0x1264   : > { %v2664_v58 = vadd.f32 1.4214138, %v2663_v57 }
0x1266   : > { %v2665_v60 = vmul.f32 %v2664_v58, %v2659_v53 }
0x1268   : > { %v2666_v38 = vadd.f32 -0.28449672, %v2665_v60 }
0x126a   : > { %v2667_v61 = vmul.f32 %v2666_v38, %v2659_v53 }
0x126c   : > { %v2668_v62 = vadd.f32 0.2548296, %v2667_v61 }
0x126e   : > { %v2669_v63 = vmul.f32 %v2668_v62, %v2659_v53 }
0x1270   : > { %v2674_v1 = vmul.f32 %v4351_v0, %v2669_v63  ;;  %v4075_v63 = vld [vmem:[%s5695_s12 + $0x20] sm:$0xff] }
0x1271   : > { %v2848_v0 = vpack.c.bf16 %v4075_v63, %v4075_v63 }
0x1272   : > { %v2675_v3 = vsub.f32 1.0, %v2674_v1 }
0x1273   : > { %v2931_v1 = vsel %vm1866_vm14, %v2848_v0, 0 }
0x1274   : > { %v2676_v16 = vmul.f32 %v2675_v3, %v2642_v6  ;;  %2940 = vmatpush.bf16.msra.mxu2 %v2931_v1 }
0x1276   : > { %v2677_v8 = vadd.f32 1.0, %v2676_v16 }
0x1278   : > { %v2678_v2 = vmul.f32 %v2677_v8, %v2639_v7 }
0x127a   : > { %v2695_v9 = vpack.c.bf16 %v2678_v2, %v2678_v2 }
0x127c   : > { %2712 = vmatmul.bf16.vlgmr.msrb.gmra.mxu2 %v2695_v9 }
0x12ff   : > { %v2713_v11 = vpop.f32.mrf.mxu2 }
0x1300   : > { %v2717_v12 = vadd.f32 %v2713_v11, %v5207_v44  ;;  %v4072_v44 = vld [vmem:[%s5691_s6 + $0x38] sm:$0xff] }
0x1301   : > { %v2760_v23 = vpack.c.bf16 %v4072_v44, %v4071_v22 }
0x1302   : > { %v5246_v13 = vadd.f32 %v4275_v10, %v2717_v12 }
0x1303   : > { %2775 = vmatpush.bf16.msra.mxu3 %v2760_v23  ;;  %v4100_v23 = vld [vmem:[%s5696_s20 + $0x30] sm:$0xff] }
0x1304   : > { %v2727_v14 = vsel %vm1369_vm1, %v5246_v13, 0.0 }
0x1305   : > { %2728 = vadd.xlane.f32.xlu0 %v2727_v14 }
0x1307   : > { %v2715_v15 = vpop.f32.mrf.mxu2  ;;  %2776 = vmatpush.bf16.msra.mxu3 %v2759_v32  ;;  %v3169_v32 = vpack.c.bf16 %v4101_v25, %v4100_v23 }
0x1378   : > { %v2729_v5 = vpop.xlane.xlu0 %2728 }
0x1379   : > { %v2730_v17 = vmul.f32 %v2729_v5, %v4988_v47 }
0x137b   : > { %v2731_v19 = vsub.f32 %v5246_v13, %v2730_v17 }
0x137d   : > { %v2732_v21 = vmul.f32 %v2731_v19, %v2731_v19 }
0x137f   : > { %v2733_v31 = vsel %vm1369_vm1, %v2732_v21, 0.0 }
0x1380   : > { %2734 = vadd.xlane.f32.xlu1 %v2733_v31 }
0x13f3   : > { %v2735_v34 = vpop.xlane.xlu1 %2734 }
0x13f4   : > { %v2736_v35 = vmul.f32 %v2735_v34, %v4988_v47 }
0x13f6   : > { %v2737_v36 = vadd.f32 1e-05, %v2736_v35  ;;  %v4098_v35 = vld [vmem:[%s5696_s20 + $0x20] sm:$0xff] }
0x13f8   : > { %4352 = vrsqrt.f32 %v2737_v36  ;;  %vm2744_vm2 = vweird.f32 %v2737_v36 }
0x13fe   : > { %v4353_v37 = vpop.eup %4352 }
0x13ff   : > { %v2739_v39 = vmul.f32 %v4353_v37, %v2737_v36  ;;  %vm2745_vm0 = vweird.f32 %v4353_v37  ;;  %v4099_v36 = vld [vmem:[%s5696_s20 + $0x28] sm:$0xff] }
0x1400   : > { %vm2746_vm3 = vmor %vm2744_vm2, %vm2745_vm0 }
0x1401   : > { %v2740_v40 = vmul.f32 %v4353_v37, %v2739_v39 }
0x1403   : > { %v2741_v41 = vmul.f32 0.5, %v2740_v40 }
0x1405   : > { %v2742_v45 = vsub.f32 1.5, %v2741_v41 }
0x1407   : > { %v2743_v46 = vmul.f32 %v4353_v37, %v2742_v45 }
0x1409   : > { %v2747_v27 = vsel %vm2746_vm3, %v4353_v37, %v2743_v46  ;;  %v3168_v37 = vpack.c.bf16 %v4099_v36, %v4098_v35  ;;  %v4077_v36 = vld [vmem:[%s5695_s12 + $0x30] sm:$0xff] }
0x140a   : > { %v2748_v28 = vmul.f32 %v2747_v27, %v2731_v19 }
0x140c   : > { %v2750_v51 = vmul.f32 %v2749_v49, %v2748_v28 }
0x140e   : > { %v2752_v52 = vadd.f32 %v2751_v50, %v2750_v51 }
0x1410   : > { %v2758_v54 = vpack.c.bf16 %v2752_v52, %v2752_v52 }
0x1412   : > { %4074 = vmatmul.msk.bf16.vlgmr.msra.gmra.mxu3 %vm1369_vm1, %v2758_v54 }
0x1495   : > { %v2778_v53 = vpop.f32.mrf.mxu3 }
0x1496   : > { %v2779_v43 = vadd.f32 %v4276_v29, %v2778_v53 }
0x1498   : > { %v5268_v55 = vpack.c.bf16 %v2779_v43, %v2779_v43  ;;  %v2782_v56 = vmul.f32 0.35355338, %v2779_v43 }
0x149a   : > { %2793 = vrot.lane.b32.xlu2 %v5268_v55, %s5701_s13  ;;  %v2790_v57 = vpack.c.bf16 %v2782_v56, %v2782_v56 }
0x149d   : > { %v2780_v24 = vpop.f32.mrf.mxu3 }
0x14a2   : > { %2850 = vrot.lane.b32.xlu2 %v2790_v57, %s5702_s21 }
0x14aa   : > { %2948 = vrot.lane.b32.xlu2 %v5268_v55, %s5709_s23 }
0x14f4   : > { %v2794_v58 = vpop.permute.xlu2 %2793 }
0x14f5   : > { %v2799_v59 = vsel %vm1829_vm12, %v2794_v58, 0 }
0x14f6   : > { %2808 = vmatpush.bf16.xpose.msra.mxu0 %v2799_v59 }
0x14fc   : > { %v2851_v17 = vpop.permute.xlu2 %2850 }
0x14fd   : > { %4080 = vmatmul.msk.bf16.vlgmr.msra.gmra.mxu0 %vm1829_vm12, %v2790_v57 }
0x1504   : > { %v2949_v19 = vpop.permute.xlu2 %2948 }
0x1505   : > { %v2954_v22 = vsel %vm1829_vm12, %v2949_v19, 0 }
0x157a   : > { %v2810_v60 = vpop.f32.mrf.mxu0 }
0x157b   : > { %v2811_v38 = vadd.f32 %v2810_v60, %v5028_v33 }
0x157d   : > { %v2814_v61 = vsel %vm1829_vm12, %v2811_v38, -inf }
0x157e   : > { %2815 = vmax.xlane.f32.xlu0 %v2814_v61 }
0x1582   : > { %v2812_v62 = vpop.f32.mrf.mxu0 }
0x1583   : > { %v4277_v62 = vld [vmem:[%s5698_s8 + $0x1] ss:$0 sm:$0xff] }
0x1592   : > { %2826 = vrot.lane.b32.xlu0 %v5268_v55, %s5718_s28  ;;  %s5720_s28 = smov 48  }
0x159a   : > { %3026 = vrot.lane.b32.xlu0 %v5268_v55, %s5708_s26 }
0x15a2   : > { %3024 = vrot.lane.b32.xlu0 %v2790_v57, %s5704_s27 }
0x15f1   : > { %v2816_v3 = vpop.xlane.xlu0 %2815 }
0x15f2   : > { %v2817_v6 = vsub.f32 %v2811_v38, %v2816_v3 }
0x15f4   : > { %v2818_v16 = vmul.f32 1.442695, %v2817_v6 }
0x15f6   : > { %4354 = vpow2.f32 %v2818_v16 }
0x15fc   : > { %v4355_v7 = vpop.eup %4354 }
0x15fd   : > { %v2820_v8 = vsel %vm1829_vm12, %v4355_v7, 0.0 }
0x15fe   : > { %2821 = vadd.xlane.f32.xlu1 %v2820_v8 }
0x1604   : > { %v2827_v2 = vpop.permute.xlu0 %2826 }
0x1605   : > { %v2832_v9 = vsel %vm1866_vm14, %v2827_v2, 0 }
0x1606   : > { %2841 = vmatpush.bf16.msrb.mxu1 %v2832_v9 }
0x160c   : > { %v3027_v10 = vpop.permute.xlu0 %3026 }
0x160d   : > { %v3032_v11 = vsel %vm1829_vm12, %v3027_v10, 0 }
0x160e   : > { %3041 = vmatpush.bf16.xpose.msrb.mxu2 %v3032_v11 }
0x1614   : > { %v3025_v40 = vpop.permute.xlu0 %3024 }
0x1617   : > { %2852 = vrot.lane.b32.xlu1 %v5268_v55, %s5707_s11 }
0x161f   : > { %2946 = vrot.lane.b32.xlu1 %v2790_v57, %s5705_s29 }
0x1671   : > { %v2822_v12 = vpop.xlane.xlu1 %2821 }
0x1672   : > { %4356 = vrcp.f32 %v2822_v12 }
0x1678   : > { %v4357_v14 = vpop.eup %4356 }
0x1679   : > { %v2824_v15 = vmul.f32 %v4357_v14, %v4355_v7 }
0x167b   : > { %v2825_v5 = vpack.c.bf16 %v2824_v15, %v2824_v15 }
0x167d   : > { %4081 = vmatmul.msk.bf16.vlgmr.msrb.gmra.mxu1 %vm1829_vm12, %v2825_v5 }
0x1689   : > { %v2853_v21 = vpop.permute.xlu1 %2852 }
0x168a   : > { %v2858_v31 = vsel %vm1829_vm12, %v2853_v21, 0 }
0x168b   : > { %2867 = vmatpush.bf16.xpose.msrb.mxu3 %v2858_v31 }
0x1691   : > { %v2947_v44 = vpop.permute.xlu1 %2946 }
0x1692   : > { %4082 = vmatmul.msk.bf16.vlgmr.msrb.gmra.mxu3 %vm1829_vm12, %v2851_v17 }
0x1693   : > { %2963 = vmatpush.bf16.xpose.msra.mxu3 %v2954_v22 }
0x16a2   : > { %4086 = vmatmul.msk.bf16.vlgmr.msra.gmra.mxu3 %vm1829_vm12, %v2947_v44 }
0x16fa   : > { %v2843_v26 = vpop.f32.mrf.mxu1 }
0x16fb   : > { %v2847_v34 = vpack.c.bf16 %v2843_v26, %v2843_v26  ;;  %v4076_v26 = vld [vmem:[%s5695_s12 + $0x28] sm:$0xff] }
0x16fd   : > { %4085 = vmatmul.msk.bf16.vlgmr.msra.gmra.mxu2 %vm1829_vm12, %v2847_v34 }
0x16fe   : > { %3181 = vmatpush.bf16.msra.mxu2 %v3169_v32  ;;  %v2907_v32 = vpack.c.bf16 %v4076_v26, %v4076_v26 }
0x1700   : > { %v2912_v34 = vsel %vm1866_vm14, %v2907_v32, 0 }
0x1701   : > { %2921 = vmatpush.bf16.msra.mxu1 %v2912_v34 }
0x1702   : > { %v2845_v39 = vpop.f32.mrf.mxu1  ;;  %3182 = vmatpush.bf16.msra.mxu2 %v3168_v37 }
0x170d   : > { %4089 = vmatmul.msk.bf16.vlgmr.msrb.gmra.mxu2 %vm1829_vm12, %v3025_v40 }
0x1715   : > { %v2869_v41 = vpop.f32.mrf.mxu3 }
0x1716   : > { %v2870_v45 = vadd.f32 %v2869_v41, %v5028_v33 }
0x1718   : > { %v2873_v46 = vsel %vm1829_vm12, %v2870_v45, -inf }
0x1719   : > { %2874 = vmax.xlane.f32.xlu2 %v2873_v46 }
0x171d   : > { %v2871_v49 = vpop.f32.mrf.mxu3  ;;  %4103 = vmatmul.msk.bf16.vlgmr.msra.gmra.mxu2 %vm1369_vm1, %v5059_v18 }
0x1725   : > { %v2965_v27 = vpop.f32.mrf.mxu3 }
0x1726   : > { %v2966_v28 = vadd.f32 %v2965_v27, %v5028_v33 }
0x1728   : > { %v2969_v50 = vsel %vm1829_vm12, %v2966_v28, -inf }
0x1729   : > { %2970 = vmax.xlane.f32.xlu1 %v2969_v50 }
0x172d   : > { %v2967_v51 = vpop.f32.mrf.mxu3  ;;  %4104 = vmatmul.msk.bf16.gmra.mxu2 %vm1369_vm1, %v5066_v20 }
0x1780   : > { %v5311_v52 = vpop.f32.mrf.mxu2 }
0x1788   : > { %v2944_v54 = vpop.f32.mrf.mxu2 }
0x178c   : > { %v2875_v29 = vpop.xlane.xlu2 %2874 }
0x178d   : > { %v2876_v53 = vsub.f32 %v2870_v45, %v2875_v29 }
0x178f   : > { %v2877_v43 = vmul.f32 1.442695, %v2876_v53 }
0x1790   : > { %v3043_v56 = vpop.f32.mrf.mxu2 }
0x1791   : > { %4358 = vpow2.f32 %v2877_v43  ;;  %v3044_v18 = vadd.f32 %v3043_v56, %v5028_v33 }
0x1793   : > { %v3047_v24 = vsel %vm1829_vm12, %v3044_v18, -inf }
0x1794   : > { %3048 = vmax.xlane.f32.xlu0 %v3047_v24 }
0x1797   : > { %v4359_v57 = vpop.eup %4358 }
0x1798   : > { %v3045_v58 = vpop.f32.mrf.mxu2  ;;  %v2879_v59 = vsel %vm1829_vm12, %v4359_v57, 0.0 }
0x1799   : > { %2880 = vadd.xlane.f32.xlu2 %v2879_v59 }
0x179c   : > { %v2971_v20 = vpop.xlane.xlu1 %2970 }
0x179d   : > { %v2972_v60 = vsub.f32 %v2966_v28, %v2971_v20 }
0x179f   : > { %v2973_v38 = vmul.f32 1.442695, %v2972_v60 }
0x17a0   : > { %v3184_v61 = vpop.f32.mrf.mxu2 }
0x17a1   : > { %4360 = vpow2.f32 %v2973_v38  ;;  %v3185_v3 = vadd.f32 %v4277_v62, %v3184_v61 }
0x17a7   : > { %v4361_v63 = vpop.eup %4360 }
0x17a8   : > { %v3186_v0 = vpop.f32.mrf.mxu2  ;;  %v2975_v1 = vsel %vm1829_vm12, %v4361_v63, 0.0 }
0x17a9   : > { %v3187_v33 = vadd.f32 %v4277_v62, %v3186_v0  ;;  %2976 = vadd.xlane.f32.xlu1 %v2975_v1  ;;  %v4278_v1 = vld [vmem:[%s5699_s9 + $0x1] ss:$0 sm:$0xff] }
0x17ab   : > { %v5318_v6 = vpack.c.bf16 %v3187_v33, %v3185_v3 }
0x17ad   : > { %v3207_v29 = vsel %vm1829_vm12, %v5318_v6, 0 }
0x17b0   : > { %v3189_v16 = vpop.f32.mrf.mxu2 }
0x17b1   : > { %2885 = vrot.lane.b32.xlu2 %v5268_v55, %s5719_s22  ;;  %s5721_s22 = smov 40   ;;  %v3190_v37 = vadd.f32 %v4277_v62, %v3189_v16 }
0x17b3   : > { %v5335_v46 = vpack.c.bf16 %v3190_v37, %v3190_v37  ;;  %v3129_v37 = vperm.slane %v5259_v30, 1 }
0x17b5   : > { %v3210_v50 = vsel %vm1829_vm12, %v5335_v46, 0 }
0x17b8   : > { %v3191_v7 = vpop.f32.mrf.mxu2 }
0x17c2   : > { %2981 = vrot.lane.b32.xlu1 %v5268_v55, %s5720_s28  ;;  %s5725_s28 = scalar_lea.vmem [#allocation4], %s4917_s10 }
0x1807   : > { %v3049_v8 = vpop.xlane.xlu0 %3048 }
0x1808   : > { %v3050_v2 = vsub.f32 %v3044_v18, %v3049_v8  ;;  %v4078_v18 = vld [vmem:[%s5695_s12 + $0x38] sm:$0xff] }
0x1809   : > { %v3081_v24 = vpack.c.bf16 %v4078_v18, %v4078_v18 }
0x180a   : > { %v3051_v9 = vmul.f32 1.442695, %v3050_v2 }
0x180c   : > { %4362 = vpow2.f32 %v3051_v9  ;;  %v2881_v10 = vpop.xlane.xlu2 %2880 }
0x180d   : > { %4364 = vrcp.f32 %v2881_v10 }
0x1812   : > { %v4363_v11 = vpop.eup %4362 }
0x1813   : > { %v4365_v12 = vpop.eup %4364  ;;  %v3053_v14 = vsel %vm1829_vm12, %v4363_v11, 0.0 }
0x1814   : > { %v2883_v15 = vmul.f32 %v4365_v12, %v4359_v57  ;;  %v2886_v5 = vpop.permute.xlu2 %2885  ;;  %3054 = vadd.xlane.f32.xlu0 %v3053_v14  ;;  %v3086_v57 = vsel %vm1866_vm14, %v3081_v24, 0  ;;  %v4095_v14 = vld [vmem:[%s5700_s14 + $0x38] sm:$0xff] }
0x1815   : > { %v2891_v17 = vsel %vm1866_vm14, %v2886_v5, 0  ;;  %v4092_v5 = vld [vmem:[%s5700_s14 + $0x20] sm:$0xff] }
0x1816   : > { %v2884_v19 = vpack.c.bf16 %v2883_v15, %v2883_v15  ;;  %2900 = vmatpush.bf16.msrb.mxu0 %v2891_v17  ;;  %v4093_v17 = vld [vmem:[%s5700_s14 + $0x28] sm:$0xff] }
0x1819   : > { %4083 = vmatmul.msk.bf16.vlgmr.msrb.gmra.mxu0 %vm1829_vm12, %v2884_v19  ;;  %v3139_v19 = vpack.c.bf16 %v4093_v17, %v4092_v5 }
0x181c   : > { %v2977_v21 = vpop.xlane.xlu1 %2976 }
0x181d   : > { %4366 = vrcp.f32 %v2977_v21 }
0x1823   : > { %v4367_v31 = vpop.eup %4366 }
0x1824   : > { %v2979_v22 = vmul.f32 %v4367_v31, %v4361_v63 }
0x1826   : > { %v2980_v25 = vpack.c.bf16 %v2979_v22, %v2979_v22 }
0x1828   : > { %3059 = vrot.lane.b32.xlu0 %v5268_v55, %s5721_s22  ;;  %v3003_v55 = vpack.c.bf16 %v4077_v36, %v4077_v36  ;;  %s3788_s22 = sshll.u32 %s5725_s28, 4  ;;  %s3789_s22 = int_to_ptr.vmem [resolvable:$true] %s3788_s22 }
0x182a   : > { %v3008_v41 = vsel %vm1866_vm14, %v3003_v55, 0 }
0x182b   : > { %3017 = vmatpush.bf16.msrb.mxu1 %v3008_v41 }
0x1834   : > { %v2982_v44 = vpop.permute.xlu1 %2981 }
0x1835   : > { %v2987_v23 = vsel %vm1866_vm14, %v2982_v44, 0 }
0x1836   : > { %2996 = vmatpush.bf16.msra.mxu0 %v2987_v23 }
0x1839   : > { %4087 = vmatmul.msk.bf16.vlgmr.msra.gmra.mxu0 %vm1829_vm12, %v2980_v25 }
0x183a   : > { %3095 = vmatpush.bf16.msrb.mxu0 %v3086_v57 }
0x1887   : > { %v3055_v35 = vpop.xlane.xlu0 %3054 }
0x1888   : > { %4368 = vrcp.f32 %v3055_v35 }
0x188e   : > { %v4369_v39 = vpop.eup %4368 }
0x188f   : > { %v3057_v49 = vmul.f32 %v4369_v39, %v4363_v11  ;;  %v3131_v39 = vperm.slane %v5262_v48, 1 }
0x1891   : > { %v3058_v51 = vpack.c.bf16 %v3057_v49, %v3057_v49 }
0x1896   : > { %v2902_v40 = vpop.f32.mrf.mxu0 }
0x1897   : > { %v2906_v45 = vpack.c.bf16 %v2902_v40, %v2902_v40 }
0x1899   : > { %4084 = vmatmul.msk.bf16.vlgmr.msra.gmra.mxu1 %vm1829_vm12, %v2906_v45 }
0x189a   : > { %v3060_v27 = vpop.permute.xlu0 %3059 }
0x189b   : > { %v3065_v28 = vsel %vm1866_vm14, %v3060_v27, 0 }
0x189c   : > { %3074 = vmatpush.bf16.msrb.mxu3 %v3065_v28 }
0x189e   : > { %v2904_v54 = vpop.f32.mrf.mxu0 }
0x189f   : > { %4090 = vmatmul.msk.bf16.vlgmr.msrb.gmra.mxu3 %vm1829_vm12, %v3058_v51  ;;  %v4279_v51 = vld [vmem:[%s5703_s25 + $0x1] ss:$0 sm:$0xff] }
0x18a0   : > { %3218 = vmatpush.bf16.xpose.msra.mxu3 %v3210_v50 }
0x18a8   : > { %3219 = vmatpush.bf16.xpose.msra.mxu3 %v3207_v29 }
0x18b6   : > { %v2998_v53 = vpop.f32.mrf.mxu0 }
0x18b7   : > { %v3002_v43 = vpack.c.bf16 %v2998_v53, %v2998_v53 }
0x18b9   : > { %4088 = vmatmul.msk.bf16.vlgmr.msrb.gmra.mxu1 %vm1829_vm12, %v3002_v43 }
0x18be   : > { %v3000_v56 = vpop.f32.mrf.mxu0 }
0x1916   : > { %v2923_v58 = vpop.f32.mrf.mxu1 }
0x1917   : > { %v2943_v61 = vadd.f32 %v5311_v52, %v2923_v58 }
0x191e   : > { %v2925_v59 = vpop.f32.mrf.mxu1 }
0x1922   : > { %v3076_v20 = vpop.f32.mrf.mxu3 }
0x1923   : > { %v3080_v60 = vpack.c.bf16 %v3076_v20, %v3076_v20 }
0x1925   : > { %4091 = vmatmul.msk.bf16.vlgmr.msrb.gmra.mxu0 %vm1829_vm12, %v3080_v60 }
0x192a   : > { %v3078_v38 = vpop.f32.mrf.mxu3 }
0x1936   : > { %v3019_v62 = vpop.f32.mrf.mxu1 }
0x1937   : > { %v3023_v63 = vadd.f32 %v3019_v62, %v2943_v61 }
0x193e   : > { %v3021_v0 = vpop.f32.mrf.mxu1 }
0x19a2   : > { %v3097_v3 = vpop.f32.mrf.mxu0 }
0x19a3   : > { %v3101_v33 = vadd.f32 %v3097_v3, %v3023_v63 }
0x19a5   : > { %v3105_v16 = vadd.f32 %v4278_v1, %v3101_v33  ;;  %v4105_v1 = vld [vmem:[%s5706_s30 + $0x20] sm:$0xff] }
0x19a6   : > { %v3264_v3 = vpack.c.bf16 %v4105_v1, %v4105_v1 }
0x19a7   : > { %v5351_v7 = vadd.f32 %v3105_v16, %v5246_v13  ;;  %v4094_v13 = vld [vmem:[%s5700_s14 + $0x30] sm:$0xff] }
0x19a8   : > { %v3140_v15 = vpack.c.bf16 %v4095_v14, %v4094_v13  ;;  %v3355_v33 = vsel %vm1866_vm14, %v3264_v3, 0 }
0x19a9   : > { %v3107_v8 = vsel %vm1369_vm1, %v5351_v7, 0.0 }
0x19aa   : > { %3108 = vadd.xlane.f32.xlu2 %v3107_v8  ;;  %v3099_v2 = vpop.f32.mrf.mxu0  ;;  %3155 = vmatpush.bf16.msra.mxu1 %v3140_v15 }
0x19ae   : > { %3156 = vmatpush.bf16.msra.mxu1 %v3139_v19 }
0x1a1d   : > { %v3109_v52 = vpop.xlane.xlu2 %3108 }
0x1a1e   : > { %v3110_v9 = vmul.f32 %v3109_v52, %v4988_v47 }
0x1a20   : > { %v3111_v10 = vsub.f32 %v5351_v7, %v3110_v9 }
0x1a22   : > { %v3112_v11 = vmul.f32 %v3111_v10, %v3111_v10 }
0x1a24   : > { %v3113_v12 = vsel %vm1369_vm1, %v3112_v11, 0.0 }
0x1a25   : > { %3114 = vadd.xlane.f32.xlu0 %v3113_v12 }
0x1a39   : > { %3241 = vrot.lane.b32.xlu0 %v5335_v46, %s5701_s13 }
0x1a41   : > { %3268 = vrot.lane.b32.xlu0 %v5318_v6, %s5702_s21 }
0x1a49   : > { %3374 = vrot.lane.b32.xlu0 %v5335_v46, %s5705_s29 }
0x1a51   : > { %3458 = vrot.lane.b32.xlu0 %v5318_v6, %s5704_s27 }
0x1a98   : > { %v3115_v21 = vpop.xlane.xlu0 %3114 }
0x1a99   : > { %v3116_v31 = vmul.f32 %v3115_v21, %v4988_v47 }
0x1a9b   : > { %v3117_v22 = vadd.f32 1e-05, %v3116_v31 }
0x1a9d   : > { %4370 = vrsqrt.f32 %v3117_v22  ;;  %vm3124_vm7 = vweird.f32 %v3117_v22 }
0x1aa3   : > { %v4371_v44 = vpop.eup %4370 }
0x1aa4   : > { %v3119_v23 = vmul.f32 %v4371_v44, %v3117_v22  ;;  %vm3125_vm5 = vweird.f32 %v4371_v44 }
0x1aa5   : > { %vm3126_vm8 = vmor %vm3124_vm7, %vm3125_vm5 }
0x1aa6   : > { %v3120_v25 = vmul.f32 %v4371_v44, %v3119_v23 }
0x1aa8   : > { %v3121_v26 = vmul.f32 0.5, %v3120_v25 }
0x1aaa   : > { %v3122_v32 = vsub.f32 1.5, %v3121_v26 }
0x1aab   : > { %v3242_v34 = vpop.permute.xlu0 %3241 }
0x1aac   : > { %v3123_v35 = vmul.f32 %v4371_v44, %v3122_v32  ;;  %v3248_v36 = vsel %vm1593_vm6, %v3242_v34, 0 }
0x1aad   : > { %3256 = vmatpush.bf16.msra.mxu0 %v3248_v36 }
0x1aae   : > { %v3127_v55 = vsel %vm3126_vm8, %v4371_v44, %v3123_v35 }
0x1aaf   : > { %v3128_v40 = vmul.f32 %v3127_v55, %v3111_v10 }
0x1ab1   : > { %v3130_v41 = vmul.f32 %v3129_v37, %v3128_v40 }
0x1ab3   : > { %v3132_v45 = vadd.f32 %v3131_v39, %v3130_v41  ;;  %v3269_v49 = vpop.permute.xlu0 %3268 }
0x1ab4   : > { %v3276_v0 = vsel %vm1829_vm12, %v3269_v49, 0 }
0x1ab5   : > { %v3138_v27 = vpack.c.bf16 %v3132_v45, %v3132_v45 }
0x1ab7   : > { %4097 = vmatmul.msk.bf16.vlgmr.msra.gmra.mxu1 %vm1369_vm1, %v3138_v27 }
0x1abb   : > { %v3375_v28 = vpop.permute.xlu0 %3374 }
0x1abc   : > { %v3383_v50 = vsel %vm1829_vm12, %v3375_v28, 0 }
0x1abd   : > { %3391 = vmatpush.bf16.xpose.msrb.mxu2 %v3383_v50 }
0x1ac3   : > { %v3459_v13 = vpop.permute.xlu0 %3458 }
0x1ac4   : > { %v3466_v15 = vsel %vm1829_vm12, %v3459_v13, 0 }
0x1b34   : > { %v3158_v54 = vpop.f32.mrf.mxu1 }
0x1b35   : > { %v3159_v29 = vadd.f32 %v4279_v51, %v3158_v54 }
0x1b37   : > { %v3162_v53 = vmul.f32 0.35355338, %v3159_v29 }
0x1b39   : > { %v3200_v43 = vpack.c.bf16 %v3162_v53, %v3162_v53 }
0x1b3b   : > { %4110 = vmatmul.msk.bf16.vlgmr.msra.gmra.mxu3 %vm1829_vm12, %v3200_v43 }
0x1b3c   : > { %v3160_v56 = vpop.f32.mrf.mxu1 }
0x1bbe   : > { %v3221_v18 = vpop.f32.mrf.mxu3 }
0x1bbf   : > { %v3222_v24 = vadd.f32 %v3221_v18, %v5140_v42 }
0x1bc1   : > { %v3225_v57 = vsel %vm2263_vm4, %v3222_v24, -inf }
0x1bc2   : > { %3226 = vmax.xlane.f32.xlu1 %v3225_v57 }
0x1bc6   : > { %v3223_v58 = vpop.f32.mrf.mxu3 }
0x1bdb   : > { %3270 = vrot.lane.b32.xlu1 %v5335_v46, %s5702_s21 }
0x1be3   : > { %3460 = vrot.lane.b32.xlu1 %v5335_v46, %s5704_s27 }
0x1beb   : > { %3370 = vrot.lane.b32.xlu1 %v3200_v43, %s5705_s29 }
0x1c35   : > { %v3227_v59 = vpop.xlane.xlu1 %3226 }
0x1c36   : > { %v3228_v20 = vsub.f32 %v3222_v24, %v3227_v59 }
0x1c38   : > { %v3229_v60 = vmul.f32 1.442695, %v3228_v20 }
0x1c3a   : > { %4372 = vpow2.f32 %v3229_v60 }
0x1c40   : > { %v4373_v38 = vpop.eup %4372 }
0x1c41   : > { %v3231_v61 = vsel %vm2263_vm4, %v4373_v38, 0.0 }
0x1c42   : > { %3232 = vadd.xlane.f32.xlu2 %v3231_v61 }
0x1c4d   : > { %v3271_v62 = vpop.permute.xlu1 %3270 }
0x1c4e   : > { %v3279_v63 = vsel %vm1829_vm12, %v3271_v62, 0 }
0x1c4f   : > { %3287 = vmatpush.bf16.xpose.msrb.mxu1 %v3279_v63 }
0x1c55   : > { %v3461_v10 = vpop.permute.xlu1 %3460 }
0x1c56   : > { %v3469_v12 = vsel %vm1829_vm12, %v3461_v10, 0 }
0x1c57   : > { %3288 = vmatpush.bf16.xpose.msrb.mxu1 %v3276_v0 }
0x1c5a   : > { %3239 = vrot.lane.b32.xlu2 %v5318_v6, %s5701_s13  ;;  %s5722_s13 = sld [smem:[#allocation47_spill]] }
0x1c5d   : > { %v3371_v17 = vpop.permute.xlu1 %3370 }
0x1c5f   : > { %3364 = vmatpush.bf16.msra.mxu1 %v3355_v33 }
0x1c62   : > { %3266 = vrot.lane.b32.xlu2 %v3200_v43, %s5702_s21  ;;  %s5723_s21 = sld [smem:[#allocation45_spill]] }
0x1c6a   : > { %3372 = vrot.lane.b32.xlu2 %v5318_v6, %s5705_s29  ;;  %s5724_s29 = sld [smem:[#allocation46_spill]] }
0x1c72   : > { %3456 = vrot.lane.b32.xlu2 %v3200_v43, %s5704_s27  ;;  %s3802_s27 = sshll.u32 %s4928_s1, 4  ;;  %s4416_s1 = scalar_lea.hbm %s5661_s4, 2  ;;  %s5496_s27 = int_to_ptr.vmem [resolvable:$true] %s3802_s27 }
0x1cb5   : > { %v3233_v16 = vpop.xlane.xlu2 %3232 }
0x1cb6   : > { %4374 = vrcp.f32 %v3233_v16 }
0x1cbc   : > { %v4375_v8 = vpop.eup %4374 }
0x1cbd   : > { %v3235_v2 = vmul.f32 %v4375_v8, %v4373_v38  ;;  %v3240_v52 = vpop.permute.xlu2 %3239 }
0x1cbe   : > { %3257 = vmatpush.bf16.msra.mxu0 %v3240_v52 }
0x1cbf   : > { %v3236_v9 = vpack.c.bf16 %v3235_v2, %v3235_v2  ;;  %v4106_v2 = vld [vmem:[%s5706_s30 + $0x28] sm:$0xff] }
0x1cc0   : > { %v3331_v52 = vpack.c.bf16 %v4106_v2, %v4106_v2  ;;  %v3571_v2 = vperm.slane %v5262_v48, 2 }
0x1cc1   : > { %4111 = vmatmul.msk.bf16.vlgmr.msra.gmra.mxu0 %vm2263_vm4, %v3236_v9 }
0x1cc2   : > { %v3336_v9 = vsel %vm1866_vm14, %v3331_v52, 0 }
0x1cc3   : > { %3345 = vmatpush.bf16.msrb.mxu0 %v3336_v9 }
0x1cc5   : > { %v3267_v11 = vpop.permute.xlu2 %3266 }
0x1cc6   : > { %4112 = vmatmul.msk.bf16.vlgmr.msrb.gmra.mxu1 %vm1829_vm12, %v3267_v11 }
0x1cc7   : > { %3477 = vmatpush.bf16.xpose.msrb.mxu1 %v3469_v12 }
0x1ccd   : > { %v3373_v14 = vpop.permute.xlu2 %3372 }
0x1cce   : > { %v3380_v5 = vsel %vm1829_vm12, %v3373_v14, 0 }
0x1ccf   : > { %3478 = vmatpush.bf16.xpose.msrb.mxu1 %v3466_v15  ;;  %3392 = vmatpush.bf16.xpose.msrb.mxu2 %v3380_v5 }
0x1cd5   : > { %v3457_v26 = vpop.permute.xlu2 %3456 }
0x1cd6   : > { %4116 = vmatmul.msk.bf16.vlgmr.msrb.gmra.mxu2 %vm1829_vm12, %v3371_v17 }
0x1d3e   : > { %v3259_v19 = vpop.f32.mrf.mxu0 }
0x1d3f   : > { %v3263_v21 = vpack.c.bf16 %v3259_v19, %v3259_v19 }
0x1d41   : > { %4115 = vmatmul.msk.bf16.vlgmr.msra.gmra.mxu1 %vm1829_vm12, %v3263_v21 }
0x1d43   : > { %v3290_v31 = vpop.f32.mrf.mxu1 }
0x1d44   : > { %v3291_v22 = vadd.f32 %v3290_v31, %v5140_v42 }
0x1d46   : > { %v3261_v44 = vpop.f32.mrf.mxu0  ;;  %v3294_v23 = vsel %vm2263_vm4, %v3291_v22, -inf }
0x1d47   : > { %3295 = vmax.xlane.f32.xlu0 %v3294_v23 }
0x1d4b   : > { %v3292_v25 = vpop.f32.mrf.mxu1 }
0x1d51   : > { %4119 = vmatmul.msk.bf16.vlgmr.msrb.gmra.mxu1 %vm1829_vm12, %v3457_v26  ;;  %v4108_v26 = vld [vmem:[%s5706_s30 + $0x38] sm:$0xff] }
0x1d59   : > { %v3394_v32 = vpop.f32.mrf.mxu2 }
0x1d5a   : > { %v3395_v34 = vadd.f32 %v3394_v32, %v5140_v42  ;;  %v3521_v32 = vpack.c.bf16 %v4108_v26, %v4108_v26 }
0x1d5c   : > { %v3398_v35 = vsel %vm2263_vm4, %v3395_v34, -inf }
0x1d5d   : > { %3399 = vmax.xlane.f32.xlu2 %v3398_v35 }
0x1d61   : > { %v3396_v36 = vpop.f32.mrf.mxu2 }
0x1d75   : > { %3306 = vrot.lane.b32.xlu2 %v5318_v6, %s5707_s11 }
0x1d7d   : > { %3496 = vrot.lane.b32.xlu2 %v5318_v6, %s5708_s26 }
0x1dba   : > { %v3296_v37 = vpop.xlane.xlu0 %3295 }
0x1dbb   : > { %v3297_v55 = vsub.f32 %v3291_v22, %v3296_v37 }
0x1dbd   : > { %v3298_v39 = vmul.f32 1.442695, %v3297_v55 }
0x1dbe   : > { %v5412_v40 = vpop.f32.mrf.mxu1 }
0x1dbf   : > { %4376 = vpow2.f32 %v3298_v39 }
0x1dc5   : > { %v4377_v41 = vpop.eup %4376 }
0x1dc6   : > { %v3368_v45 = vpop.f32.mrf.mxu1  ;;  %v3300_v49 = vsel %vm2263_vm4, %v4377_v41, 0.0 }
0x1dc7   : > { %3301 = vadd.xlane.f32.xlu0 %v3300_v49 }
0x1dce   : > { %v3480_v27 = vpop.f32.mrf.mxu1 }
0x1dcf   : > { %v3481_v28 = vadd.f32 %v3480_v27, %v5140_v42 }
0x1dd0   : > { %v3400_v50 = vpop.xlane.xlu2 %3399 }
0x1dd1   : > { %v3401_v51 = vsub.f32 %v3395_v34, %v3400_v50  ;;  %v3484_v54 = vsel %vm2263_vm4, %v3481_v28, -inf  ;;  %v3526_v34 = vsel %vm1866_vm14, %v3521_v32, 0 }
0x1dd2   : > { %3485 = vmax.xlane.f32.xlu1 %v3484_v54 }
0x1dd3   : > { %v3402_v29 = vmul.f32 1.442695, %v3401_v51 }
0x1dd5   : > { %4378 = vpow2.f32 %v3402_v29 }
0x1dd6   : > { %v3482_v53 = vpop.f32.mrf.mxu1 }
0x1dd8   : > { %v3307_v62 = vpop.permute.xlu2 %3306 }
0x1ddb   : > { %v4379_v43 = vpop.eup %4378 }
0x1ddc   : > { %v3404_v56 = vsel %vm2263_vm4, %v4379_v43, 0.0 }
0x1ddd   : > { %3405 = vadd.xlane.f32.xlu0 %v3404_v56 }
0x1de0   : > { %v3497_v17 = vpop.permute.xlu2 %3496 }
0x1deb   : > { %3308 = vrot.lane.b32.xlu1 %v5335_v46, %s5707_s11  ;;  %s3756_s11 = sand.u32 1, %s4827_s0  }
0x1df3   : > { %3412 = vrot.lane.b32.xlu1 %v5335_v46, %s5709_s23 }
0x1dfb   : > { %3410 = vrot.lane.b32.xlu1 %v5318_v6, %s5709_s23  ;;  %s3786_s23 = scalar_lea.hbm %s5661_s4, %s4827_s0 }
0x1e3a   : > { %v3302_v59 = vpop.xlane.xlu0 %3301 }
0x1e45   : > { %v3486_v42 = vpop.xlane.xlu1 %3485 }
0x1e46   : > { %v3487_v18 = vsub.f32 %v3481_v28, %v3486_v42  ;;  %v4280_v28 = vld [vmem:[%s5710_s2 + $0x1] ss:$0 sm:$0xff]  ;;  %s5506_s2 = scalar_lea.sflag [#allocation5], %s3756_s11 }
0x1e48   : > { %v3488_v24 = vmul.f32 1.442695, %v3487_v18 }
0x1e4a   : > { %4380 = vpow2.f32 %v3488_v24 }
0x1e4b   : > { %4382 = vrcp.f32 %v3302_v59 }
0x1e50   : > { %v4381_v57 = vpop.eup %4380  ;;  %v3406_v63 = vpop.xlane.xlu0 %3405 }
0x1e51   : > { %v3490_v58 = vsel %vm2263_vm4, %v4381_v57, 0.0  ;;  %v4383_v20 = vpop.eup %4382  ;;  %4384 = vrcp.f32 %v3406_v63 }
0x1e52   : > { %3491 = vadd.xlane.f32.xlu0 %v3490_v58  ;;  %v3304_v61 = vmul.f32 %v4383_v20, %v4377_v41  ;;  %v4125_v58 = vld [vmem:[%s5711_s16 + $0x38] sm:$0xff]  ;;  %v4123_v20 = vld [vmem:[%s5711_s16 + $0x28] sm:$0xff] }
0x1e54   : > { %v3305_v6 = vpack.c.bf16 %v3304_v61, %v3304_v61 }
0x1e57   : > { %v4385_v3 = vpop.eup %4384 }
0x1e58   : > { %v3408_v16 = vmul.f32 %v4385_v3, %v4379_v43 }
0x1e5a   : > { %v3409_v8 = vpack.c.bf16 %v3408_v16, %v3408_v16  ;;  %v3569_v16 = vperm.slane %v5259_v30, 2  ;;  %v4140_v30 = vld [vmem:[%s5713_s17 + $0xe0] sm:$0xff] }
0x1e5d   : > { %v3309_v60 = vpop.permute.xlu1 %3308 }
0x1e5e   : > { %v3315_v38 = vsel %vm1593_vm6, %v3309_v60, 0 }
0x1e5f   : > { %3323 = vmatpush.bf16.msrb.mxu3 %v3315_v38 }
0x1e63   : > { %3324 = vmatpush.bf16.msrb.mxu3 %v3307_v62 }
0x1e65   : > { %v3413_v0 = vpop.permute.xlu1 %3412 }
0x1e66   : > { %v3419_v1 = vsel %vm1593_vm6, %v3413_v0, 0  ;;  %3498 = vrot.lane.b32.xlu0 %v5335_v46, %s5708_s26  ;;  %4113 = vmatmul.msk.bf16.vlgmr.msrb.gmra.mxu3 %vm2263_vm4, %v3305_v6  ;;  %v4107_v46 = vld [vmem:[%s5706_s30 + $0x30] sm:$0xff] }
0x1e67   : > { %3427 = vmatpush.bf16.msra.mxu3 %v3419_v1  ;;  %v3435_v11 = vpack.c.bf16 %v4107_v46, %v4107_v46 }
0x1e69   : > { %v3440_v15 = vsel %vm1866_vm14, %v3435_v11, 0  ;;  %v4142_v11 = vld [vmem:[%s5713_s17 + $0xf0] sm:$0xff] }
0x1e6a   : > { %3449 = vmatpush.bf16.msra.mxu0 %v3440_v15  ;;  %v4141_v15 = vld [vmem:[%s5713_s17 + $0xe8] sm:$0xff] }
0x1e6d   : > { %v3411_v33 = vpop.permute.xlu1 %3410 }
0x1e6e   : > { %3428 = vmatpush.bf16.msra.mxu3 %v3411_v33 }
0x1e72   : > { %3535 = vmatpush.bf16.msrb.mxu3 %v3526_v34 }
0x1e76   : > { %4117 = vmatmul.msk.bf16.vlgmr.msra.gmra.mxu3 %vm2263_vm4, %v3409_v8 }
0x1ec5   : > { %v3492_v10 = vpop.xlane.xlu0 %3491 }
0x1ec6   : > { %4386 = vrcp.f32 %v3492_v10 }
0x1ecc   : > { %v4387_v12 = vpop.eup %4386 }
0x1ecd   : > { %v3494_v5 = vmul.f32 %v4387_v12, %v4381_v57  ;;  %v4124_v57 = vld [vmem:[%s5711_s16 + $0x30] sm:$0xff]  ;;  %v4143_v12 = vld [vmem:[%s5713_s17 + $0xf8] sm:$0xff] }
0x1ece   : > { %v3580_v59 = vpack.c.bf16 %v4125_v58, %v4124_v57 }
0x1ecf   : > { %v3495_v19 = vpack.c.bf16 %v3494_v5, %v3494_v5  ;;  %v3666_v5 = vpack.c.bf16 %v4141_v15, %v4140_v30 }
0x1ed8   : > { %v3499_v13 = vpop.permute.xlu0 %3498 }
0x1ed9   : > { %v3505_v14 = vsel %vm1593_vm6, %v3499_v13, 0  ;;  %v3667_v13 = vpack.c.bf16 %v4143_v12, %v4142_v11 }
0x1eda   : > { %3513 = vmatpush.bf16.msra.mxu2 %v3505_v14  ;;  %v4281_v14 = vld [vmem:[%s5715_s7 + $0x1] ss:$0 sm:$0xff] }
0x1edb   : > { %3668 = vmatpush.bf16.msra.mxu1 %v3667_v13  ;;  %v4282_v13 = vld [vmem:[%s5717_s24 + $0x1] ss:$0 sm:$0xff] }
0x1ede   : > { %3514 = vmatpush.bf16.msra.mxu2 %v3497_v17 }
0x1edf   : > { %3669 = vmatpush.bf16.msra.mxu1 %v3666_v5 }
0x1ee1   : > { %4120 = vmatmul.msk.bf16.vlgmr.msra.gmra.mxu2 %vm2263_vm4, %v3495_v19  ;;  %v4138_v19 = vld [vmem:[%s5713_s17 + $0xd0] sm:$0xff] }
0x1ee9   : > { %v3326_v21 = vpop.f32.mrf.mxu3 }
0x1eea   : > { %v3330_v31 = vpack.c.bf16 %v3326_v21, %v3326_v21  ;;  %v4139_v21 = vld [vmem:[%s5713_s17 + $0xd8] sm:$0xff] }
0x1eec   : > { %4114 = vmatmul.msk.bf16.vlgmr.msrb.gmra.mxu0 %vm1829_vm12, %v3330_v31  ;;  %v3665_v31 = vpack.c.bf16 %v4139_v21, %v4138_v19 }
0x1eed   : > { %3595 = vmatpush.bf16.msrb.mxu0 %v3580_v59 }
0x1eee   : > { %3670 = vmatpush.bf16.msra.mxu1 %v3665_v31 }
0x1ef1   : > { %v3328_v22 = vpop.f32.mrf.mxu3 }
0x1ef9   : > { %v3430_v44 = vpop.f32.mrf.mxu3 }
0x1efa   : > { %v3434_v23 = vpack.c.bf16 %v3430_v44, %v3430_v44 }
0x1efc   : > { %4118 = vmatmul.msk.bf16.vlgmr.msra.gmra.mxu0 %vm1829_vm12, %v3434_v23  ;;  %v4136_v23 = vld [vmem:[%s5713_s17 + $0xc0] sm:$0xff] }
0x1f01   : > { %v3432_v25 = vpop.f32.mrf.mxu3 }
0x1f02   : > { %v4137_v25 = vld [vmem:[%s5713_s17 + $0xc8] sm:$0xff] }
0x1f03   : > { %v3664_v26 = vpack.c.bf16 %v4137_v25, %v4136_v23  ;;  %v3720_v25 = vld [vmem:[%s5722_s13] sm:$0xff] }
0x1f05   : > { %3671 = vmatpush.bf16.msra.mxu1 %v3664_v26 }
0x1f64   : > { %v3516_v35 = vpop.f32.mrf.mxu2 }
0x1f65   : > { %v3520_v36 = vpack.c.bf16 %v3516_v35, %v3516_v35 }
0x1f67   : > { %4121 = vmatmul.msk.bf16.vlgmr.msrb.gmra.mxu3 %vm1829_vm12, %v3520_v36  ;;  %v4134_v36 = vld [vmem:[%s5713_s17 + $0xb0] sm:$0xff] }
0x1f69   : > { %v3347_v37 = vpop.f32.mrf.mxu0 }
0x1f6a   : > { %v3367_v41 = vadd.f32 %v5412_v40, %v3347_v37  ;;  %v4135_v37 = vld [vmem:[%s5713_s17 + $0xb8] sm:$0xff] }
0x1f6c   : > { %v3518_v55 = vpop.f32.mrf.mxu2 }
0x1f6d   : > { %v3663_v55 = vpack.c.bf16 %v4135_v37, %v4134_v36 }
0x1f6f   : > { %3672 = vmatpush.bf16.msra.mxu1 %v3663_v55 }
0x1f71   : > { %v3349_v39 = vpop.f32.mrf.mxu0 }
0x1f72   : > { %v4132_v39 = vld [vmem:[%s5713_s17 + $0xa0] sm:$0xff] }
0x1f79   : > { %v3451_v45 = vpop.f32.mrf.mxu0 }
0x1f7a   : > { %v3455_v49 = vadd.f32 %v3451_v45, %v3367_v41  ;;  %v4133_v41 = vld [vmem:[%s5713_s17 + $0xa8] sm:$0xff] }
0x1f7b   : > { %v3662_v45 = vpack.c.bf16 %v4133_v41, %v4132_v39 }
0x1f7d   : > { %3673 = vmatpush.bf16.msra.mxu1 %v3662_v45 }
0x1f81   : > { %v3453_v27 = vpop.f32.mrf.mxu0 }
0x1f82   : > { %v4130_v27 = vld [vmem:[%s5713_s17 + $0x90] sm:$0xff] }
0x1fea   : > { %v3537_v50 = vpop.f32.mrf.mxu3 }
0x1feb   : > { %v3541_v51 = vadd.f32 %v3537_v50, %v3455_v49 }
0x1fed   : > { %v3545_v54 = vadd.f32 %v4280_v28, %v3541_v51  ;;  %v4131_v28 = vld [vmem:[%s5713_s17 + $0x98] sm:$0xff] }
0x1fee   : > { %v3661_v51 = vpack.c.bf16 %v4131_v28, %v4130_v27 }
0x1fef   : > { %v5445_v29 = vadd.f32 %v3545_v54, %v5351_v7  ;;  %v4122_v7 = vld [vmem:[%s5711_s16 + $0x20] sm:$0xff] }
0x1ff0   : > { %v3579_v60 = vpack.c.bf16 %v4123_v20, %v4122_v7  ;;  %3674 = vmatpush.bf16.msra.mxu1 %v3661_v51 }
0x1ff1   : > { %v3547_v53 = vsel %vm1369_vm1, %v5445_v29, 0.0 }
0x1ff2   : > { %3548 = vadd.xlane.f32.xlu2 %v3547_v53  ;;  %v3539_v43 = vpop.f32.mrf.mxu3  ;;  %3596 = vmatpush.bf16.msrb.mxu0 %v3579_v60 }
0x1ff3   : > { %v4128_v43 = vld [vmem:[%s5713_s17 + $0x80] sm:$0xff] }
0x2065   : > { %v3549_v40 = vpop.xlane.xlu2 %3548 }
0x2066   : > { %v3550_v56 = vmul.f32 %v3549_v40, %v4988_v47  ;;  %v4129_v40 = vld [vmem:[%s5713_s17 + $0x88] sm:$0xff] }
0x2068   : > { %v3551_v42 = vsub.f32 %v5445_v29, %v3550_v56 }
0x206a   : > { %v3552_v18 = vmul.f32 %v3551_v42, %v3551_v42 }
0x206c   : > { %v3553_v24 = vsel %vm1369_vm1, %v3552_v18, 0.0  ;;  %v3660_v18 = vpack.c.bf16 %v4129_v40, %v4128_v43 }
0x206d   : > { %3554 = vadd.xlane.f32.xlu1 %v3553_v24 }
0x206e   : > { %3675 = vmatpush.bf16.msra.mxu1 %v3660_v18 }
0x20e0   : > { %v3555_v38 = vpop.xlane.xlu1 %3554 }
0x20e1   : > { %v3556_v61 = vmul.f32 %v3555_v38, %v4988_v47 }
0x20e3   : > { %v3557_v62 = vadd.f32 1e-05, %v3556_v61 }
0x20e5   : > { %4388 = vrsqrt.f32 %v3557_v62  ;;  %vm3564_vm12 = vweird.f32 %v3557_v62 }
0x20eb   : > { %v4389_v6 = vpop.eup %4388 }
0x20ec   : > { %v3559_v63 = vmul.f32 %v4389_v6, %v3557_v62  ;;  %vm3565_vm6 = vweird.f32 %v4389_v6 }
0x20ed   : > { %vm3566_vm14 = vmor %vm3564_vm12, %vm3565_vm6 }
0x20ee   : > { %v3560_v0 = vmul.f32 %v4389_v6, %v3559_v63 }
0x20f0   : > { %v3561_v1 = vmul.f32 0.5, %v3560_v0 }
0x20f2   : > { %v3562_v3 = vsub.f32 1.5, %v3561_v1 }
0x20f4   : > { %v3563_v33 = vmul.f32 %v4389_v6, %v3562_v3 }
0x20f6   : > { %v3567_v8 = vsel %vm3566_vm14, %v4389_v6, %v3563_v33 }
0x20f7   : > { %v3568_v52 = vmul.f32 %v3567_v8, %v3551_v42 }
0x20f9   : > { %v3570_v9 = vmul.f32 %v3569_v16, %v3568_v52 }
0x20fb   : > { %v3572_v10 = vadd.f32 %v3571_v2, %v3570_v9 }
0x20fd   : > { %v3578_v46 = vpack.c.bf16 %v3572_v10, %v3572_v10 }
0x20ff   : > { %4127 = vmatmul.msk.bf16.vlgmr.msrb.gmra.mxu0 %vm1369_vm1, %v3578_v46 }
0x217c   : > { %v3598_v17 = vpop.f32.mrf.mxu0 }
0x217d   : > { %v5465_v48 = vadd.f32 %v4281_v14, %v3598_v17 }
0x217f   : > { %v3603_v22 = vmul.f32 0.70710677, %v5465_v48  ;;  %v3602_v10 = vmul.f32 0.5, %v5465_v48 }
0x2181   : > { %v3606_v44 = vand.u32 2147483647, %v3603_v22  ;;  %vm3604_vm13 = vcmp.ge.f32.partialorder %v3603_v22, 0.0  ;;  %v3722_v22 = vld [vmem:[%s5722_s13 + $0x10] sm:$0xff] }
0x2182   : > { %v3605_v52 = vsel %vm3604_vm13, 1.0, %v4578_v4 }
0x2183   : > { %v3607_v32 = vmul.f32 0.3275911, %v3606_v44  ;;  %v3633_v7 = vsub.f32 0.0, %v3606_v44 }
0x2184   : > { %v3600_v34 = vpop.f32.mrf.mxu0 }
0x2185   : > { %v3608_v35 = vadd.f32 1.0, %v3607_v32  ;;  %v3634_v38 = vmul.f32 %v3633_v7, %v3606_v44  ;;  %v3723_v44 = vld [vmem:[%s5722_s13 + $0x18] sm:$0xff] }
0x2186   : > { %v3726_v23 = vpack.c.bf16 %v3723_v44, %v3722_v22 }
0x2187   : > { %4390 = vrcp.f32 %v3608_v35  ;;  %v3620_v53 = vand.u32 2147483648, %v3608_v35  ;;  %v3618_v42 = vand.u32 2147483647, %v3608_v35  ;;  %vm3614_vm9 = vweird.f32 %v3608_v35 }
0x2188   : > { %v3635_v6 = vmul.f32 1.442695, %v3634_v38  ;;  %3740 = vmatpush.bf16.msrb.mxu2 %v3726_v23 }
0x2189   : > { %v3621_v57 = vor.u32 1.1754944e-38, %v3620_v53  ;;  %vm3619_vm11 = vcmp.eq.f32.partialorder %v3618_v42, 8.507059e+37 }
0x218a   : > { %4392 = vpow2.f32 %v3635_v6 }
0x218d   : > { %v4391_v49 = vpop.eup %4390 }
0x218e   : > { %v3610_v50 = vmul.f32 %v4391_v49, %v3608_v35  ;;  %vm3615_vm4 = vweird.f32 %v4391_v49 }
0x218f   : > { %vm3616_vm10 = vmor %vm3614_vm9, %vm3615_vm4 }
0x2190   : > { %v3611_v54 = vsub.f32 1.0, %v3610_v50  ;;  %v4393_v16 = vpop.eup %4392 }
0x2192   : > { %v3612_v56 = vmul.f32 %v4391_v49, %v3611_v54 }
0x2194   : > { %v3613_v24 = vadd.f32 %v4391_v49, %v3612_v56 }
0x2196   : > { %v3617_v58 = vsel %vm3616_vm10, %v4391_v49, %v3613_v24  ;;  %v4283_v49 = vld [vmem:[%s5723_s21] ss:$0 sm:$0xff]  ;;  %s3790_s21 = sshll.u32 %s3786_s23, 4  ;;  %s3791_s21 = int_to_ptr.hbm [resolvable:$true] %s3790_s21 }
0x2197   : > { %v3622_v59 = vsel %vm3619_vm11, %v3621_v57, %v3617_v58  ;;  %s4410_s3 = sshra.s32 %s3791_s21, 4  ;;  %s4411_s3 = int_to_ptr.hbm [resolvable:$true] %s4410_s3 }
0x2198   : > { %v3624_v20 = vmul.f32 1.0614054, %v3622_v59  ;;  %s4412_s5 = scalar_lea.hbm %s4411_s3, 1  ;;  %p4417_p0 = scmp.lt.s32.totalorder %s4411_s3, %s5661_s4 }
0x2199   : > { %p4413_p11 = scmp.ne.s32.totalorder %s4411_s3, %s4412_s5  ;;  %p4418_p1 = scmp.lt.s32.totalorder %s4416_s1, %s4412_s5 }
0x219a   : > { %v3625_v60 = vadd.f32 -1.4531521, %v3624_v20 }
0x219b   : > { %p4414_p12 = pnand %p4413_p11, %p4846_p5  ;;  %p4419_p2 = por %p4418_p1, %p4417_p0 }
0x219c   : > { %v3626_v61 = vmul.f32 %v3625_v60, %v3622_v59 }
0x219d   : > { %p4415_p13 = pneg %p4414_p12 }
0x219e   : > { %v3627_v62 = vadd.f32 1.4214138, %v3626_v61 }
0x219f   : > { %p4420_p3 = pnand %p4419_p2, %p4415_p13 }
0x21a0   : > { %v3628_v63 = vmul.f32 %v3627_v62, %v3622_v59 }
0x21a2   : > { %v3629_v0 = vadd.f32 -0.28449672, %v3628_v63 }
0x21a4   : > { %v3630_v1 = vmul.f32 %v3629_v0, %v3622_v59 }
0x21a6   : > { %v3631_v3 = vadd.f32 0.2548296, %v3630_v1 }
0x21a8   : > { %v3632_v33 = vmul.f32 %v3631_v3, %v3622_v59 }
0x21aa   : > { %v3637_v8 = vmul.f32 %v4393_v16, %v3632_v33 }
0x21ac   : > { %v3638_v2 = vsub.f32 1.0, %v3637_v8 }
0x21ae   : > { %v3639_v9 = vmul.f32 %v3638_v2, %v3605_v52 }
0x21b0   : > { %v3640_v46 = vadd.f32 1.0, %v3639_v9 }
0x21b2   : > { %v3641_v11 = vmul.f32 %v3640_v46, %v3602_v10 }
0x21b4   : > { %v3659_v12 = vpack.c.bf16 %v3641_v11, %v3641_v11 }
0x21b6   : > { %3676 = vmatmul.bf16.vlgmr.msra.gmra.mxu1 %v3659_v12 }
0x2233   : > { %v3677_v14 = vpop.f32.mrf.mxu1 }
0x2234   : > { %v3681_v30 = vadd.f32 %v3677_v14, %v5445_v29  ;;  %v3721_v29 = vld [vmem:[%s5722_s13 + $0x8] sm:$0xff] }
0x2235   : > { %v3725_v26 = vpack.c.bf16 %v3721_v29, %v3720_v25 }
0x2236   : > { %v3687_v15 = vadd.f32 %v4282_v13, %v3681_v30 }
0x2237   : > { %3741 = vmatpush.bf16.msrb.mxu2 %v3725_v26 }
0x2238   : > { %v3690_v5 = vsel %vm1369_vm1, %v3687_v15, 0.0 }
0x2239   : > { %3691 = vadd.xlane.f32.xlu0 %v3690_v5 }
0x223b   : > { %v3679_v4 = vpop.f32.mrf.mxu1 }
0x22ac   : > { %v3692_v17 = vpop.xlane.xlu0 %3691 }
0x22ad   : > { %v3693_v48 = vmul.f32 %v3692_v17, %v4988_v47 }
0x22af   : > { %v3694_v19 = vsub.f32 %v3687_v15, %v3693_v48 }
0x22b1   : > { %v3695_v21 = vmul.f32 %v3694_v19, %v3694_v19 }
0x22b3   : > { %v3696_v31 = vsel %vm1369_vm1, %v3695_v21, 0.0 }
0x22b4   : > { %3697 = vadd.xlane.f32.xlu2 %v3696_v31 }
0x2327   : > { %v3698_v32 = vpop.xlane.xlu2 %3697 }
0x2328   : > { %v3699_v34 = vmul.f32 %v3698_v32, %v4988_v47  ;;  %v4284_v47 = vld [vmem:[%s5724_s29] ss:$0 sm:$0xff]  ;;  %s3773_s29 = scalar_lea.hbm %s4794_s19, %s4827_s0 }
0x232a   : > { %v3700_v35 = vadd.f32 1e-05, %v3699_v34 }
0x232c   : > { %4394 = vrsqrt.f32 %v3700_v35  ;;  %vm3707_vm0 = vweird.f32 %v3700_v35 }
0x2332   : > { %v4395_v36 = vpop.eup %4394 }
0x2333   : > { %v3702_v37 = vmul.f32 %v4395_v36, %v3700_v35  ;;  %vm3708_vm15 = vweird.f32 %v4395_v36 }
0x2334   : > { %vm3709_vm2 = vmor %vm3707_vm0, %vm3708_vm15 }
0x2335   : > { %v3703_v55 = vmul.f32 %v4395_v36, %v3702_v37 }
0x2337   : > { %v3704_v39 = vmul.f32 0.5, %v3703_v55 }
0x2339   : > { %v3705_v41 = vsub.f32 1.5, %v3704_v39 }
0x233b   : > { %v3706_v45 = vmul.f32 %v4395_v36, %v3705_v41 }
0x233d   : > { %v3710_v27 = vsel %vm3709_vm2, %v4395_v36, %v3706_v45 }
0x233e   : > { %v3711_v28 = vmul.f32 %v3710_v27, %v3694_v19 }
0x2340   : > { %v3715_v50 = vmul.f32 %v4283_v49, %v3711_v28 }
0x2342   : > { %v3719_v51 = vadd.f32 %v4284_v47, %v3715_v50 }
0x2344   : > { %v3724_v54 = vpack.c.bf16 %v3719_v51, %v3719_v51 }
0x2346   : > { %4145 = vmatmul.msk.bf16.vlgmr.msrb.gmra.mxu2 %vm1369_vm1, %v3724_v54 }
0x2347   : > { %4423 = shalt.err (!%p4420_p3)
}
0x2348   : > { %4154 = dma.vmem_to_hbm [thread:$0]  (%p4846_p5), %s3789_s22, 16, %s3791_s21, %s5506_s2  }
0x2349   : > { %s5726_s23 = scalar_lea.vmem [#allocation2], %s4917_s10  ;;  %s3777_s28 = sshll.u32 %s3773_s29, 4  ;;  %s3778_s28 = int_to_ptr.hbm [resolvable:$true] %s3777_s28 }
0x234a   : > { %s3775_s11 = sshll.u32 %s5726_s23, 4  ;;  %s3753_s26 = scalar_lea.sflag [#allocation3], %s4917_s10  ;;  %s3776_s11 = int_to_ptr.vmem [resolvable:$true] %s3775_s11 }
0x234b   : > { %s4438_s3 = sshra.s32 %s3778_s28, 4  ;;  %s4444_s1 = scalar_lea.hbm %s4794_s19, 2  ;;  %s4439_s3 = int_to_ptr.hbm [resolvable:$true] %s4438_s3 }
0x234c   : > { %s4440_s5 = scalar_lea.hbm %s4439_s3, 1  ;;  %p4445_p9 = scmp.lt.s32.totalorder %s4439_s3, %s4794_s19 }
0x234d   : > { %p4441_p4 = scmp.ne.s32.totalorder %s4439_s3, %s4440_s5  ;;  %p4446_p10 = scmp.lt.s32.totalorder %s4444_s1, %s4440_s5 }
0x234f   : > { %p4442_p7 = pnand %p4441_p4, %p4846_p5  ;;  %p4447_p11 = por %p4446_p10, %p4445_p9 }
0x2351   : > { %p4443_p8 = pneg %p4442_p7 }
0x2353   : > { %p4448_p12 = pnand %p4447_p11, %p4443_p8 }
0x2355   : > { %4451 = shalt.err (!%p4448_p12)
}
0x2356   : > { %s5727_s22 = sld [smem:[#allocation51_spill]]  ;;  %s5729_s10 = sshll.u32 %s4827_s0, 4 }
0x2357   : > { %4153 = dma.vmem_to_hbm [thread:$0]  (%p4846_p5), %s3776_s11, 16, %s3778_s28, %s3753_s26  }
0x235c   : > { %s5728_s21 = smov %s5727_s22  ;;  %s3801_s29 = scalar_lea.hbm %s5727_s22, %s5729_s10 }
0x235d   : > { %s3804_s23 = sshll.u32 %s3801_s29, 4  ;;  %s4472_s3 = scalar_lea.hbm %s5728_s21, 32  ;;  %s3805_s23 = int_to_ptr.hbm [resolvable:$true] %s3804_s23 }
0x235e   : > { %s4466_s4 = sshra.s32 %s3805_s23, 4  ;;  %s4467_s4 = int_to_ptr.hbm [resolvable:$true] %s4466_s4 }
0x235f   : > { %s4468_s6 = scalar_lea.hbm %s4467_s4, 16  ;;  %p4473_p2 = scmp.lt.s32.totalorder %s4467_s4, %s5728_s21 }
0x2360   : > { %p4469_p13 = scmp.ne.s32.totalorder %s4467_s4, %s4468_s6  ;;  %p4474_p3 = scmp.lt.s32.totalorder %s4472_s3, %s4468_s6 }
0x2362   : > { %p4470_p0 = pnand %p4469_p13, %p4846_p5  ;;  %p4475_p4 = por %p4474_p3, %p4473_p2 }
0x2364   : > { %p4471_p1 = pneg %p4470_p0 }
0x2366   : > { %p4476_p7 = pnand %p4475_p4, %p4471_p1 }
0x2368   : > { %4479 = shalt.err (!%p4476_p7)
}
0x2369   : > { %s4579_s5 = smov 128   ;;  %s5730_s0 = sld [smem:[#allocation48_spill]] }
0x236a   : > { %s5731_s26 = sld [smem:[#allocation59_spill]]  ;;  %s4580_s28 = smov 8  }
0x236b   : > { %s5732_s11 = sld [smem:[#allocation49_spill]] }
0x236c   : > { %4155 = dma.vmem_to_hbm [thread:$0]  (%p4846_p5), %s5496_s27, 256, %s3805_s23, %s5506_s2, %s4579_s5, %s4579_s5, %s4580_s28  }
0x236f   : > { %v4285_v53 = vld [vmem:[%s5730_s0] ss:$0 sm:$0xff] }
0x2371   : > { %s1366_s1 = scalar_lea.vmem %s5732_s11, %s5731_s26 }
0x23c9   : > { %v3743_v43 = vpop.f32.mrf.mxu2 }
0x23ca   : > { %v3744_v40 = vadd.f32 %v4285_v53, %v3743_v43 }
0x23cc   : > { %3747 = vst [vmem:[%s1366_s1] sm:$0xff] %v3744_v40 }
0x23d1   : > { %v3745_v56 = vpop.f32.mrf.mxu2 }
0x23d2 PF: > { %s5733_s4 = sld [smem:[#allocation55_spill]] }
0x23d3   : > { %s5734_s6 = sld [smem:[#allocation52_spill]] }
0x23d8   : > { %p4169_p8 = scmp.ge.s32.totalorder %s5733_s4, 2 }
0x23d9   : > { %s3826_s10 = sand.u32 1, %s5734_s6  }
0x23da   : > { %p4160_p9 = pnand %p4169_p8, %p4850_p6  ;;  %s3827_s29 = scalar_lea.sflag [#allocation3], %s3826_s10 }
0x23dc   : > { %p4161_p10 = pneg %p4160_p9 }
0x23de   : > { %4497 = dma.done.wait (%p4161_p10), %s3827_s29, 16  }
0x23df   : > { %4499 = vsyncadd (%p4161_p10), %s3827_s29, 4294967280  ;;  %s5736_s2 = sadd.s32 4294967294, %s5733_s4  }
0x23e0   : > { %s3835_s15 = sand.u32 1, %s5736_s2  }
0x23e1   : > { %s3836_s27 = scalar_lea.sflag [#allocation5], %s3835_s15 }
0x23e2   : > { %4501 = dma.done.wait (%p4161_p10), %s3836_s27, 272  }
0x23e3   : > { %4503 = vsyncadd (%p4161_p10), %s3836_s27, 4294967024  ;;  %s5737_s28 = sld [smem:[#allocation56_spill]] }
0x23e4   : > { %s5738_s22 = sld [smem:[#allocation53_spill]] }
0x23e5   : > { %s5739_s23 = sld [smem:[#allocation54_spill]] }
0x23e6   : > { %s5740_s26 = sld [smem:[#allocation57_spill]] }
0x23e9   : > { %p101_p5 = scmp.ge.s32.totalorder %s5737_s28, 4  }
0x23eb   :  { %103 = sbr.rel (!%p101_p5) target bundleno = 108 (0x6c), region = 327 }
0x23f0   :  { %3851 = vsyncpa [#allocation3], 1 }
0x23f1   :  { %3853 = vsyncpa [#allocation3 + $0x1], 1 }
0x23f2   :  { %3854 = vsyncpa [#allocation5], 1 }
0x23f3   :  { %3856 = vsyncpa [#allocation5 + $0x1], 1 }

</bundles_post_ra>
